<compile_context>
chip_gen: v7x
topology: tpu7x:2x2x1
jax: 0.10.0
libtpu: 0.0.40
codegen_flags: <defaults>
</compile_context>

<pallas_src>
import numpy as np
import jax
import jax.numpy as jnp
from jax import lax
from jax.experimental import pallas as pl
from jax.experimental.pallas import tpu as pltpu


def _round_up(x, m):
    return ((x + m - 1) // m) * m


_VMEM_LIMIT_CACHE = None


def _vmem_limit_bytes():
    """Generation-aware scoped-VMEM budget: ~3/4 of physical, capped at 96 MiB."""
    global _VMEM_LIMIT_CACHE
    if _VMEM_LIMIT_CACHE is None:
        try:
            cap = int(pltpu.get_tpu_info().vmem_capacity_bytes)
        except Exception:
            cap = 64 * 1024 * 1024          # conservative fallback (fits v7x too)
        _VMEM_LIMIT_CACHE = max(32 * 1024 * 1024,
                                min((cap * 3) // 4, 96 * 1024 * 1024))
    return _VMEM_LIMIT_CACHE


def _const_spec(shape):
    """Grid-invariant block (weights / bias): fetched once, single-buffered."""
    zeros = (0,) * len(shape)
    return pl.BlockSpec(shape, lambda *_: zeros, pipeline_mode=pl.Buffered(1))


# ---------------------------------------------------------------------------
# Projection kernel: pre_gates = sum_i(in_i @ W_i) + b for both directions at once.
# Row-tiled over M = T_pad * B_p rows, fully parallel. Two bf16 outputs: the
# forward half [:, :4H] and backward half [:, 4H:] of the fused (., 8H) slab.
# ---------------------------------------------------------------------------
def _make_proj_kernel(n_in, g4):
    def kernel(*refs):
        ins = refs[:n_in]
        ws = refs[n_in:2 * n_in]
        b_ref = refs[2 * n_in]
        of_ref = refs[2 * n_in + 1]
        ob_ref = refs[2 * n_in + 2]

        def half(sl, out_ref):
            acc = jnp.dot(ins[0][...], ws[0][:, sl],
                          preferred_element_type=jnp.float32)
            for i in range(1, n_in):
                acc = acc + jnp.dot(ins[i][...], ws[i][:, sl],
                                    preferred_element_type=jnp.float32)
            out_ref[...] = (acc + b_ref[:, sl]).astype(out_ref.dtype)

        half(slice(0, g4), of_ref)          # forward-direction gates
        half(slice(g4, 2 * g4), ob_ref)     # backward-direction gates
    return kernel


def _dual_projection(inputs, weights, bias, *, h_p, tile_rows):
    """inputs: list of (M, K_i) bf16; weights: list of (K_i, 8*h_p) bf16; bias (1, 8*h_p) f32."""
    m_rows = inputs[0].shape[0]
    n_in = len(inputs)
    g4 = 4 * h_p
    g8 = 8 * h_p
    in_specs = []
    for x in inputs:
        in_specs.append(pl.BlockSpec((tile_rows, x.shape[1]), lambda r: (r, 0)))
    for w in weights:
        in_specs.append(_const_spec((w.shape[0], g8)))
    in_specs.append(_const_spec((1, g8)))
    out_specs = [pl.BlockSpec((tile_rows, g4), lambda r: (r, 0)),
                 pl.BlockSpec((tile_rows, g4), lambda r: (r, 0))]
    out_shape = [jax.ShapeDtypeStruct((m_rows, g4), jnp.bfloat16),
                 jax.ShapeDtypeStruct((m_rows, g4), jnp.bfloat16)]
    k_total = sum(x.shape[1] for x in inputs)
    cost = pl.CostEstimate(
        flops=int(2 * m_rows * k_total * g8),
        transcendentals=0,
        bytes_accessed=int(2 * m_rows * k_total + 2 * k_total * g8
                           + 4 * g8 + 2 * m_rows * g8))
    # TODO(synk): for very large hidden sizes add a second grid axis tiling the 8H
    # output columns so weight VMEM residency stays bounded independent of H.
    return pl.pallas_call(
        _make_proj_kernel(n_in, g4),
        out_shape=out_shape,
        grid_spec=pltpu.PrefetchScalarGridSpec(
            num_scalar_prefetch=0,
            grid=(m_rows // tile_rows,),
            in_specs=in_specs,
            out_specs=out_specs),
        compiler_params=pltpu.CompilerParams(
            dimension_semantics=("parallel",),
            vmem_limit_bytes=_vmem_limit_bytes()),
        cost_estimate=cost,
    )(*inputs, *weights, bias)


# ---------------------------------------------------------------------------
# Fused bidirectional recurrent kernel. Grid iterates over time chunks; the
# forward direction walks chunks 0..nc-1, the backward direction walks chunks
# nc-1..0 (via its index_map) and reversed rows inside the chunk, so each
# direction's output lands in original time order. h/c states live in f32 VMEM
# scratch and persist across grid steps.
# Gate layout (per direction, packed at init): [i | f | o | g], each h_p wide.
# ---------------------------------------------------------------------------
def _make_bilstm_kernel(tc, h_p, t_real, t_pad, unroll):
    pad = t_pad - t_real

    def kernel(pref_ref, preb_ref, whf_ref, whb_ref, outf_ref, outb_ref,
               hf, cf, hb, cb):
        ci = pl.program_id(0)

        @pl.when(ci == 0)
        def _():
            hf[...] = jnp.zeros_like(hf)
            cf[...] = jnp.zeros_like(cf)
            hb[...] = jnp.zeros_like(hb)
            cb[...] = jnp.zeros_like(cb)

        whf = whf_ref[...]
        whb = whb_ref[...]

        def cell(pre_t, h_prev, c_prev, w_hh):
            g = pre_t.astype(jnp.float32) + jnp.dot(
                h_prev.astype(jnp.bfloat16), w_hh,
                preferred_element_type=jnp.float32)
            sig = jax.nn.sigmoid(g[:, :3 * h_p])        # contiguous [i|f|o] slab
            i_g = sig[:, 0:h_p]
            f_g = sig[:, h_p:2 * h_p]
            o_g = sig[:, 2 * h_p:3 * h_p]
            g_g = jnp.tanh(g[:, 3 * h_p:])
            c_new = f_g * c_prev + i_g * g_g
            h_new = o_g * jnp.tanh(c_new)
            return h_new, c_new

        def make_step(masked):
            def step(s, carry):
                hf_prev, cf_prev = hf[...], cf[...]
                hb_prev, cb_prev = hb[...], cb[...]
                # forward direction: original time ci*tc + s
                hf_new, cf_new = cell(pref_ref[s], hf_prev, cf_prev, whf)
                # backward direction: original time t_pad-1-(ci*tc+s) (block already
                # reversed by the index_map; row tc-1-s inside the chunk)
                hb_new, cb_new = cell(preb_ref[tc - 1 - s], hb_prev, cb_prev, whb)
                if masked:
                    t = ci * tc + s
                    vf = t < t_real          # forward meets the padding last
                    vb = t >= pad            # backward meets the padding first
                    hf_new = jnp.where(vf, hf_new, hf_prev)
                    cf_new = jnp.where(vf, cf_new, cf_prev)
                    hb_new = jnp.where(vb, hb_new, hb_prev)
                    cb_new = jnp.where(vb, cb_new, cb_prev)
                hf[...] = hf_new
                cf[...] = cf_new
                hb[...] = hb_new
                cb[...] = cb_new
                outf_ref[s] = hf_new.astype(outf_ref.dtype)
                outb_ref[tc - 1 - s] = hb_new.astype(outb_ref.dtype)
                return carry
            return step

        # Only chunks that actually touch padded timesteps pay the masked path.
        needs_mask = jnp.logical_or((ci + 1) * tc > t_real, ci * tc < pad)

        @pl.when(needs_mask)
        def _():
            lax.fori_loop(0, tc, make_step(True), 0, unroll=unroll)

        @pl.when(jnp.logical_not(needs_mask))
        def _():
            lax.fori_loop(0, tc, make_step(False), 0, unroll=unroll)

    return kernel


def _bilstm_layer(pre_f, pre_b, whh_f, whh_b, *, b_p, h_p, tc, t_real, unroll=4):
    t_pad = pre_f.shape[0]
    nc = t_pad // tc
    g4 = 4 * h_p
    flops = int(2 * 2 * t_pad * b_p * h_p * g4)              # 2 recurrent matmuls/step
    transcendentals = int(2 * t_pad * b_p * 5 * h_p)          # sigmoid(3H)+tanh(2H)
    bytes_accessed = int(2 * (2 * t_pad * b_p * g4 + 2 * h_p * g4
                              + 2 * t_pad * b_p * h_p))
    # TODO(synk): on v7x the two directions could be split across the two TensorCores
    # (pl.core_map / core-parallel leading axis); kept fused (shared DMA) for v5e/v6e.
    h_f, h_b = pl.pallas_call(
        _make_bilstm_kernel(tc, h_p, t_real, t_pad, unroll),
        out_shape=[jax.ShapeDtypeStruct((t_pad, b_p, h_p), jnp.bfloat16),
                   jax.ShapeDtypeStruct((t_pad, b_p, h_p), jnp.bfloat16)],
        grid_spec=pltpu.PrefetchScalarGridSpec(
            num_scalar_prefetch=0,
            grid=(nc,),
            in_specs=[
                pl.BlockSpec((tc, b_p, g4), lambda c: (c, 0, 0)),            # pre fwd
                pl.BlockSpec((tc, b_p, g4), lambda c: (nc - 1 - c, 0, 0)),   # pre bwd
                _const_spec((h_p, g4)),                                      # W_hh fwd
                _const_spec((h_p, g4)),                                      # W_hh bwd
            ],
            out_specs=[
                pl.BlockSpec((tc, b_p, h_p), lambda c: (c, 0, 0)),           # h fwd
                pl.BlockSpec((tc, b_p, h_p), lambda c: (nc - 1 - c, 0, 0)),  # h bwd
            ],
            scratch_shapes=[pltpu.VMEM((b_p, h_p), jnp.float32)
                            for _ in range(4)],
        ),
        compiler_params=pltpu.CompilerParams(
            dimension_semantics=("arbitrary",),      # sequential time recurrence
            vmem_limit_bytes=_vmem_limit_bytes()),
        cost_estimate=pl.CostEstimate(flops=flops, transcendentals=transcendentals,
                                      bytes_accessed=bytes_accessed),
    )(pre_f, pre_b, whh_f, whh_b)
    return h_f, h_b


# ---------------------------------------------------------------------------
# Final Linear + log_softmax, fused, row-tiled, with a 128-lane-padded output
# (padded classes masked to -1e30 before the reduction). Output stays f32.
# ---------------------------------------------------------------------------
def _make_fc_kernel(c_real, c_pad):
    def kernel(hf_ref, hb_ref, wt_ref, wb_ref, b_ref, o_ref):
        logits = (jnp.dot(hf_ref[...], wt_ref[...], preferred_element_type=jnp.float32)
                  + jnp.dot(hb_ref[...], wb_ref[...], preferred_element_type=jnp.float32)
                  + b_ref[...])
        if c_pad > c_real:
            col = lax.broadcasted_iota(jnp.int32, logits.shape, 1)
            logits = jnp.where(col < c_real, logits, jnp.float32(-1e30))
        m = jnp.max(logits, axis=-1, keepdims=True)
        y = logits - m
        lse = jnp.log(jnp.sum(jnp.exp(y), axis=-1, keepdims=True))
        o_ref[...] = (y - lse).astype(o_ref.dtype)
    return kernel


def _fc_logsoftmax(hf2d, hb2d, w_top, w_bot, b, *, c_real, tile_rows):
    m_rows, h_p = hf2d.shape
    c_pad = w_top.shape[1]
    cost = pl.CostEstimate(
        flops=int(2 * m_rows * 2 * h_p * c_pad),
        transcendentals=int(m_rows * c_pad),
        bytes_accessed=int(2 * 2 * m_rows * h_p + 2 * 2 * h_p * c_pad
                           + 4 * c_pad + 4 * m_rows * c_pad))
    return pl.pallas_call(
        _make_fc_kernel(c_real, c_pad),
        out_shape=jax.ShapeDtypeStruct((m_rows, c_pad), jnp.float32),
        grid_spec=pltpu.PrefetchScalarGridSpec(
            num_scalar_prefetch=0,
            grid=(m_rows // tile_rows,),
            in_specs=[
                pl.BlockSpec((tile_rows, h_p), lambda r: (r, 0)),
                pl.BlockSpec((tile_rows, h_p), lambda r: (r, 0)),
                _const_spec((h_p, c_pad)),
                _const_spec((h_p, c_pad)),
                _const_spec((1, c_pad)),
            ],
            out_specs=pl.BlockSpec((tile_rows, c_pad), lambda r: (r, 0)),
        ),
        compiler_params=pltpu.CompilerParams(
            dimension_semantics=("parallel",),
            vmem_limit_bytes=_vmem_limit_bytes()),
        cost_estimate=cost,
    )(hf2d, hb2d, w_top, w_bot, b)


# ---------------------------------------------------------------------------
# Parameters. PyTorch-style U(-1/sqrt(H), 1/sqrt(H)) init; weights are repacked
# for the kernels: gates reordered to [i|f|o|g], each gate padded to H_p lanes
# (zeros), both directions' input projections fused to (K_p, 8H_p), the 2H input
# of layers>0 / FC split into (h_fwd, h_bwd) halves, and matmul operands cast to
# bf16. Raw f32 (PyTorch-layout) copies are kept for the numpy reference check.
# ---------------------------------------------------------------------------
def init_params(key, input_dim, hidden_dim, output_dim, num_layers=3):
    hid = hidden_dim
    h_p = _round_up(hid, 128)
    d_p = _round_up(input_dim, 128)
    n_cls = output_dim + 1
    c_p = _round_up(n_cls, 128)
    scale = 1.0 / (hid ** 0.5)
    gate_order = jnp.array([0, 1, 3, 2])   # PyTorch [i,f,g,o] -> packed [i|f|o|g]
    bf16 = jnp.bfloat16

    def uni(k, shape, s):
        return jax.random.uniform(k, shape, minval=-s, maxval=s, dtype=jnp.float32)

    def pack_cols(w_t):
        # w_t: (rows, 4*hid), columns in PyTorch gate order -> (rows, 4*h_p)
        rows = w_t.shape[0]
        w4 = w_t.reshape(rows, 4, hid)[:, gate_order, :]
        w4 = jnp.pad(w4, ((0, 0), (0, 0), (0, h_p - hid)))
        return w4.reshape(rows, 4 * h_p)

    def pack_bias(b):
        b4 = b.reshape(4, hid)[gate_order, :]
        b4 = jnp.pad(b4, ((0, 0), (0, h_p - hid)))
        return b4.reshape(1, 4 * h_p)

    raw_layers = []
    packed_layers = []
    for layer in range(num_layers):
        in_dim = input_dim if layer == 0 else 2 * hid
        raw_dirs = []
        gen = []
        for _d in range(2):
            key, k1, k2, k3, k4 = jax.random.split(key, 5)
            wih = uni(k1, (4 * hid, in_dim), scale)
            whh = uni(k2, (4 * hid, hid), scale)
            bih = uni(k3, (4 * hid,), scale)
            bhh = uni(k4, (4 * hid,), scale)
            b = bih + bhh
            gen.append((wih, whh, b))
            raw_dirs.append(dict(wih=np.asarray(wih), whh=np.asarray(whh),
                                 b=np.asarray(b)))
        raw_layers.append(raw_dirs)

        whh_f = jnp.pad(pack_cols(gen[0][1].T), ((0, h_p - hid), (0, 0))).astype(bf16)
        whh_b = jnp.pad(pack_cols(gen[1][1].T), ((0, h_p - hid), (0, 0))).astype(bf16)
        b_fused = jnp.concatenate([pack_bias(gen[0][2]), pack_bias(gen[1][2])], axis=1)

        if layer == 0:
            w_f = jnp.pad(pack_cols(gen[0][0].T), ((0, d_p - input_dim), (0, 0)))
            w_b = jnp.pad(pack_cols(gen[1][0].T), ((0, d_p - input_dim), (0, 0)))
            w_in = [jnp.concatenate([w_f, w_b], axis=1).astype(bf16)]   # [(D_p, 8H_p)]
        else:
            tops, bots = [], []
            for d in range(2):
                wih = gen[d][0]                                          # (4H, 2H)
                tops.append(jnp.pad(pack_cols(wih[:, :hid].T), ((0, h_p - hid), (0, 0))))
                bots.append(jnp.pad(pack_cols(wih[:, hid:].T), ((0, h_p - hid), (0, 0))))
            w_in = [jnp.concatenate(tops, axis=1).astype(bf16),          # applied to h_fwd
                    jnp.concatenate(bots, axis=1).astype(bf16)]          # applied to h_bwd

        packed_layers.append(dict(w_in=w_in, b=b_fused, whh_f=whh_f, whh_b=whh_b))

    kf = 1.0 / ((2 * hid) ** 0.5)
    key, k1, k2 = jax.random.split(key, 3)
    fc_w = uni(k1, (n_cls, 2 * hid), kf)
    fc_b = uni(k2, (n_cls,), kf)
    fc_w_top = jnp.pad(fc_w[:, :hid].T, ((0, h_p - hid), (0, c_p - n_cls))).astype(bf16)
    fc_w_bot = jnp.pad(fc_w[:, hid:].T, ((0, h_p - hid), (0, c_p - n_cls))).astype(bf16)
    fc_b_p = jnp.pad(fc_b, (0, c_p - n_cls)).reshape(1, c_p)

    return dict(
        lstm=packed_layers,
        fc_w_top=fc_w_top, fc_w_bot=fc_w_bot, fc_b=fc_b_p,
        config=dict(H=hid, H_p=h_p, D=input_dim, D_p=d_p, C=n_cls, C_p=c_p),
        raw=dict(lstm=raw_layers, fc_w=np.asarray(fc_w), fc_b=np.asarray(fc_b)),
    )


# ---------------------------------------------------------------------------
# Forward pass (matches the PyTorch module in eval/inference mode).
# ---------------------------------------------------------------------------
def speech_recognition_forward(params, x_btd, *, time_chunk=32):
    cfg = params["config"]
    h_p, d_p, n_cls, c_p = cfg["H_p"], cfg["D_p"], cfg["C"], cfg["C_p"]
    batch, t_real, d_in = x_btd.shape
    assert d_in == cfg["D"]

    b_p = _round_up(batch, 8)
    tc = time_chunk
    # Decoupled row tiles: recurrence walks `tc`-step chunks; projection / FC get
    # their own >=512-row tile. proj_tc is a multiple of tc so t_pad serves both.
    proj_tc = tc * max(1, 512 // (tc * b_p))
    t_pad = _round_up(t_real, proj_tc)
    tile_rows = proj_tc * b_p
    m_rows = t_pad * b_p
    g4 = 4 * h_p

    x = jnp.transpose(x_btd, (1, 0, 2)).astype(jnp.float32)              # (T, B, D)
    x = jnp.pad(x, ((0, t_pad - t_real), (0, b_p - batch), (0, d_p - d_in)))
    x = x.astype(jnp.bfloat16)

    inputs = [x.reshape(m_rows, d_p)]
    for layer in params["lstm"]:
        pf2d, pb2d = _dual_projection(inputs, layer["w_in"], layer["b"],
                                      h_p=h_p, tile_rows=tile_rows)
        pre_f = pf2d.reshape(t_pad, b_p, g4)
        pre_b = pb2d.reshape(t_pad, b_p, g4)
        h_f, h_b = _bilstm_layer(pre_f, pre_b, layer["whh_f"], layer["whh_b"],
                                 b_p=b_p, h_p=h_p, tc=tc, t_real=t_real,
                                 unroll=min(4, tc))
        inputs = [h_f.reshape(m_rows, h_p), h_b.reshape(m_rows, h_p)]

    # Dropout(0.3): inference/eval mode => identity.
    # TODO(synk): training-mode dropout mask not implemented (inference semantics).

    out2d = _fc_logsoftmax(inputs[0], inputs[1], params["fc_w_top"],
                           params["fc_w_bot"], params["fc_b"],
                           c_real=n_cls, tile_rows=tile_rows)
    out = out2d.reshape(t_pad, b_p, c_p)[:t_real, :batch, :n_cls]
    # Final (T,B,C)->(B,T,C) relayout left to XLA (single fused slice+transpose on
    # the smallest tensor).
    return jnp.transpose(out, (1, 0, 2))                                  # (B, T, C)


# ---------------------------------------------------------------------------
# Pure-numpy reference (PyTorch semantics, f32) for the correctness check.
# ---------------------------------------------------------------------------
def _reference_forward_np(raw, x_btd):
    x = np.asarray(x_btd, dtype=np.float32)
    batch, t_len, _ = x.shape

    def sigmoid(z):
        return 1.0 / (1.0 + np.exp(-z))

    inp = x
    for layer in raw["lstm"]:
        outs = []
        for d, p in enumerate(layer):
            wih, whh, b = p["wih"], p["whh"], p["b"]
            hid = whh.shape[1]
            h = np.zeros((batch, hid), np.float32)
            c = np.zeros((batch, hid), np.float32)
            hs = np.zeros((batch, t_len, hid), np.float32)
            ts = range(t_len) if d == 0 else range(t_len - 1, -1, -1)
            for t in ts:
                g = inp[:, t, :] @ wih.T + h @ whh.T + b
                i = sigmoid(g[:, :hid])
                f = sigmoid(g[:, hid:2 * hid])
                gg = np.tanh(g[:, 2 * hid:3 * hid])
                o = sigmoid(g[:, 3 * hid:])
                c = f * c + i * gg
                h = o * np.tanh(c)
                hs[:, t, :] = h
            outs.append(hs)
        inp = np.concatenate(outs, axis=-1)
    logits = inp @ raw["fc_w"].T + raw["fc_b"]
    m = logits.max(-1, keepdims=True)
    y = logits - m
    return y - np.log(np.exp(y).sum(-1, keepdims=True))


if __name__ == "__main__":
    # Small synthetic config consistent with the module's forward
    # (char2idx.pth is unavailable; pick a small synthetic vocab size).
    B, T = 2, 12
    INPUT_DIM, HIDDEN_DIM, OUTPUT_DIM = 40, 32, 12     # fc out = OUTPUT_DIM + 1 = 13

    key = jax.random.PRNGKey(0)
    key, pkey, xkey = jax.random.split(key, 3)
    params = init_params(pkey, INPUT_DIM, HIDDEN_DIM, OUTPUT_DIM, num_layers=3)
    x = jax.random.normal(xkey, (B, T, INPUT_DIM), dtype=jnp.float32)

    out = speech_recognition_forward(params, x, time_chunk=32)
    out = jax.block_until_ready(out)

    assert out.shape == (B, T, OUTPUT_DIM + 1)
    out_np = np.asarray(out)
    # log_softmax rows must exponentiate-sum to ~1 (log-softmax itself runs in f32)
    assert np.allclose(np.exp(out_np).sum(-1), 1.0, atol=1e-4)
    # numerical check against a pure-f32 numpy PyTorch-semantics reference;
    # tolerance sized for bf16 matmul operands with f32 accumulation.
    ref = _reference_forward_np(params["raw"], x)
    assert np.allclose(out_np, ref, atol=5e-2, rtol=0.0), \
        float(np.max(np.abs(out_np - ref)))
    print("KERNEL_OK")
</pallas_src>

<mosaic_0001>
module attributes {stable_mosaic.version = 11 : i64} {
  func.func @kernel(%arg0: i32, %arg1: memref<512x128xbf16, #tpu.memory_space<vmem>>, %arg2: memref<128x1024xbf16, #tpu.memory_space<vmem>>, %arg3: memref<1x1024xf32, #tpu.memory_space<vmem>>, %arg4: memref<512x512xbf16, #tpu.memory_space<vmem>>, %arg5: memref<512x512xbf16, #tpu.memory_space<vmem>>) attributes {dimension_semantics = [#tpu.dimension_semantics<parallel>], iteration_bounds = array<i64: 1>, scalar_prefetch = 0 : i64, scratch_operands = 0 : i64, tpu.core_type = #tpu.core_type<tc>, window_params = [{transform_indices = @transform_0, window_bounds = array<i64: 512, 128>}, {pipeline_mode = #tpu.pipeline_mode<synchronous>, transform_indices = @transform_1, window_bounds = array<i64: 128, 1024>}, {pipeline_mode = #tpu.pipeline_mode<synchronous>, transform_indices = @transform_2, window_bounds = array<i64: 1, 1024>}, {transform_indices = @transform_3, window_bounds = array<i64: 512, 512>}, {transform_indices = @transform_4, window_bounds = array<i64: 512, 512>}]} {
    %c0 = arith.constant 0 : index
    %c0_0 = arith.constant 0 : index
    %0 = vector.load %arg1[%c0, %c0_0] : memref<512x128xbf16, #tpu.memory_space<vmem>>, vector<512x128xbf16>
    %c0_1 = arith.constant 0 : index
    %c0_2 = arith.constant 0 : index
    %1 = vector.load %arg2[%c0_1, %c0_2] : memref<128x1024xbf16, #tpu.memory_space<vmem>>, vector<128x512xbf16>
    %cst = arith.constant dense<0.000000e+00> : vector<512x512xf32>
    %2 = tpu.matmul %0, %1, %cst {dimension_numbers = #tpu.dot_dimension_numbers<[1], [0], [0], [1], [0, 0, 1, 1], [], []>} : vector<512x128xbf16>, vector<128x512xbf16>, vector<512x512xf32> -> vector<512x512xf32>
    %c0_3 = arith.constant 0 : index
    %c0_4 = arith.constant 0 : index
    %3 = vector.load %arg3[%c0_3, %c0_4] : memref<1x1024xf32, #tpu.memory_space<vmem>>, vector<1x512xf32>
    %4 = vector.broadcast %3 : vector<1x512xf32> to vector<512x512xf32>
    %5 = arith.addf %2, %4 : vector<512x512xf32>
    %6 = arith.truncf %5 : vector<512x512xf32> to vector<512x512xbf16>
    %c0_5 = arith.constant 0 : index
    %c0_6 = arith.constant 0 : index
    %7 = vector.load %arg4[%c0_5, %c0_6] : memref<512x512xbf16, #tpu.memory_space<vmem>>, vector<512x512xbf16>
    tpu.vector_store %arg4[%c0_5, %c0_6], %6 {strides = array<i32>} : memref<512x512xbf16, #tpu.memory_space<vmem>>, vector<512x512xbf16>,
    %c0_7 = arith.constant 0 : index
    %c0_8 = arith.constant 0 : index
    %8 = vector.load %arg1[%c0_7, %c0_8] : memref<512x128xbf16, #tpu.memory_space<vmem>>, vector<512x128xbf16>
    %c0_9 = arith.constant 0 : index
    %c512 = arith.constant 512 : index
    %9 = vector.load %arg2[%c0_9, %c512] : memref<128x1024xbf16, #tpu.memory_space<vmem>>, vector<128x512xbf16>
    %cst_10 = arith.constant dense<0.000000e+00> : vector<512x512xf32>
    %10 = tpu.matmul %8, %9, %cst_10 {dimension_numbers = #tpu.dot_dimension_numbers<[1], [0], [0], [1], [0, 0, 1, 1], [], []>} : vector<512x128xbf16>, vector<128x512xbf16>, vector<512x512xf32> -> vector<512x512xf32>
    %c0_11 = arith.constant 0 : index
    %c512_12 = arith.constant 512 : index
    %11 = vector.load %arg3[%c0_11, %c512_12] : memref<1x1024xf32, #tpu.memory_space<vmem>>, vector<1x512xf32>
    %12 = vector.broadcast %11 : vector<1x512xf32> to vector<512x512xf32>
    %13 = arith.addf %10, %12 : vector<512x512xf32>
    %14 = arith.truncf %13 : vector<512x512xf32> to vector<512x512xbf16>
    %c0_13 = arith.constant 0 : index
    %c0_14 = arith.constant 0 : index
    %15 = vector.load %arg5[%c0_13, %c0_14] : memref<512x512xbf16, #tpu.memory_space<vmem>>, vector<512x512xbf16>
    tpu.vector_store %arg5[%c0_13, %c0_14], %14 {strides = array<i32>} : memref<512x512xbf16, #tpu.memory_space<vmem>>, vector<512x512xbf16>,
    return
  }
  func.func @transform_0(%arg0: i32) -> (i32, i32) {
    %c0_i32 = arith.constant 0 : i32
    %c0_i32_0 = arith.constant 0 : i32
    return %arg0, %c0_i32 : i32, i32
  }
  func.func @transform_1(%arg0: i32) -> (i32, i32) {
    %c0_i32 = arith.constant 0 : i32
    %c0_i32_0 = arith.constant 0 : i32
    %c0_i32_1 = arith.constant 0 : i32
    return %c0_i32, %c0_i32_0 : i32, i32
  }
  func.func @transform_2(%arg0: i32) -> (i32, i32) {
    %c0_i32 = arith.constant 0 : i32
    %c0_i32_0 = arith.constant 0 : i32
    %c0_i32_1 = arith.constant 0 : i32
    return %c0_i32, %c0_i32_0 : i32, i32
  }
  func.func @transform_3(%arg0: i32) -> (i32, i32) {
    %c0_i32 = arith.constant 0 : i32
    %c0_i32_0 = arith.constant 0 : i32
    return %arg0, %c0_i32 : i32, i32
  }
  func.func @transform_4(%arg0: i32) -> (i32, i32) {
    %c0_i32 = arith.constant 0 : i32
    %c0_i32_0 = arith.constant 0 : i32
    return %arg0, %c0_i32 : i32, i32
  }
}

</mosaic_0001>

<bundles_post_ra>
// kernel: tpu_custom_call.1
= control target key start
LH: loop header
LB: loop body
LE: loop exit
PB: predicated region body
PF: predicated region fallthrough
CT: control target
= control target key end

     0   :  { %10 = vsyncpa [#allocation3], 0  ;;  %s5851_s0 = inlined_call_operand.hbm [shape: bf16[512,128], index: 0, kind: input, shape index: {}]   ;;  %s5852_s1 = inlined_call_operand.hbm [shape: bf16[128,1024], index: 1, kind: input, shape index: {}]   ;;  %s5853_s2 = inlined_call_operand.hbm [shape: f32[1,1024], index: 2, kind: input, shape index: {}]   ;;  %s5854_s3 = inlined_call_operand.hbm [shape: bf16[512,512], index: 3, kind: output, shape index: {0}]   ;;  %s5855_s4 = inlined_call_operand.hbm [shape: bf16[512,512], index: 4, kind: output, shape index: {1}]  }
   0x1   :  { %11 = vsyncpa [#allocation6], 0 }
   0x2   :  { %12 = vsyncpa [#allocation4], 0 }
   0x3   :  { %13 = vsyncpa [#allocation10], 0  ;;  %s5070_s15 = smov [#allocation5]   ;;  %s4952_s19 = scalar_lea.hbm %s5852_s1, 8192 }
   0x4   :  { %s31_s16 = sshll.u32 %s5070_s15, 4  ;;  %p4953_p0 = scmp.ne.s32.totalorder %s5852_s1, %s4952_s19  ;;  %s32_s16 = int_to_ptr.vmem [resolvable:$true] %s31_s16 }
   0x5   :  { %p4956_p1 = scmp.lt.u32.totalorder %s4952_s19, %s5852_s1 }
   0x7   :  { %p4958_p2 = pnand %p4956_p1, %p4953_p0 }
   0x9   :  { %4961 = shalt.err (!%p4958_p2)
}
   0xa   :  { %s4962_s24 = scalar_lea.vmem %s32_s16, 8192  ;;  %p4967_p4 = scmp.lt.s32.totalorder %s32_s16, %s32_s16 }
   0xb   :  { %p4963_p3 = scmp.ne.s32.totalorder %s32_s16, %s4962_s24  ;;  %p4968_p5 = scmp.lt.s32.totalorder %s4962_s24, %s4962_s24 }
   0xd   :  { %p4969_p6 = por %p4968_p5, %p4967_p4 }
   0xf   :  { %p4970_p7 = pnand %p4969_p6, %p4963_p3 }
  0x11   :  { %4973 = shalt.err (!%p4970_p7)
}
  0x12   :  { %s5071_s25 = smov 512   ;;  %s5072_s26 = smov 32  }
  0x13   :  { %37 = dma.hbm_to_vmem [thread:$0]  %s5852_s1, 8192, %s32_s16, [#allocation6], %s5071_s25, %s5071_s25, %s5072_s26  }
  0x14   :  { %s5073_s29 = smov [#allocation2]   ;;  %s4974_s7 = scalar_lea.hbm %s5851_s0, 4096 }
  0x15   :  { %s19_s30 = sshll.u32 %s5073_s29, 4  ;;  %p4975_p8 = scmp.ne.s32.totalorder %s5851_s0, %s4974_s7  ;;  %s20_s30 = int_to_ptr.vmem [resolvable:$true] %s19_s30 }
  0x16   :  { %p4978_p9 = scmp.lt.u32.totalorder %s4974_s7, %s5851_s0 }
  0x18   :  { %p4980_p10 = pnand %p4978_p9, %p4975_p8 }
  0x1a   :  { %4983 = shalt.err (!%p4980_p10)
}
  0x1b   :  { %s4984_s12 = scalar_lea.vmem %s20_s30, 4096  ;;  %p4989_p12 = scmp.lt.s32.totalorder %s20_s30, %s20_s30 }
  0x1c   :  { %p4985_p11 = scmp.ne.s32.totalorder %s20_s30, %s4984_s12  ;;  %p4990_p13 = scmp.lt.s32.totalorder %s4984_s12, %s4984_s12 }
  0x1e   :  { %p4991_p0 = por %p4990_p13, %p4989_p12 }
  0x20   :  { %p4992_p1 = pnand %p4991_p0, %p4985_p11 }
  0x22   :  { %4995 = shalt.err (!%p4992_p1)
}
  0x23   :  { %s5074_s1 = smov 64   ;;  %s5075_s13 = smov 4  }
  0x24   :  { %25 = dma.hbm_to_vmem [thread:$0]  %s5851_s0, 4096, %s20_s30, [#allocation3], %s5074_s1, %s5074_s1, %s5075_s13  }
  0x25   :  { %s5076_s16 = smov [#allocation7]   ;;  %s4996_s20 = scalar_lea.hbm %s5853_s2, 128 }
  0x26   :  { %s44_s17 = sshll.u32 %s5076_s16, 4  ;;  %p4997_p2 = scmp.ne.s32.totalorder %s5853_s2, %s4996_s20  ;;  %s45_s17 = int_to_ptr.vmem [resolvable:$true] %s44_s17 }
  0x27   :  { %p5000_p3 = scmp.lt.u32.totalorder %s4996_s20, %s5853_s2 }
  0x29   :  { %p5002_p4 = pnand %p5000_p3, %p4997_p2 }
  0x2b   :  { %5005 = shalt.err (!%p5002_p4)
}
  0x2c   :  { %s5006_s25 = scalar_lea.vmem %s45_s17, 128  ;;  %p5011_p6 = scmp.lt.s32.totalorder %s45_s17, %s45_s17 }
  0x2d   :  { %p5007_p5 = scmp.ne.s32.totalorder %s45_s17, %s5006_s25  ;;  %p5012_p7 = scmp.lt.s32.totalorder %s5006_s25, %s5006_s25 }
  0x2f   :  { %p5013_p8 = por %p5012_p7, %p5011_p6 }
  0x31   :  { %p5014_p9 = pnand %p5013_p8, %p5007_p5 }
  0x33   :  { %5017 = shalt.err (!%p5014_p9)
}
  0x34   :  { %47 = dma.hbm_to_vmem [thread:$0]  %s5853_s2, 128, %s45_s17, [#allocation6]  }
  0x35   :  { %5062 = dma.done.wait [#allocation3], 4096  }
  0x36   :  { %5063 = vsyncadd [#allocation3], 4294963200 }
  0x37   :  { %5064 = dma.done.wait [#allocation6], 8320  }
  0x38   :  { %5065 = vsyncadd [#allocation6], 4294958976  ;;  %v5077_v0 = vmov 0   ;;  %v122_v1 = vld [vmem:[#allocation5] sm:$0xff]  ;;  %v123_v3 = vld [vmem:[#allocation5 + $0x8] sm:$0xff]  ;;  %s5078_s2 = smov [#allocation8]  }
  0x39   :  { %560 = vmatprep.mubr.bf16.mxu0 %v5077_v0  ;;  %913 = vmatprep.mubr.bf16.mxu1 %v5077_v0  ;;  %v124_v2 = vld [vmem:[#allocation5 + $0x20] sm:$0xff]  ;;  %v125_v5 = vld [vmem:[#allocation5 + $0x28] sm:$0xff]  ;;  %v2194_v62 = vld [vmem:[#allocation5 + $0x10] sm:$0xff]  ;;  %s4207_s27 = sshll.u32 %s5078_s2, 4  ;;  %s4208_s27 = int_to_ptr.vmem [resolvable:$true] %s4207_s27 }
  0x3a   :  { %v4269_v4 = vcombine.high %v122_v1, %v124_v2  ;;  %v4268_v6 = vcombine.low %v122_v1, %v124_v2  ;;  %v126_v7 = vld [vmem:[#allocation5 + $0x40] sm:$0xff]  ;;  %v4271_v9 = vcombine.high %v123_v3, %v125_v5  ;;  %v4270_v10 = vcombine.low %v123_v3, %v125_v5  ;;  %v127_v12 = vld [vmem:[#allocation5 + $0x48] sm:$0xff]  ;;  %v2196_v1 = vld [vmem:[#allocation5 + $0x30] sm:$0xff]  ;;  %s5018_s28 = scalar_lea.vmem %s4208_s27, 16384  ;;  %p5023_p11 = scmp.lt.s32.totalorder %s4208_s27, %s4208_s27 }
  0x3b   :  { %v128_v8 = vld [vmem:[#allocation5 + $0x60] sm:$0xff]  ;;  %v129_v13 = vld [vmem:[#allocation5 + $0x68] sm:$0xff]  ;;  %v2195_v2 = vld [vmem:[#allocation5 + $0x18] sm:$0xff]  ;;  %p5019_p10 = scmp.ne.s32.totalorder %s4208_s27, %s5018_s28  ;;  %p5024_p12 = scmp.lt.s32.totalorder %s5018_s28, %s5018_s28 }
  0x3c   :  { %v4273_v11 = vcombine.high %v126_v7, %v128_v8  ;;  %v130_v14 = vld [vmem:[#allocation5 + $0x80] sm:$0xff]  ;;  %528 = vmatprep.subr.bf16.mxu0 %v4269_v4  ;;  %v4275_v15 = vcombine.high %v127_v12, %v129_v13  ;;  %v131_v17 = vld [vmem:[#allocation5 + $0x88] sm:$0xff]  ;;  %881 = vmatprep.subr.bf16.mxu1 %v4271_v9  ;;  %v4272_v19 = vcombine.low %v126_v7, %v128_v8  ;;  %v2197_v3 = vld [vmem:[#allocation5 + $0x38] sm:$0xff] }
  0x3d   :  { %v132_v16 = vld [vmem:[#allocation5 + $0xa0] sm:$0xff]  ;;  %v133_v18 = vld [vmem:[#allocation5 + $0xa8] sm:$0xff]  ;;  %529 = vmatpush1.bf16.msra.mxu0 %v4268_v6  ;;  %882 = vmatpush1.bf16.msra.mxu1 %v4270_v10  ;;  %v4274_v20 = vcombine.low %v127_v12, %v129_v13  ;;  %v4461_v7 = vcombine.high %v2194_v62, %v2196_v1  ;;  %v2198_v8 = vld [vmem:[#allocation5 + $0x50] sm:$0xff]  ;;  %v4463_v10 = vcombine.high %v2195_v2, %v2197_v3  ;;  %p5025_p13 = por %p5024_p12, %p5023_p11 }
  0x3e   :  { %530 = vmatprep.subr.bf16.mxu0 %v4273_v11  ;;  %v4277_v21 = vcombine.high %v130_v14, %v132_v16  ;;  %883 = vmatprep.subr.bf16.mxu1 %v4275_v15  ;;  %v4279_v22 = vcombine.high %v131_v17, %v133_v18  ;;  %v134_v23 = vld [vmem:[#allocation5 + $0xc0] sm:$0xff]  ;;  %v135_v25 = vld [vmem:[#allocation5 + $0xc8] sm:$0xff]  ;;  %v4276_v27 = vcombine.low %v130_v14, %v132_v16  ;;  %v2200_v9 = vld [vmem:[#allocation5 + $0x70] sm:$0xff] }
  0x3f   :  { %v136_v24 = vld [vmem:[#allocation5 + $0xe0] sm:$0xff]  ;;  %v137_v26 = vld [vmem:[#allocation5 + $0xe8] sm:$0xff]  ;;  %v4278_v28 = vcombine.low %v131_v17, %v133_v18  ;;  %v2199_v11 = vld [vmem:[#allocation5 + $0x58] sm:$0xff]  ;;  %v4460_v13 = vcombine.low %v2194_v62, %v2196_v1  ;;  %v4462_v16 = vcombine.low %v2195_v2, %v2197_v3  ;;  %p5026_p0 = pnand %p5025_p13, %p5019_p10 }
  0x40   :  { %v4281_v29 = vcombine.high %v134_v23, %v136_v24  ;;  %v4283_v30 = vcombine.high %v135_v25, %v137_v26  ;;  %v138_v31 = vld [vmem:[#allocation5 + $0x100] sm:$0xff]  ;;  %v139_v33 = vld [vmem:[#allocation5 + $0x108] sm:$0xff]  ;;  %v4280_v35 = vcombine.low %v134_v23, %v136_v24  ;;  %v4282_v37 = vcombine.low %v135_v25, %v137_v26  ;;  %v2201_v12 = vld [vmem:[#allocation5 + $0x78] sm:$0xff] }
  0x41   :  { %531 = vmatpush1.bf16.msra.mxu0 %v4272_v19  ;;  %884 = vmatpush1.bf16.msra.mxu1 %v4274_v20  ;;  %v140_v32 = vld [vmem:[#allocation5 + $0x120] sm:$0xff]  ;;  %v141_v34 = vld [vmem:[#allocation5 + $0x128] sm:$0xff]  ;;  %v2202_v14 = vld [vmem:[#allocation5 + $0x90] sm:$0xff]  ;;  %v4465_v19 = vcombine.high %v2198_v8, %v2200_v9  ;;  %v4467_v20 = vcombine.high %v2199_v11, %v2201_v12  ;;  %v4466_v23 = vcombine.low %v2199_v11, %v2201_v12 }
  0x42   :  { %532 = vmatprep.subr.bf16.mxu0 %v4277_v21  ;;  %885 = vmatprep.subr.bf16.mxu1 %v4279_v22  ;;  %v142_v36 = vld [vmem:[#allocation5 + $0x140] sm:$0xff]  ;;  %v4285_v38 = vcombine.high %v138_v31, %v140_v32  ;;  %v4287_v40 = vcombine.high %v139_v33, %v141_v34  ;;  %v143_v41 = vld [vmem:[#allocation5 + $0x148] sm:$0xff]  ;;  %v4284_v43 = vcombine.low %v138_v31, %v140_v32  ;;  %v2204_v15 = vld [vmem:[#allocation5 + $0xb0] sm:$0xff] }
  0x43   :  { %v144_v39 = vld [vmem:[#allocation5 + $0x160] sm:$0xff]  ;;  %v145_v42 = vld [vmem:[#allocation5 + $0x168] sm:$0xff]  ;;  %v4286_v44 = vcombine.low %v139_v33, %v141_v34  ;;  %v2203_v17 = vld [vmem:[#allocation5 + $0x98] sm:$0xff]  ;;  %v4464_v21 = vcombine.low %v2198_v8, %v2200_v9  ;;  %v4469_v24 = vcombine.high %v2202_v14, %v2204_v15 }
  0x44   :  { %v4289_v45 = vcombine.high %v142_v36, %v144_v39  ;;  %v146_v46 = vld [vmem:[#allocation5 + $0x180] sm:$0xff]  ;;  %v4291_v48 = vcombine.high %v143_v41, %v145_v42  ;;  %v147_v49 = vld [vmem:[#allocation5 + $0x188] sm:$0xff]  ;;  %v4288_v51 = vcombine.low %v142_v36, %v144_v39  ;;  %v4290_v52 = vcombine.low %v143_v41, %v145_v42  ;;  %v2205_v18 = vld [vmem:[#allocation5 + $0xb8] sm:$0xff] }
  0x45   :  { %533 = vmatpush1.bf16.msra.mxu0 %v4276_v27  ;;  %886 = vmatpush1.bf16.msra.mxu1 %v4278_v28  ;;  %v148_v47 = vld [vmem:[#allocation5 + $0x1a0] sm:$0xff]  ;;  %v149_v50 = vld [vmem:[#allocation5 + $0x1a8] sm:$0xff]  ;;  %v2206_v25 = vld [vmem:[#allocation5 + $0xd0] sm:$0xff]  ;;  %v4471_v27 = vcombine.high %v2203_v17, %v2205_v18  ;;  %v4470_v33 = vcombine.low %v2203_v17, %v2205_v18 }
  0x46   :  { %534 = vmatprep.subr.bf16.mxu0 %v4281_v29  ;;  %887 = vmatprep.subr.bf16.mxu1 %v4283_v30  ;;  %v4293_v53 = vcombine.high %v146_v46, %v148_v47  ;;  %v4295_v54 = vcombine.high %v147_v49, %v149_v50  ;;  %v150_v55 = vld [vmem:[#allocation5 + $0x1c0] sm:$0xff]  ;;  %v151_v57 = vld [vmem:[#allocation5 + $0x1c8] sm:$0xff]  ;;  %v4292_v59 = vcombine.low %v146_v46, %v148_v47  ;;  %v2208_v26 = vld [vmem:[#allocation5 + $0xf0] sm:$0xff] }
  0x47   :  { %v152_v56 = vld [vmem:[#allocation5 + $0x1e0] sm:$0xff]  ;;  %v153_v58 = vld [vmem:[#allocation5 + $0x1e8] sm:$0xff]  ;;  %v4294_v60 = vcombine.low %v147_v49, %v149_v50  ;;  %v2207_v28 = vld [vmem:[#allocation5 + $0xd8] sm:$0xff]  ;;  %v4468_v30 = vcombine.low %v2202_v14, %v2204_v15  ;;  %v4473_v34 = vcombine.high %v2206_v25, %v2208_v26  ;;  %v4472_v39 = vcombine.low %v2206_v25, %v2208_v26 }
  0x48   :  { %v4297_v61 = vcombine.high %v150_v55, %v152_v56  ;;  %v4299_v63 = vcombine.high %v151_v57, %v153_v58  ;;  %v4296_v4 = vcombine.low %v150_v55, %v152_v56  ;;  %v4298_v5 = vcombine.low %v151_v57, %v153_v58  ;;  %v4888_v6 = vld [vmem:[#allocation2] sm:$0xff]   ;;  %v4889_v22 = vld [vmem:[#allocation2 + $0x8] sm:$0xff]   ;;  %v2209_v29 = vld [vmem:[#allocation5 + $0xf8] sm:$0xff] }
  0x49   :  { %535 = vmatpush1.bf16.msra.mxu0 %v4280_v35  ;;  %888 = vmatpush1.bf16.msra.mxu1 %v4282_v37  ;;  %v2210_v31 = vld [vmem:[#allocation5 + $0x110] sm:$0xff]  ;;  %v2211_v35 = vld [vmem:[#allocation5 + $0x118] sm:$0xff]  ;;  %v4475_v37 = vcombine.high %v2207_v28, %v2209_v29  ;;  %v4892_v46 = vld [vmem:[#allocation2 + $0x20] sm:$0xff]  }
  0x4a   :  { %536 = vmatprep.subr.bf16.mxu0 %v4285_v38  ;;  %889 = vmatprep.subr.bf16.mxu1 %v4287_v40  ;;  %v2212_v32 = vld [vmem:[#allocation5 + $0x130] sm:$0xff]  ;;  %v2213_v36 = vld [vmem:[#allocation5 + $0x138] sm:$0xff]  ;;  %v4474_v40 = vcombine.low %v2207_v28, %v2209_v29  ;;  %v4893_v55 = vld [vmem:[#allocation2 + $0x28] sm:$0xff]   ;;  %v156_v29 = vlaneseq }
  0x4b   :  { %v4890_v38 = vld [vmem:[#allocation2 + $0x10] sm:$0xff]   ;;  %v4477_v41 = vcombine.high %v2210_v31, %v2212_v32  ;;  %v4479_v42 = vcombine.high %v2211_v35, %v2213_v36  ;;  %v2215_v49 = vld [vmem:[#allocation5 + $0x158] sm:$0xff]  ;;  %v4896_v58 = vld [vmem:[#allocation2 + $0x40] sm:$0xff]  }
  0x4c   :  { %v2214_v47 = vld [vmem:[#allocation5 + $0x150] sm:$0xff]  ;;  %v4895_v57 = vld [vmem:[#allocation2 + $0x38] sm:$0xff]   ;;  %v4901_v8 = vld [vmem:[#allocation2 + $0x68] sm:$0xff]  }
  0x4d   :  { %537 = vmatpush1.bf16.msra.mxu0 %v4284_v43  ;;  %890 = vmatpush1.bf16.msra.mxu1 %v4286_v44  ;;  %v4476_v43 = vcombine.low %v2210_v31, %v2212_v32  ;;  %v4478_v44 = vcombine.low %v2211_v35, %v2213_v36  ;;  %v4894_v56 = vld [vmem:[#allocation2 + $0x30] sm:$0xff]   ;;  %v2221_v1 = vld [vmem:[#allocation5 + $0x1b8] sm:$0xff]  ;;  %v4913_v28 = vld [vmem:[#allocation2 + $0xc8] sm:$0xff]  }
  0x4e   :  { %538 = vmatprep.subr.bf16.mxu0 %v4289_v45  ;;  %891 = vmatprep.subr.bf16.mxu1 %v4291_v48  ;;  %v4891_v45 = vld [vmem:[#allocation2 + $0x18] sm:$0xff]   ;;  %v2216_v48 = vld [vmem:[#allocation5 + $0x170] sm:$0xff] }
  0x4f   :  { %v4480_v50 = vcombine.low %v2214_v47, %v2216_v48  ;;  %v2222_v9 = vld [vmem:[#allocation5 + $0x1d0] sm:$0xff]  ;;  %v2223_v11 = vld [vmem:[#allocation5 + $0x1d8] sm:$0xff] }
  0x50   :  { %v4902_v17 = vld [vmem:[#allocation2 + $0x70] sm:$0xff]   ;;  %v4903_v18 = vld [vmem:[#allocation2 + $0x78] sm:$0xff]  }
  0x51   :  { %539 = vmatpush1.bf16.msra.mxu0 %v4288_v51  ;;  %892 = vmatpush1.bf16.msra.mxu1 %v4290_v52  ;;  %v4481_v51 = vcombine.high %v2214_v47, %v2216_v48  ;;  %v2217_v52 = vld [vmem:[#allocation5 + $0x178] sm:$0xff]  ;;  %v4910_v25 = vld [vmem:[#allocation2 + $0xb0] sm:$0xff]  }
  0x52   :  { %540 = vmatprep.subr.bf16.mxu0 %v4293_v53  ;;  %893 = vmatprep.subr.bf16.mxu1 %v4295_v54  ;;  %v4482_v53 = vcombine.low %v2215_v49, %v2217_v52  ;;  %v4483_v54 = vcombine.high %v2215_v49, %v2217_v52  ;;  %v4911_v26 = vld [vmem:[#allocation2 + $0xb8] sm:$0xff]   ;;  %v4914_v31 = vld [vmem:[#allocation2 + $0xd0] sm:$0xff]  }
  0x55   :  { %541 = vmatpush1.bf16.msra.mxu0 %v4292_v59  ;;  %894 = vmatpush1.bf16.msra.mxu1 %v4294_v60  ;;  %v2218_v59 = vld [vmem:[#allocation5 + $0x190] sm:$0xff] }
  0x56   :  { %542 = vmatprep.subr.bf16.mxu0 %v4297_v61  ;;  %895 = vmatprep.subr.bf16.mxu1 %v4299_v63  ;;  %v2220_v60 = vld [vmem:[#allocation5 + $0x1b0] sm:$0xff]  ;;  %v2219_v61 = vld [vmem:[#allocation5 + $0x198] sm:$0xff] }
  0x57   :  { %v4484_v62 = vcombine.low %v2218_v59, %v2220_v60  ;;  %v4485_v63 = vcombine.high %v2218_v59, %v2220_v60  ;;  %v4486_v2 = vcombine.low %v2219_v61, %v2221_v1  ;;  %v4487_v3 = vcombine.high %v2219_v61, %v2221_v1 }
  0x59   :  { %543 = vmatpush1.bf16.msra.mxu0 %v4296_v4  ;;  %896 = vmatpush1.bf16.msra.mxu1 %v4298_v5  ;;  %v4897_v4 = vld [vmem:[#allocation2 + $0x48] sm:$0xff]   ;;  %v4898_v5 = vld [vmem:[#allocation2 + $0x50] sm:$0xff]  }
  0x5a   :  { %2600 = vmatprep.subr.bf16.mxu0 %v4461_v7  ;;  %2953 = vmatprep.subr.bf16.mxu1 %v4463_v10  ;;  %v4900_v7 = vld [vmem:[#allocation2 + $0x60] sm:$0xff]   ;;  %v2224_v10 = vld [vmem:[#allocation5 + $0x1f0] sm:$0xff] }
  0x5b   :  { %v4489_v12 = vcombine.high %v2222_v9, %v2224_v10  ;;  %v4488_v14 = vcombine.low %v2222_v9, %v2224_v10 }
  0x5c   :  { %561 = vmatmul.mubr.bf16.vlgmr.msra.gmra.mrb[0].mxu0 %v4888_v6  ;;  %914 = vmatmul.mubr.bf16.vlgmr.msra.gmra.mrb[0].mxu1 %v4888_v6  ;;  %v4899_v6 = vld [vmem:[#allocation2 + $0x58] sm:$0xff]  }
  0x5d   :  { %2601 = vmatpush1.bf16.msra.mxu0 %v4460_v13  ;;  %2954 = vmatpush1.bf16.msra.mxu1 %v4462_v16  ;;  %v2225_v13 = vld [vmem:[#allocation5 + $0x1f8] sm:$0xff] }
  0x5e   :  { %570 = vmatprep.mubr.bf16.mxu0 %v5077_v0  ;;  %923 = vmatprep.mubr.bf16.mxu1 %v5077_v0  ;;  %v4491_v15 = vcombine.high %v2223_v11, %v2225_v13  ;;  %v4490_v16 = vcombine.low %v2223_v11, %v2225_v13 }
  0x5f   :  { %2602 = vmatprep.subr.bf16.mxu0 %v4465_v19  ;;  %2955 = vmatprep.subr.bf16.mxu1 %v4467_v20  ;;  %v4904_v19 = vld [vmem:[#allocation2 + $0x80] sm:$0xff]   ;;  %v4905_v20 = vld [vmem:[#allocation2 + $0x88] sm:$0xff]  }
  0x61   :  { %2603 = vmatpush1.bf16.msra.mxu0 %v4464_v21  ;;  %2956 = vmatpush1.bf16.msra.mxu1 %v4466_v23  ;;  %v4906_v21 = vld [vmem:[#allocation2 + $0x90] sm:$0xff]   ;;  %v4908_v23 = vld [vmem:[#allocation2 + $0xa0] sm:$0xff]  }
  0x62   :  { %2604 = vmatprep.subr.bf16.mxu0 %v4469_v24  ;;  %2957 = vmatprep.subr.bf16.mxu1 %v4471_v27  ;;  %v4909_v24 = vld [vmem:[#allocation2 + $0xa8] sm:$0xff]   ;;  %v4912_v27 = vld [vmem:[#allocation2 + $0xc0] sm:$0xff]  }
  0x64   :  { %571 = vmatmul.mubr.bf16.gmra.mrb[4].mxu0 %v4889_v22  ;;  %924 = vmatmul.mubr.bf16.gmra.mrb[4].mxu1 %v4889_v22  ;;  %v4907_v22 = vld [vmem:[#allocation2 + $0x98] sm:$0xff]  }
  0x65   :  { %580 = vmatprep.mubr.bf16.mxu0 %v5077_v0  ;;  %933 = vmatprep.mubr.bf16.mxu1 %v5077_v0 }
  0x66   :  { %2605 = vmatpush1.bf16.msra.mxu0 %v4468_v30  ;;  %2958 = vmatpush1.bf16.msra.mxu1 %v4470_v33  ;;  %v5195_v30 = vshrl.u32 %v156_v29, 7  ;;  %v154_v33 = vld [vmem:[#allocation7] sm:$0xf] }
  0x67   :  { %2606 = vmatprep.subr.bf16.mxu0 %v4473_v34  ;;  %2959 = vmatprep.subr.bf16.mxu1 %v4475_v37 }
  0x68   :  { %v158_v32 = vsub.s32 0, %v5195_v30  ;;  %v166_v34 = vsub.s32 2, %v5195_v30  ;;  %v162_v35 = vsub.s32 1, %v5195_v30  ;;  %v170_v36 = vsub.s32 3, %v5195_v30 }
  0x6a   :  { %2607 = vmatpush1.bf16.msra.mxu0 %v4472_v39  ;;  %2960 = vmatpush1.bf16.msra.mxu1 %v4474_v40  ;;  %v5205_v37 = vrot.slane %v154_v33, %v158_v32  ;;  %v5213_v39 = vrot.slane %v154_v33, %v162_v35  ;;  %v5218_v40 = vrot.slane %v154_v33, %v170_v36 }
  0x6b   :  { %2608 = vmatprep.subr.bf16.mxu0 %v4477_v41  ;;  %2961 = vmatprep.subr.bf16.mxu1 %v4479_v42 }
  0x6c   :  { %581 = vmatmul.mubr.bf16.gmra.mrb[8].mxu0 %v4890_v38  ;;  %934 = vmatmul.mubr.bf16.gmra.mrb[8].mxu1 %v4890_v38  ;;  %v5209_v38 = vrot.slane %v154_v33, %v166_v34 }
  0x6d   :  { %590 = vmatprep.mubr.bf16.mxu0 %v5077_v0  ;;  %943 = vmatprep.mubr.bf16.mxu1 %v5077_v0 }
  0x6e   :  { %2609 = vmatpush1.bf16.msra.mxu0 %v4476_v43  ;;  %2962 = vmatpush1.bf16.msra.mxu1 %v4478_v44 }
  0x6f   :  { %2610 = vmatprep.subr.bf16.mxu0 %v4481_v51  ;;  %2963 = vmatprep.subr.bf16.mxu1 %v4483_v54 }
  0x72   :  { %2611 = vmatpush1.bf16.msra.mxu0 %v4480_v50  ;;  %2964 = vmatpush1.bf16.msra.mxu1 %v4482_v53 }
  0x73   :  { %2612 = vmatprep.subr.bf16.mxu0 %v4485_v63  ;;  %2965 = vmatprep.subr.bf16.mxu1 %v4487_v3  ;;  %v4916_v3 = vld [vmem:[#allocation2 + $0xe0] sm:$0xff]  }
  0x74   :  { %591 = vmatmul.mubr.bf16.gmra.mrb[12].mxu0 %v4891_v45  ;;  %944 = vmatmul.mubr.bf16.gmra.mrb[12].mxu1 %v4891_v45  ;;  %v4915_v45 = vld [vmem:[#allocation2 + $0xd8] sm:$0xff]  }
  0x75   :  { %600 = vmatprep.mubr.bf16.mxu0 %v5077_v0  ;;  %953 = vmatprep.mubr.bf16.mxu1 %v5077_v0 }
  0x76   :  { %2613 = vmatpush1.bf16.msra.mxu0 %v4484_v62  ;;  %2966 = vmatpush1.bf16.msra.mxu1 %v4486_v2 }
  0x77   :  { %2614 = vmatprep.subr.bf16.mxu0 %v4489_v12  ;;  %2967 = vmatprep.subr.bf16.mxu1 %v4491_v15 }
  0x7a   :  { %2615 = vmatpush1.bf16.msra.mxu0 %v4488_v14  ;;  %2968 = vmatpush1.bf16.msra.mxu1 %v4490_v16 }
  0x7c   :  { %601 = vmatmul.mubr.bf16.gmra.mrb[16].mxu0 %v4892_v46  ;;  %954 = vmatmul.mubr.bf16.gmra.mrb[16].mxu1 %v4892_v46 }
  0x7d   :  { %610 = vmatprep.mubr.bf16.mxu0 %v5077_v0  ;;  %963 = vmatprep.mubr.bf16.mxu1 %v5077_v0 }
  0x84   :  { %611 = vmatmul.mubr.bf16.gmra.mrb[20].mxu0 %v4893_v55  ;;  %964 = vmatmul.mubr.bf16.gmra.mrb[20].mxu1 %v4893_v55 }
  0x85   :  { %620 = vmatprep.mubr.bf16.mxu0 %v5077_v0  ;;  %973 = vmatprep.mubr.bf16.mxu1 %v5077_v0 }
  0x8c   :  { %621 = vmatmul.mubr.bf16.gmra.mrb[24].mxu0 %v4894_v56  ;;  %974 = vmatmul.mubr.bf16.gmra.mrb[24].mxu1 %v4894_v56 }
  0x8d   :  { %630 = vmatprep.mubr.bf16.mxu0 %v5077_v0  ;;  %983 = vmatprep.mubr.bf16.mxu1 %v5077_v0 }
  0x94   :  { %631 = vmatmul.mubr.bf16.gmra.mrb[28].mxu0 %v4895_v57  ;;  %984 = vmatmul.mubr.bf16.gmra.mrb[28].mxu1 %v4895_v57 }
  0x95   :  { %640 = vmatprep.mubr.bf16.mxu0 %v5077_v0  ;;  %993 = vmatprep.mubr.bf16.mxu1 %v5077_v0 }
  0x9c   :  { %641 = vmatmul.mubr.bf16.gmra.mrb[32].mxu0 %v4896_v58  ;;  %994 = vmatmul.mubr.bf16.gmra.mrb[32].mxu1 %v4896_v58 }
  0x9d   :  { %650 = vmatprep.mubr.bf16.mxu0 %v5077_v0  ;;  %1003 = vmatprep.mubr.bf16.mxu1 %v5077_v0 }
  0xa4   :  { %651 = vmatmul.mubr.bf16.gmra.mrb[36].mxu0 %v4897_v4  ;;  %1004 = vmatmul.mubr.bf16.gmra.mrb[36].mxu1 %v4897_v4 }
  0xa5   :  { %660 = vmatprep.mubr.bf16.mxu0 %v5077_v0  ;;  %1013 = vmatprep.mubr.bf16.mxu1 %v5077_v0 }
  0xac   :  { %661 = vmatmul.mubr.bf16.gmra.mrb[40].mxu0 %v4898_v5  ;;  %1014 = vmatmul.mubr.bf16.gmra.mrb[40].mxu1 %v4898_v5 }
  0xad   :  { %670 = vmatprep.mubr.bf16.mxu0 %v5077_v0  ;;  %1023 = vmatprep.mubr.bf16.mxu1 %v5077_v0 }
  0xb4   :  { %671 = vmatmul.mubr.bf16.gmra.mrb[44].mxu0 %v4899_v6  ;;  %1024 = vmatmul.mubr.bf16.gmra.mrb[44].mxu1 %v4899_v6 }
  0xb5   :  { %680 = vmatprep.mubr.bf16.mxu0 %v5077_v0  ;;  %1033 = vmatprep.mubr.bf16.mxu1 %v5077_v0 }
  0xbc   :  { %681 = vmatmul.mubr.bf16.gmra.mrb[48].mxu0 %v4900_v7  ;;  %1034 = vmatmul.mubr.bf16.gmra.mrb[48].mxu1 %v4900_v7 }
  0xbd   :  { %690 = vmatprep.mubr.bf16.mxu0 %v5077_v0  ;;  %1043 = vmatprep.mubr.bf16.mxu1 %v5077_v0 }
  0xc4   :  { %691 = vmatmul.mubr.bf16.gmra.mrb[52].mxu0 %v4901_v8  ;;  %1044 = vmatmul.mubr.bf16.gmra.mrb[52].mxu1 %v4901_v8 }
  0xc5   :  { %700 = vmatprep.mubr.bf16.mxu0 %v5077_v0  ;;  %1053 = vmatprep.mubr.bf16.mxu1 %v5077_v0 }
  0xcc   :  { %701 = vmatmul.mubr.bf16.gmra.mrb[56].mxu0 %v4902_v17  ;;  %1054 = vmatmul.mubr.bf16.gmra.mrb[56].mxu1 %v4902_v17 }
  0xcd   :  { %710 = vmatprep.mubr.bf16.mxu0 %v5077_v0  ;;  %1063 = vmatprep.mubr.bf16.mxu1 %v5077_v0 }
  0xd4   :  { %711 = vmatmul.mubr.bf16.gmra.mrb[60].mxu0 %v4903_v18  ;;  %1064 = vmatmul.mubr.bf16.gmra.mrb[60].mxu1 %v4903_v18 }
  0xd5   :  { %720 = vmatprep.mubr.bf16.mxu0 %v5077_v0  ;;  %1073 = vmatprep.mubr.bf16.mxu1 %v5077_v0 }
  0xdc   :  { %721 = vmatmul.mubr.bf16.gmra.mrb[64].mxu0 %v4904_v19  ;;  %1074 = vmatmul.mubr.bf16.gmra.mrb[64].mxu1 %v4904_v19 }
  0xdd   :  { %730 = vmatprep.mubr.bf16.mxu0 %v5077_v0  ;;  %1083 = vmatprep.mubr.bf16.mxu1 %v5077_v0 }
  0xe4   :  { %731 = vmatmul.mubr.bf16.gmra.mrb[68].mxu0 %v4905_v20  ;;  %1084 = vmatmul.mubr.bf16.gmra.mrb[68].mxu1 %v4905_v20 }
  0xe5   :  { %740 = vmatprep.mubr.bf16.mxu0 %v5077_v0  ;;  %1093 = vmatprep.mubr.bf16.mxu1 %v5077_v0 }
  0xec   :  { %741 = vmatmul.mubr.bf16.gmra.mrb[72].mxu0 %v4906_v21  ;;  %1094 = vmatmul.mubr.bf16.gmra.mrb[72].mxu1 %v4906_v21 }
  0xed   :  { %750 = vmatprep.mubr.bf16.mxu0 %v5077_v0  ;;  %1103 = vmatprep.mubr.bf16.mxu1 %v5077_v0 }
  0xf4   :  { %751 = vmatmul.mubr.bf16.gmra.mrb[76].mxu0 %v4907_v22  ;;  %1104 = vmatmul.mubr.bf16.gmra.mrb[76].mxu1 %v4907_v22 }
  0xf5   :  { %760 = vmatprep.mubr.bf16.mxu0 %v5077_v0  ;;  %1113 = vmatprep.mubr.bf16.mxu1 %v5077_v0 }
  0xfc   :  { %761 = vmatmul.mubr.bf16.gmra.mrb[80].mxu0 %v4908_v23  ;;  %1114 = vmatmul.mubr.bf16.gmra.mrb[80].mxu1 %v4908_v23 }
  0xfd   :  { %770 = vmatprep.mubr.bf16.mxu0 %v5077_v0  ;;  %1123 = vmatprep.mubr.bf16.mxu1 %v5077_v0 }
 0x104   :  { %771 = vmatmul.mubr.bf16.gmra.mrb[84].mxu0 %v4909_v24  ;;  %1124 = vmatmul.mubr.bf16.gmra.mrb[84].mxu1 %v4909_v24  ;;  %v4917_v24 = vld [vmem:[#allocation2 + $0xe8] sm:$0xff]  }
 0x105   :  { %780 = vmatprep.mubr.bf16.mxu0 %v5077_v0  ;;  %1133 = vmatprep.mubr.bf16.mxu1 %v5077_v0 }
 0x10c   :  { %781 = vmatmul.mubr.bf16.gmra.mrb[88].mxu0 %v4910_v25  ;;  %1134 = vmatmul.mubr.bf16.gmra.mrb[88].mxu1 %v4910_v25 }
 0x10d   :  { %790 = vmatprep.mubr.bf16.mxu0 %v5077_v0  ;;  %1143 = vmatprep.mubr.bf16.mxu1 %v5077_v0 }
 0x114   :  { %791 = vmatmul.mubr.bf16.gmra.mrb[92].mxu0 %v4911_v26  ;;  %1144 = vmatmul.mubr.bf16.gmra.mrb[92].mxu1 %v4911_v26 }
 0x115   :  { %800 = vmatprep.mubr.bf16.mxu0 %v5077_v0  ;;  %1153 = vmatprep.mubr.bf16.mxu1 %v5077_v0 }
 0x11c   :  { %801 = vmatmul.mubr.bf16.gmra.mrb[96].mxu0 %v4912_v27  ;;  %1154 = vmatmul.mubr.bf16.gmra.mrb[96].mxu1 %v4912_v27 }
 0x11d   :  { %810 = vmatprep.mubr.bf16.mxu0 %v5077_v0  ;;  %1163 = vmatprep.mubr.bf16.mxu1 %v5077_v0 }
 0x124   :  { %811 = vmatmul.mubr.bf16.gmra.mrb[100].mxu0 %v4913_v28  ;;  %1164 = vmatmul.mubr.bf16.gmra.mrb[100].mxu1 %v4913_v28 }
 0x125   :  { %820 = vmatprep.mubr.bf16.mxu0 %v5077_v0  ;;  %1173 = vmatprep.mubr.bf16.mxu1 %v5077_v0 }
 0x12c   :  { %821 = vmatmul.mubr.bf16.gmra.mrb[104].mxu0 %v4914_v31  ;;  %1174 = vmatmul.mubr.bf16.gmra.mrb[104].mxu1 %v4914_v31 }
 0x12d   :  { %830 = vmatprep.mubr.bf16.mxu0 %v5077_v0  ;;  %1183 = vmatprep.mubr.bf16.mxu1 %v5077_v0 }
 0x12f   :  { %v562_v41 = vpop.f32.mrb[0].mxu0  ;;  %v915_v43 = vpop.f32.mrb[0].mxu1 }
 0x130   :  { %v563_v42 = vadd.f32 %v562_v41, %v5205_v37  ;;  %v564_v44 = vpop.f32.mrb[1].mxu0  ;;  %v916_v46 = vadd.f32 %v915_v43, %v5209_v38  ;;  %v917_v48 = vpop.f32.mrb[1].mxu1 }
 0x131   :  { %v565_v47 = vadd.f32 %v564_v44, %v5213_v39  ;;  %v566_v49 = vpop.f32.mrb[2].mxu0  ;;  %v918_v50 = vadd.f32 %v917_v48, %v5218_v40  ;;  %v919_v52 = vpop.f32.mrb[2].mxu1 }
 0x132   :  { %v567_v51 = vadd.f32 %v566_v49, %v5205_v37  ;;  %v568_v53 = vpop.f32.mrb[3].mxu0  ;;  %v920_v55 = vadd.f32 %v919_v52, %v5209_v38  ;;  %v921_v57 = vpop.f32.mrb[3].mxu1 }
 0x133   :  { %v4620_v54 = vpack.c.bf16 %v565_v47, %v563_v42  ;;  %v569_v56 = vadd.f32 %v568_v53, %v5213_v39  ;;  %v4621_v58 = vpack.c.bf16 %v918_v50, %v916_v46  ;;  %v922_v59 = vadd.f32 %v921_v57, %v5218_v40 }
 0x134   :  { %831 = vmatmul.mubr.bf16.gmra.mrb[108].mxu0 %v4915_v45  ;;  %1184 = vmatmul.mubr.bf16.gmra.mrb[108].mxu1 %v4915_v45 }
 0x135   :  { %2002 = vst [vmem:[#allocation8] sm:$0xff] %v4620_v54  ;;  %v4622_v60 = vpack.c.bf16 %v569_v56, %v567_v51  ;;  %840 = vmatprep.mubr.bf16.mxu0 %v5077_v0  ;;  %2003 = vst [vmem:[#allocation8 + $0x8] sm:$0xff] %v4621_v58  ;;  %v4623_v61 = vpack.c.bf16 %v922_v59, %v920_v55  ;;  %1193 = vmatprep.mubr.bf16.mxu1 %v5077_v0  ;;  %v4918_v54 = vld [vmem:[#allocation2 + $0xf0] sm:$0xff]  }
 0x137   :  { %2004 = vst [vmem:[#allocation8 + $0x10] sm:$0xff] %v4622_v60  ;;  %v572_v62 = vpop.f32.mrb[4].mxu0  ;;  %2005 = vst [vmem:[#allocation8 + $0x18] sm:$0xff] %v4623_v61  ;;  %v925_v1 = vpop.f32.mrb[4].mxu1 }
 0x138   :  { %v573_v63 = vadd.f32 %v572_v62, %v5205_v37  ;;  %v574_v2 = vpop.f32.mrb[5].mxu0  ;;  %v926_v4 = vadd.f32 %v925_v1, %v5209_v38  ;;  %v927_v6 = vpop.f32.mrb[5].mxu1 }
 0x139   :  { %v575_v5 = vadd.f32 %v574_v2, %v5213_v39  ;;  %v576_v7 = vpop.f32.mrb[6].mxu0  ;;  %v928_v8 = vadd.f32 %v927_v6, %v5218_v40  ;;  %v929_v10 = vpop.f32.mrb[6].mxu1 }
 0x13a   :  { %v577_v9 = vadd.f32 %v576_v7, %v5205_v37  ;;  %v578_v11 = vpop.f32.mrb[7].mxu0  ;;  %v930_v13 = vadd.f32 %v929_v10, %v5209_v38  ;;  %v931_v15 = vpop.f32.mrb[7].mxu1 }
 0x13b   :  { %v4624_v12 = vpack.c.bf16 %v575_v5, %v573_v63  ;;  %v579_v14 = vadd.f32 %v578_v11, %v5213_v39  ;;  %v4625_v16 = vpack.c.bf16 %v928_v8, %v926_v4  ;;  %v932_v17 = vadd.f32 %v931_v15, %v5218_v40 }
 0x13c   :  { %841 = vmatmul.mubr.bf16.gmra.mrb[112].mxu0 %v4916_v3  ;;  %1194 = vmatmul.mubr.bf16.gmra.mrb[112].mxu1 %v4916_v3 }
 0x13d   :  { %2006 = vst [vmem:[#allocation8 + $0x20] sm:$0xff] %v4624_v12  ;;  %v4626_v18 = vpack.c.bf16 %v579_v14, %v577_v9  ;;  %850 = vmatprep.mubr.bf16.mxu0 %v5077_v0  ;;  %2007 = vst [vmem:[#allocation8 + $0x28] sm:$0xff] %v4625_v16  ;;  %v4627_v19 = vpack.c.bf16 %v932_v17, %v930_v13  ;;  %1203 = vmatprep.mubr.bf16.mxu1 %v5077_v0  ;;  %v4919_v12 = vld [vmem:[#allocation2 + $0xf8] sm:$0xff]  }
 0x13f   :  { %2008 = vst [vmem:[#allocation8 + $0x30] sm:$0xff] %v4626_v18  ;;  %v582_v20 = vpop.f32.mrb[8].mxu0  ;;  %2009 = vst [vmem:[#allocation8 + $0x38] sm:$0xff] %v4627_v19  ;;  %v935_v22 = vpop.f32.mrb[8].mxu1 }
 0x140   :  { %v583_v21 = vadd.f32 %v582_v20, %v5205_v37  ;;  %v584_v23 = vpop.f32.mrb[9].mxu0  ;;  %v936_v25 = vadd.f32 %v935_v22, %v5209_v38  ;;  %v937_v27 = vpop.f32.mrb[9].mxu1 }
 0x141   :  { %v585_v26 = vadd.f32 %v584_v23, %v5213_v39  ;;  %v586_v28 = vpop.f32.mrb[10].mxu0  ;;  %v938_v29 = vadd.f32 %v937_v27, %v5218_v40  ;;  %v939_v33 = vpop.f32.mrb[10].mxu1 }
 0x142   :  { %v587_v31 = vadd.f32 %v586_v28, %v5205_v37  ;;  %v588_v41 = vpop.f32.mrb[11].mxu0  ;;  %v940_v43 = vadd.f32 %v939_v33, %v5209_v38  ;;  %v941_v45 = vpop.f32.mrb[11].mxu1 }
 0x143   :  { %v4628_v42 = vpack.c.bf16 %v585_v26, %v583_v21  ;;  %v589_v44 = vadd.f32 %v588_v41, %v5213_v39  ;;  %v4629_v46 = vpack.c.bf16 %v938_v29, %v936_v25  ;;  %v942_v47 = vadd.f32 %v941_v45, %v5218_v40 }
 0x144   :  { %851 = vmatmul.mubr.bf16.gmra.mrb[116].mxu0 %v4917_v24  ;;  %1204 = vmatmul.mubr.bf16.gmra.mrb[116].mxu1 %v4917_v24 }
 0x145   :  { %2010 = vst [vmem:[#allocation8 + $0x40] sm:$0xff] %v4628_v42  ;;  %v4630_v48 = vpack.c.bf16 %v589_v44, %v587_v31  ;;  %860 = vmatprep.mubr.bf16.mxu0 %v5077_v0  ;;  %2011 = vst [vmem:[#allocation8 + $0x48] sm:$0xff] %v4629_v46  ;;  %v4631_v49 = vpack.c.bf16 %v942_v47, %v940_v43  ;;  %1213 = vmatprep.mubr.bf16.mxu1 %v5077_v0  ;;  %v4920_v42 = vld [vmem:[#allocation2] sm:$0xff]  }
 0x147   :  { %2012 = vst [vmem:[#allocation8 + $0x50] sm:$0xff] %v4630_v48  ;;  %v592_v50 = vpop.f32.mrb[12].mxu0  ;;  %2013 = vst [vmem:[#allocation8 + $0x58] sm:$0xff] %v4631_v49  ;;  %v945_v52 = vpop.f32.mrb[12].mxu1 }
 0x148   :  { %v593_v51 = vadd.f32 %v592_v50, %v5205_v37  ;;  %v594_v53 = vpop.f32.mrb[13].mxu0  ;;  %v946_v55 = vadd.f32 %v945_v52, %v5209_v38  ;;  %v947_v57 = vpop.f32.mrb[13].mxu1 }
 0x149   :  { %v595_v56 = vadd.f32 %v594_v53, %v5213_v39  ;;  %v596_v58 = vpop.f32.mrb[14].mxu0  ;;  %v948_v59 = vadd.f32 %v947_v57, %v5218_v40  ;;  %v949_v61 = vpop.f32.mrb[14].mxu1 }
 0x14a   :  { %v597_v60 = vadd.f32 %v596_v58, %v5205_v37  ;;  %v598_v62 = vpop.f32.mrb[15].mxu0  ;;  %v950_v1 = vadd.f32 %v949_v61, %v5209_v38  ;;  %v951_v3 = vpop.f32.mrb[15].mxu1 }
 0x14b   :  { %v4632_v63 = vpack.c.bf16 %v595_v56, %v593_v51  ;;  %v599_v2 = vadd.f32 %v598_v62, %v5213_v39  ;;  %v4633_v4 = vpack.c.bf16 %v948_v59, %v946_v55  ;;  %v952_v5 = vadd.f32 %v951_v3, %v5218_v40 }
 0x14c   :  { %861 = vmatmul.mubr.bf16.gmra.mrb[120].mxu0 %v4918_v54  ;;  %1214 = vmatmul.mubr.bf16.gmra.mrb[120].mxu1 %v4918_v54 }
 0x14d   :  { %2014 = vst [vmem:[#allocation8 + $0x60] sm:$0xff] %v4632_v63  ;;  %v4634_v6 = vpack.c.bf16 %v599_v2, %v597_v60  ;;  %870 = vmatprep.mubr.bf16.mxu0 %v5077_v0  ;;  %2015 = vst [vmem:[#allocation8 + $0x68] sm:$0xff] %v4633_v4  ;;  %v4635_v7 = vpack.c.bf16 %v952_v5, %v950_v1  ;;  %1223 = vmatprep.mubr.bf16.mxu1 %v5077_v0  ;;  %v4921_v63 = vld [vmem:[#allocation2 + $0x8] sm:$0xff]  }
 0x14f   :  { %2016 = vst [vmem:[#allocation8 + $0x70] sm:$0xff] %v4634_v6  ;;  %v602_v8 = vpop.f32.mrb[16].mxu0  ;;  %2017 = vst [vmem:[#allocation8 + $0x78] sm:$0xff] %v4635_v7  ;;  %v955_v10 = vpop.f32.mrb[16].mxu1 }
 0x150   :  { %v603_v9 = vadd.f32 %v602_v8, %v5205_v37  ;;  %v604_v11 = vpop.f32.mrb[17].mxu0  ;;  %v956_v13 = vadd.f32 %v955_v10, %v5209_v38  ;;  %v957_v15 = vpop.f32.mrb[17].mxu1 }
 0x151   :  { %v605_v14 = vadd.f32 %v604_v11, %v5213_v39  ;;  %v606_v16 = vpop.f32.mrb[18].mxu0  ;;  %v958_v17 = vadd.f32 %v957_v15, %v5218_v40  ;;  %v959_v19 = vpop.f32.mrb[18].mxu1 }
 0x152   :  { %v607_v18 = vadd.f32 %v606_v16, %v5205_v37  ;;  %v608_v20 = vpop.f32.mrb[19].mxu0  ;;  %v960_v22 = vadd.f32 %v959_v19, %v5209_v38  ;;  %v961_v24 = vpop.f32.mrb[19].mxu1 }
 0x153   :  { %v4636_v21 = vpack.c.bf16 %v605_v14, %v603_v9  ;;  %v609_v23 = vadd.f32 %v608_v20, %v5213_v39  ;;  %v4637_v25 = vpack.c.bf16 %v958_v17, %v956_v13  ;;  %v962_v26 = vadd.f32 %v961_v24, %v5218_v40 }
 0x154   :  { %871 = vmatmul.mubr.bf16.gmra.mrb[124].mxu0 %v4919_v12  ;;  %1224 = vmatmul.mubr.bf16.gmra.mrb[124].mxu1 %v4919_v12 }
 0x155   :  { %2018 = vst [vmem:[#allocation8 + $0x80] sm:$0xff] %v4636_v21  ;;  %v4638_v27 = vpack.c.bf16 %v609_v23, %v607_v18  ;;  %2632 = vmatprep.mubr.bf16.mxu0 %v5077_v0  ;;  %2019 = vst [vmem:[#allocation8 + $0x88] sm:$0xff] %v4637_v25  ;;  %v4639_v28 = vpack.c.bf16 %v962_v26, %v960_v22  ;;  %2985 = vmatprep.mubr.bf16.mxu1 %v5077_v0  ;;  %v4922_v21 = vld [vmem:[#allocation2 + $0x10] sm:$0xff]  }
 0x157   :  { %2020 = vst [vmem:[#allocation8 + $0x90] sm:$0xff] %v4638_v27  ;;  %v612_v29 = vpop.f32.mrb[20].mxu0  ;;  %2021 = vst [vmem:[#allocation8 + $0x98] sm:$0xff] %v4639_v28  ;;  %v965_v33 = vpop.f32.mrb[20].mxu1 }
 0x158   :  { %v613_v31 = vadd.f32 %v612_v29, %v5205_v37  ;;  %v614_v41 = vpop.f32.mrb[21].mxu0  ;;  %v966_v43 = vadd.f32 %v965_v33, %v5209_v38  ;;  %v967_v45 = vpop.f32.mrb[21].mxu1 }
 0x159   :  { %v615_v44 = vadd.f32 %v614_v41, %v5213_v39  ;;  %v616_v46 = vpop.f32.mrb[22].mxu0  ;;  %v968_v47 = vadd.f32 %v967_v45, %v5218_v40  ;;  %v969_v49 = vpop.f32.mrb[22].mxu1 }
 0x15a   :  { %v617_v48 = vadd.f32 %v616_v46, %v5205_v37  ;;  %v618_v50 = vpop.f32.mrb[23].mxu0  ;;  %v970_v52 = vadd.f32 %v969_v49, %v5209_v38  ;;  %v971_v54 = vpop.f32.mrb[23].mxu1 }
 0x15b   :  { %v4640_v51 = vpack.c.bf16 %v615_v44, %v613_v31  ;;  %v619_v53 = vadd.f32 %v618_v50, %v5213_v39  ;;  %v4641_v55 = vpack.c.bf16 %v968_v47, %v966_v43  ;;  %v972_v56 = vadd.f32 %v971_v54, %v5218_v40 }
 0x15c   :  { %2633 = vmatmul.mubr.bf16.vlgmr.msra.gmra.mrb[128].mxu0 %v4920_v42  ;;  %2986 = vmatmul.mubr.bf16.vlgmr.msra.gmra.mrb[128].mxu1 %v4920_v42 }
 0x15d   :  { %2022 = vst [vmem:[#allocation8 + $0xa0] sm:$0xff] %v4640_v51  ;;  %v4642_v57 = vpack.c.bf16 %v619_v53, %v617_v48  ;;  %2642 = vmatprep.mubr.bf16.mxu0 %v5077_v0  ;;  %2023 = vst [vmem:[#allocation8 + $0xa8] sm:$0xff] %v4641_v55  ;;  %v4643_v58 = vpack.c.bf16 %v972_v56, %v970_v52  ;;  %2995 = vmatprep.mubr.bf16.mxu1 %v5077_v0  ;;  %v4923_v51 = vld [vmem:[#allocation2 + $0x18] sm:$0xff]  }
 0x15f   :  { %2024 = vst [vmem:[#allocation8 + $0xb0] sm:$0xff] %v4642_v57  ;;  %v622_v59 = vpop.f32.mrb[24].mxu0  ;;  %2025 = vst [vmem:[#allocation8 + $0xb8] sm:$0xff] %v4643_v58  ;;  %v975_v61 = vpop.f32.mrb[24].mxu1 }
 0x160   :  { %v623_v60 = vadd.f32 %v622_v59, %v5205_v37  ;;  %v624_v62 = vpop.f32.mrb[25].mxu0  ;;  %v976_v1 = vadd.f32 %v975_v61, %v5209_v38  ;;  %v977_v3 = vpop.f32.mrb[25].mxu1 }
 0x161   :  { %v625_v2 = vadd.f32 %v624_v62, %v5213_v39  ;;  %v626_v4 = vpop.f32.mrb[26].mxu0  ;;  %v978_v5 = vadd.f32 %v977_v3, %v5218_v40  ;;  %v979_v7 = vpop.f32.mrb[26].mxu1 }
 0x162   :  { %v627_v6 = vadd.f32 %v626_v4, %v5205_v37  ;;  %v628_v8 = vpop.f32.mrb[27].mxu0  ;;  %v980_v10 = vadd.f32 %v979_v7, %v5209_v38  ;;  %v981_v12 = vpop.f32.mrb[27].mxu1 }
 0x163   :  { %v4644_v9 = vpack.c.bf16 %v625_v2, %v623_v60  ;;  %v629_v11 = vadd.f32 %v628_v8, %v5213_v39  ;;  %v4645_v13 = vpack.c.bf16 %v978_v5, %v976_v1  ;;  %v982_v14 = vadd.f32 %v981_v12, %v5218_v40 }
 0x164   :  { %2643 = vmatmul.mubr.bf16.gmra.mrb[132].mxu0 %v4921_v63  ;;  %2996 = vmatmul.mubr.bf16.gmra.mrb[132].mxu1 %v4921_v63 }
 0x165   :  { %2026 = vst [vmem:[#allocation8 + $0xc0] sm:$0xff] %v4644_v9  ;;  %v4646_v15 = vpack.c.bf16 %v629_v11, %v627_v6  ;;  %2652 = vmatprep.mubr.bf16.mxu0 %v5077_v0  ;;  %2027 = vst [vmem:[#allocation8 + $0xc8] sm:$0xff] %v4645_v13  ;;  %v4647_v16 = vpack.c.bf16 %v982_v14, %v980_v10  ;;  %3005 = vmatprep.mubr.bf16.mxu1 %v5077_v0  ;;  %v4924_v9 = vld [vmem:[#allocation2 + $0x20] sm:$0xff]  }
 0x167   :  { %2028 = vst [vmem:[#allocation8 + $0xd0] sm:$0xff] %v4646_v15  ;;  %v632_v17 = vpop.f32.mrb[28].mxu0  ;;  %2029 = vst [vmem:[#allocation8 + $0xd8] sm:$0xff] %v4647_v16  ;;  %v985_v19 = vpop.f32.mrb[28].mxu1 }
 0x168   :  { %v633_v18 = vadd.f32 %v632_v17, %v5205_v37  ;;  %v634_v20 = vpop.f32.mrb[29].mxu0  ;;  %v986_v22 = vadd.f32 %v985_v19, %v5209_v38  ;;  %v987_v24 = vpop.f32.mrb[29].mxu1 }
 0x169   :  { %v635_v23 = vadd.f32 %v634_v20, %v5213_v39  ;;  %v636_v25 = vpop.f32.mrb[30].mxu0  ;;  %v988_v26 = vadd.f32 %v987_v24, %v5218_v40  ;;  %v989_v28 = vpop.f32.mrb[30].mxu1 }
 0x16a   :  { %v637_v27 = vadd.f32 %v636_v25, %v5205_v37  ;;  %v638_v29 = vpop.f32.mrb[31].mxu0  ;;  %v990_v33 = vadd.f32 %v989_v28, %v5209_v38  ;;  %v991_v42 = vpop.f32.mrb[31].mxu1 }
 0x16b   :  { %v4648_v31 = vpack.c.bf16 %v635_v23, %v633_v18  ;;  %v639_v41 = vadd.f32 %v638_v29, %v5213_v39  ;;  %v4649_v43 = vpack.c.bf16 %v988_v26, %v986_v22  ;;  %v992_v44 = vadd.f32 %v991_v42, %v5218_v40 }
 0x16c   :  { %2653 = vmatmul.mubr.bf16.gmra.mrb[136].mxu0 %v4922_v21  ;;  %3006 = vmatmul.mubr.bf16.gmra.mrb[136].mxu1 %v4922_v21 }
 0x16d   :  { %2030 = vst [vmem:[#allocation8 + $0xe0] sm:$0xff] %v4648_v31  ;;  %v4650_v45 = vpack.c.bf16 %v639_v41, %v637_v27  ;;  %2662 = vmatprep.mubr.bf16.mxu0 %v5077_v0  ;;  %2031 = vst [vmem:[#allocation8 + $0xe8] sm:$0xff] %v4649_v43  ;;  %v4651_v46 = vpack.c.bf16 %v992_v44, %v990_v33  ;;  %3015 = vmatprep.mubr.bf16.mxu1 %v5077_v0  ;;  %v4925_v31 = vld [vmem:[#allocation2 + $0x28] sm:$0xff]  }
 0x16f   :  { %2032 = vst [vmem:[#allocation8 + $0xf0] sm:$0xff] %v4650_v45  ;;  %v642_v47 = vpop.f32.mrb[32].mxu0  ;;  %2033 = vst [vmem:[#allocation8 + $0xf8] sm:$0xff] %v4651_v46  ;;  %v995_v49 = vpop.f32.mrb[32].mxu1 }
 0x170   :  { %v643_v48 = vadd.f32 %v642_v47, %v5205_v37  ;;  %v644_v50 = vpop.f32.mrb[33].mxu0  ;;  %v996_v52 = vadd.f32 %v995_v49, %v5209_v38  ;;  %v997_v54 = vpop.f32.mrb[33].mxu1 }
 0x171   :  { %v645_v53 = vadd.f32 %v644_v50, %v5213_v39  ;;  %v646_v55 = vpop.f32.mrb[34].mxu0  ;;  %v998_v56 = vadd.f32 %v997_v54, %v5218_v40  ;;  %v999_v58 = vpop.f32.mrb[34].mxu1 }
 0x172   :  { %v647_v57 = vadd.f32 %v646_v55, %v5205_v37  ;;  %v648_v59 = vpop.f32.mrb[35].mxu0  ;;  %v1000_v61 = vadd.f32 %v999_v58, %v5209_v38  ;;  %v1001_v63 = vpop.f32.mrb[35].mxu1 }
 0x173   :  { %v4652_v60 = vpack.c.bf16 %v645_v53, %v643_v48  ;;  %v649_v62 = vadd.f32 %v648_v59, %v5213_v39  ;;  %v4653_v1 = vpack.c.bf16 %v998_v56, %v996_v52  ;;  %v1002_v2 = vadd.f32 %v1001_v63, %v5218_v40 }
 0x174   :  { %2663 = vmatmul.mubr.bf16.gmra.mrb[140].mxu0 %v4923_v51  ;;  %3016 = vmatmul.mubr.bf16.gmra.mrb[140].mxu1 %v4923_v51 }
 0x175   :  { %2034 = vst [vmem:[#allocation8 + $0x100] sm:$0xff] %v4652_v60  ;;  %v4654_v3 = vpack.c.bf16 %v649_v62, %v647_v57  ;;  %2672 = vmatprep.mubr.bf16.mxu0 %v5077_v0  ;;  %2035 = vst [vmem:[#allocation8 + $0x108] sm:$0xff] %v4653_v1  ;;  %v4655_v4 = vpack.c.bf16 %v1002_v2, %v1000_v61  ;;  %3025 = vmatprep.mubr.bf16.mxu1 %v5077_v0  ;;  %v4926_v60 = vld [vmem:[#allocation2 + $0x30] sm:$0xff]  }
 0x177   :  { %2036 = vst [vmem:[#allocation8 + $0x110] sm:$0xff] %v4654_v3  ;;  %v652_v5 = vpop.f32.mrb[36].mxu0  ;;  %2037 = vst [vmem:[#allocation8 + $0x118] sm:$0xff] %v4655_v4  ;;  %v1005_v7 = vpop.f32.mrb[36].mxu1 }
 0x178   :  { %v653_v6 = vadd.f32 %v652_v5, %v5205_v37  ;;  %v654_v8 = vpop.f32.mrb[37].mxu0  ;;  %v1006_v10 = vadd.f32 %v1005_v7, %v5209_v38  ;;  %v1007_v12 = vpop.f32.mrb[37].mxu1 }
 0x179   :  { %v655_v11 = vadd.f32 %v654_v8, %v5213_v39  ;;  %v656_v13 = vpop.f32.mrb[38].mxu0  ;;  %v1008_v14 = vadd.f32 %v1007_v12, %v5218_v40  ;;  %v1009_v16 = vpop.f32.mrb[38].mxu1 }
 0x17a   :  { %v657_v15 = vadd.f32 %v656_v13, %v5205_v37  ;;  %v658_v17 = vpop.f32.mrb[39].mxu0  ;;  %v1010_v19 = vadd.f32 %v1009_v16, %v5209_v38  ;;  %v1011_v21 = vpop.f32.mrb[39].mxu1 }
 0x17b   :  { %v4656_v18 = vpack.c.bf16 %v655_v11, %v653_v6  ;;  %v659_v20 = vadd.f32 %v658_v17, %v5213_v39  ;;  %v4657_v22 = vpack.c.bf16 %v1008_v14, %v1006_v10  ;;  %v1012_v23 = vadd.f32 %v1011_v21, %v5218_v40 }
 0x17c   :  { %2673 = vmatmul.mubr.bf16.gmra.mrb[144].mxu0 %v4924_v9  ;;  %3026 = vmatmul.mubr.bf16.gmra.mrb[144].mxu1 %v4924_v9 }
 0x17d   :  { %2038 = vst [vmem:[#allocation8 + $0x120] sm:$0xff] %v4656_v18  ;;  %v4658_v24 = vpack.c.bf16 %v659_v20, %v657_v15  ;;  %2682 = vmatprep.mubr.bf16.mxu0 %v5077_v0  ;;  %2039 = vst [vmem:[#allocation8 + $0x128] sm:$0xff] %v4657_v22  ;;  %v4659_v25 = vpack.c.bf16 %v1012_v23, %v1010_v19  ;;  %3035 = vmatprep.mubr.bf16.mxu1 %v5077_v0  ;;  %v4927_v18 = vld [vmem:[#allocation2 + $0x38] sm:$0xff]  }
 0x17f   :  { %2040 = vst [vmem:[#allocation8 + $0x130] sm:$0xff] %v4658_v24  ;;  %v662_v26 = vpop.f32.mrb[40].mxu0  ;;  %2041 = vst [vmem:[#allocation8 + $0x138] sm:$0xff] %v4659_v25  ;;  %v1015_v28 = vpop.f32.mrb[40].mxu1 }
 0x180   :  { %v663_v27 = vadd.f32 %v662_v26, %v5205_v37  ;;  %v664_v29 = vpop.f32.mrb[41].mxu0  ;;  %v1016_v33 = vadd.f32 %v1015_v28, %v5209_v38  ;;  %v1017_v42 = vpop.f32.mrb[41].mxu1 }
 0x181   :  { %v665_v41 = vadd.f32 %v664_v29, %v5213_v39  ;;  %v666_v43 = vpop.f32.mrb[42].mxu0  ;;  %v1018_v44 = vadd.f32 %v1017_v42, %v5218_v40  ;;  %v1019_v46 = vpop.f32.mrb[42].mxu1 }
 0x182   :  { %v667_v45 = vadd.f32 %v666_v43, %v5205_v37  ;;  %v668_v47 = vpop.f32.mrb[43].mxu0  ;;  %v1020_v49 = vadd.f32 %v1019_v46, %v5209_v38  ;;  %v1021_v51 = vpop.f32.mrb[43].mxu1 }
 0x183   :  { %v4660_v48 = vpack.c.bf16 %v665_v41, %v663_v27  ;;  %v669_v50 = vadd.f32 %v668_v47, %v5213_v39  ;;  %v4661_v52 = vpack.c.bf16 %v1018_v44, %v1016_v33  ;;  %v1022_v53 = vadd.f32 %v1021_v51, %v5218_v40 }
 0x184   :  { %2683 = vmatmul.mubr.bf16.gmra.mrb[148].mxu0 %v4925_v31  ;;  %3036 = vmatmul.mubr.bf16.gmra.mrb[148].mxu1 %v4925_v31 }
 0x185   :  { %2042 = vst [vmem:[#allocation8 + $0x140] sm:$0xff] %v4660_v48  ;;  %v4662_v54 = vpack.c.bf16 %v669_v50, %v667_v45  ;;  %2692 = vmatprep.mubr.bf16.mxu0 %v5077_v0  ;;  %2043 = vst [vmem:[#allocation8 + $0x148] sm:$0xff] %v4661_v52  ;;  %v4663_v55 = vpack.c.bf16 %v1022_v53, %v1020_v49  ;;  %3045 = vmatprep.mubr.bf16.mxu1 %v5077_v0  ;;  %v4928_v48 = vld [vmem:[#allocation2 + $0x40] sm:$0xff]  }
 0x187   :  { %2044 = vst [vmem:[#allocation8 + $0x150] sm:$0xff] %v4662_v54  ;;  %v672_v56 = vpop.f32.mrb[44].mxu0  ;;  %2045 = vst [vmem:[#allocation8 + $0x158] sm:$0xff] %v4663_v55  ;;  %v1025_v58 = vpop.f32.mrb[44].mxu1 }
 0x188   :  { %v673_v57 = vadd.f32 %v672_v56, %v5205_v37  ;;  %v674_v59 = vpop.f32.mrb[45].mxu0  ;;  %v1026_v61 = vadd.f32 %v1025_v58, %v5209_v38  ;;  %v1027_v63 = vpop.f32.mrb[45].mxu1 }
 0x189   :  { %v675_v62 = vadd.f32 %v674_v59, %v5213_v39  ;;  %v676_v1 = vpop.f32.mrb[46].mxu0  ;;  %v1028_v2 = vadd.f32 %v1027_v63, %v5218_v40  ;;  %v1029_v4 = vpop.f32.mrb[46].mxu1 }
 0x18a   :  { %v677_v3 = vadd.f32 %v676_v1, %v5205_v37  ;;  %v678_v5 = vpop.f32.mrb[47].mxu0  ;;  %v1030_v7 = vadd.f32 %v1029_v4, %v5209_v38  ;;  %v1031_v9 = vpop.f32.mrb[47].mxu1 }
 0x18b   :  { %v4664_v6 = vpack.c.bf16 %v675_v62, %v673_v57  ;;  %v679_v8 = vadd.f32 %v678_v5, %v5213_v39  ;;  %v4665_v10 = vpack.c.bf16 %v1028_v2, %v1026_v61  ;;  %v1032_v11 = vadd.f32 %v1031_v9, %v5218_v40 }
 0x18c   :  { %2693 = vmatmul.mubr.bf16.gmra.mrb[152].mxu0 %v4926_v60  ;;  %3046 = vmatmul.mubr.bf16.gmra.mrb[152].mxu1 %v4926_v60 }
 0x18d   :  { %2046 = vst [vmem:[#allocation8 + $0x160] sm:$0xff] %v4664_v6  ;;  %v4666_v12 = vpack.c.bf16 %v679_v8, %v677_v3  ;;  %2702 = vmatprep.mubr.bf16.mxu0 %v5077_v0  ;;  %2047 = vst [vmem:[#allocation8 + $0x168] sm:$0xff] %v4665_v10  ;;  %v4667_v13 = vpack.c.bf16 %v1032_v11, %v1030_v7  ;;  %3055 = vmatprep.mubr.bf16.mxu1 %v5077_v0  ;;  %v4929_v6 = vld [vmem:[#allocation2 + $0x48] sm:$0xff]  }
 0x18f   :  { %2048 = vst [vmem:[#allocation8 + $0x170] sm:$0xff] %v4666_v12  ;;  %v682_v14 = vpop.f32.mrb[48].mxu0  ;;  %2049 = vst [vmem:[#allocation8 + $0x178] sm:$0xff] %v4667_v13  ;;  %v1035_v16 = vpop.f32.mrb[48].mxu1 }
 0x190   :  { %v683_v15 = vadd.f32 %v682_v14, %v5205_v37  ;;  %v684_v17 = vpop.f32.mrb[49].mxu0  ;;  %v1036_v19 = vadd.f32 %v1035_v16, %v5209_v38  ;;  %v1037_v21 = vpop.f32.mrb[49].mxu1 }
 0x191   :  { %v685_v20 = vadd.f32 %v684_v17, %v5213_v39  ;;  %v686_v22 = vpop.f32.mrb[50].mxu0  ;;  %v1038_v23 = vadd.f32 %v1037_v21, %v5218_v40  ;;  %v1039_v25 = vpop.f32.mrb[50].mxu1 }
 0x192   :  { %v687_v24 = vadd.f32 %v686_v22, %v5205_v37  ;;  %v688_v26 = vpop.f32.mrb[51].mxu0  ;;  %v1040_v28 = vadd.f32 %v1039_v25, %v5209_v38  ;;  %v1041_v31 = vpop.f32.mrb[51].mxu1 }
 0x193   :  { %v4668_v27 = vpack.c.bf16 %v685_v20, %v683_v15  ;;  %v689_v29 = vadd.f32 %v688_v26, %v5213_v39  ;;  %v4669_v33 = vpack.c.bf16 %v1038_v23, %v1036_v19  ;;  %v1042_v41 = vadd.f32 %v1041_v31, %v5218_v40 }
 0x194   :  { %2703 = vmatmul.mubr.bf16.gmra.mrb[156].mxu0 %v4927_v18  ;;  %3056 = vmatmul.mubr.bf16.gmra.mrb[156].mxu1 %v4927_v18 }
 0x195   :  { %2050 = vst [vmem:[#allocation8 + $0x180] sm:$0xff] %v4668_v27  ;;  %v4670_v42 = vpack.c.bf16 %v689_v29, %v687_v24  ;;  %2712 = vmatprep.mubr.bf16.mxu0 %v5077_v0  ;;  %2051 = vst [vmem:[#allocation8 + $0x188] sm:$0xff] %v4669_v33  ;;  %v4671_v43 = vpack.c.bf16 %v1042_v41, %v1040_v28  ;;  %3065 = vmatprep.mubr.bf16.mxu1 %v5077_v0  ;;  %v4930_v27 = vld [vmem:[#allocation2 + $0x50] sm:$0xff]  }
 0x197   :  { %2052 = vst [vmem:[#allocation8 + $0x190] sm:$0xff] %v4670_v42  ;;  %v692_v44 = vpop.f32.mrb[52].mxu0  ;;  %2053 = vst [vmem:[#allocation8 + $0x198] sm:$0xff] %v4671_v43  ;;  %v1045_v46 = vpop.f32.mrb[52].mxu1 }
 0x198   :  { %v693_v45 = vadd.f32 %v692_v44, %v5205_v37  ;;  %v694_v47 = vpop.f32.mrb[53].mxu0  ;;  %v1046_v49 = vadd.f32 %v1045_v46, %v5209_v38  ;;  %v1047_v51 = vpop.f32.mrb[53].mxu1 }
 0x199   :  { %v695_v50 = vadd.f32 %v694_v47, %v5213_v39  ;;  %v696_v52 = vpop.f32.mrb[54].mxu0  ;;  %v1048_v53 = vadd.f32 %v1047_v51, %v5218_v40  ;;  %v1049_v55 = vpop.f32.mrb[54].mxu1 }
 0x19a   :  { %v697_v54 = vadd.f32 %v696_v52, %v5205_v37  ;;  %v698_v56 = vpop.f32.mrb[55].mxu0  ;;  %v1050_v58 = vadd.f32 %v1049_v55, %v5209_v38  ;;  %v1051_v60 = vpop.f32.mrb[55].mxu1 }
 0x19b   :  { %v4672_v57 = vpack.c.bf16 %v695_v50, %v693_v45  ;;  %v699_v59 = vadd.f32 %v698_v56, %v5213_v39  ;;  %v4673_v61 = vpack.c.bf16 %v1048_v53, %v1046_v49  ;;  %v1052_v62 = vadd.f32 %v1051_v60, %v5218_v40 }
 0x19c   :  { %2713 = vmatmul.mubr.bf16.gmra.mrb[160].mxu0 %v4928_v48  ;;  %3066 = vmatmul.mubr.bf16.gmra.mrb[160].mxu1 %v4928_v48 }
 0x19d   :  { %2054 = vst [vmem:[#allocation8 + $0x1a0] sm:$0xff] %v4672_v57  ;;  %v4674_v63 = vpack.c.bf16 %v699_v59, %v697_v54  ;;  %2722 = vmatprep.mubr.bf16.mxu0 %v5077_v0  ;;  %2055 = vst [vmem:[#allocation8 + $0x1a8] sm:$0xff] %v4673_v61  ;;  %v4675_v1 = vpack.c.bf16 %v1052_v62, %v1050_v58  ;;  %3075 = vmatprep.mubr.bf16.mxu1 %v5077_v0  ;;  %v4931_v57 = vld [vmem:[#allocation2 + $0x58] sm:$0xff]  }
 0x19f   :  { %2056 = vst [vmem:[#allocation8 + $0x1b0] sm:$0xff] %v4674_v63  ;;  %v702_v2 = vpop.f32.mrb[56].mxu0  ;;  %2057 = vst [vmem:[#allocation8 + $0x1b8] sm:$0xff] %v4675_v1  ;;  %v1055_v4 = vpop.f32.mrb[56].mxu1 }
 0x1a0   :  { %v703_v3 = vadd.f32 %v702_v2, %v5205_v37  ;;  %v704_v5 = vpop.f32.mrb[57].mxu0  ;;  %v1056_v7 = vadd.f32 %v1055_v4, %v5209_v38  ;;  %v1057_v9 = vpop.f32.mrb[57].mxu1 }
 0x1a1   :  { %v705_v8 = vadd.f32 %v704_v5, %v5213_v39  ;;  %v706_v10 = vpop.f32.mrb[58].mxu0  ;;  %v1058_v11 = vadd.f32 %v1057_v9, %v5218_v40  ;;  %v1059_v13 = vpop.f32.mrb[58].mxu1 }
 0x1a2   :  { %v707_v12 = vadd.f32 %v706_v10, %v5205_v37  ;;  %v708_v14 = vpop.f32.mrb[59].mxu0  ;;  %v1060_v16 = vadd.f32 %v1059_v13, %v5209_v38  ;;  %v1061_v18 = vpop.f32.mrb[59].mxu1 }
 0x1a3   :  { %v4676_v15 = vpack.c.bf16 %v705_v8, %v703_v3  ;;  %v709_v17 = vadd.f32 %v708_v14, %v5213_v39  ;;  %v4677_v19 = vpack.c.bf16 %v1058_v11, %v1056_v7  ;;  %v1062_v20 = vadd.f32 %v1061_v18, %v5218_v40 }
 0x1a4   :  { %2723 = vmatmul.mubr.bf16.gmra.mrb[164].mxu0 %v4929_v6  ;;  %3076 = vmatmul.mubr.bf16.gmra.mrb[164].mxu1 %v4929_v6 }
 0x1a5   :  { %2058 = vst [vmem:[#allocation8 + $0x1c0] sm:$0xff] %v4676_v15  ;;  %v4678_v21 = vpack.c.bf16 %v709_v17, %v707_v12  ;;  %2732 = vmatprep.mubr.bf16.mxu0 %v5077_v0  ;;  %2059 = vst [vmem:[#allocation8 + $0x1c8] sm:$0xff] %v4677_v19  ;;  %v4679_v22 = vpack.c.bf16 %v1062_v20, %v1060_v16  ;;  %3085 = vmatprep.mubr.bf16.mxu1 %v5077_v0  ;;  %v4932_v15 = vld [vmem:[#allocation2 + $0x60] sm:$0xff]  }
 0x1a7   :  { %2060 = vst [vmem:[#allocation8 + $0x1d0] sm:$0xff] %v4678_v21  ;;  %v712_v23 = vpop.f32.mrb[60].mxu0  ;;  %2061 = vst [vmem:[#allocation8 + $0x1d8] sm:$0xff] %v4679_v22  ;;  %v1065_v25 = vpop.f32.mrb[60].mxu1 }
 0x1a8   :  { %v713_v24 = vadd.f32 %v712_v23, %v5205_v37  ;;  %v714_v26 = vpop.f32.mrb[61].mxu0  ;;  %v1066_v28 = vadd.f32 %v1065_v25, %v5209_v38  ;;  %v1067_v31 = vpop.f32.mrb[61].mxu1 }
 0x1a9   :  { %v715_v29 = vadd.f32 %v714_v26, %v5213_v39  ;;  %v716_v33 = vpop.f32.mrb[62].mxu0  ;;  %v1068_v41 = vadd.f32 %v1067_v31, %v5218_v40  ;;  %v1069_v43 = vpop.f32.mrb[62].mxu1 }
 0x1aa   :  { %v717_v42 = vadd.f32 %v716_v33, %v5205_v37  ;;  %v718_v44 = vpop.f32.mrb[63].mxu0  ;;  %v1070_v46 = vadd.f32 %v1069_v43, %v5209_v38  ;;  %v1071_v48 = vpop.f32.mrb[63].mxu1 }
 0x1ab   :  { %v4680_v45 = vpack.c.bf16 %v715_v29, %v713_v24  ;;  %v719_v47 = vadd.f32 %v718_v44, %v5213_v39  ;;  %v4681_v49 = vpack.c.bf16 %v1068_v41, %v1066_v28  ;;  %v1072_v50 = vadd.f32 %v1071_v48, %v5218_v40 }
 0x1ac   :  { %2733 = vmatmul.mubr.bf16.gmra.mrb[168].mxu0 %v4930_v27  ;;  %3086 = vmatmul.mubr.bf16.gmra.mrb[168].mxu1 %v4930_v27 }
 0x1ad   :  { %2062 = vst [vmem:[#allocation8 + $0x1e0] sm:$0xff] %v4680_v45  ;;  %v4682_v51 = vpack.c.bf16 %v719_v47, %v717_v42  ;;  %2742 = vmatprep.mubr.bf16.mxu0 %v5077_v0  ;;  %2063 = vst [vmem:[#allocation8 + $0x1e8] sm:$0xff] %v4681_v49  ;;  %v4683_v52 = vpack.c.bf16 %v1072_v50, %v1070_v46  ;;  %3095 = vmatprep.mubr.bf16.mxu1 %v5077_v0  ;;  %v4933_v45 = vld [vmem:[#allocation2 + $0x68] sm:$0xff]  }
 0x1af   :  { %2064 = vst [vmem:[#allocation8 + $0x1f0] sm:$0xff] %v4682_v51  ;;  %v722_v53 = vpop.f32.mrb[64].mxu0  ;;  %2065 = vst [vmem:[#allocation8 + $0x1f8] sm:$0xff] %v4683_v52  ;;  %v1075_v55 = vpop.f32.mrb[64].mxu1 }
 0x1b0   :  { %v723_v54 = vadd.f32 %v722_v53, %v5205_v37  ;;  %v724_v56 = vpop.f32.mrb[65].mxu0  ;;  %v1076_v58 = vadd.f32 %v1075_v55, %v5209_v38  ;;  %v1077_v60 = vpop.f32.mrb[65].mxu1 }
 0x1b1   :  { %v725_v59 = vadd.f32 %v724_v56, %v5213_v39  ;;  %v726_v61 = vpop.f32.mrb[66].mxu0  ;;  %v1078_v62 = vadd.f32 %v1077_v60, %v5218_v40  ;;  %v1079_v1 = vpop.f32.mrb[66].mxu1 }
 0x1b2   :  { %v727_v63 = vadd.f32 %v726_v61, %v5205_v37  ;;  %v728_v2 = vpop.f32.mrb[67].mxu0  ;;  %v1080_v4 = vadd.f32 %v1079_v1, %v5209_v38  ;;  %v1081_v6 = vpop.f32.mrb[67].mxu1 }
 0x1b3   :  { %v4684_v3 = vpack.c.bf16 %v725_v59, %v723_v54  ;;  %v729_v5 = vadd.f32 %v728_v2, %v5213_v39  ;;  %v4685_v7 = vpack.c.bf16 %v1078_v62, %v1076_v58  ;;  %v1082_v8 = vadd.f32 %v1081_v6, %v5218_v40 }
 0x1b4   :  { %2743 = vmatmul.mubr.bf16.gmra.mrb[172].mxu0 %v4931_v57  ;;  %3096 = vmatmul.mubr.bf16.gmra.mrb[172].mxu1 %v4931_v57 }
 0x1b5   :  { %2066 = vst [vmem:[#allocation8 + $0x200] sm:$0xff] %v4684_v3  ;;  %v4686_v9 = vpack.c.bf16 %v729_v5, %v727_v63  ;;  %2752 = vmatprep.mubr.bf16.mxu0 %v5077_v0  ;;  %2067 = vst [vmem:[#allocation8 + $0x208] sm:$0xff] %v4685_v7  ;;  %v4687_v10 = vpack.c.bf16 %v1082_v8, %v1080_v4  ;;  %3105 = vmatprep.mubr.bf16.mxu1 %v5077_v0  ;;  %v4934_v3 = vld [vmem:[#allocation2 + $0x70] sm:$0xff]  }
 0x1b7   :  { %2068 = vst [vmem:[#allocation8 + $0x210] sm:$0xff] %v4686_v9  ;;  %v732_v11 = vpop.f32.mrb[68].mxu0  ;;  %2069 = vst [vmem:[#allocation8 + $0x218] sm:$0xff] %v4687_v10  ;;  %v1085_v13 = vpop.f32.mrb[68].mxu1 }
 0x1b8   :  { %v733_v12 = vadd.f32 %v732_v11, %v5205_v37  ;;  %v734_v14 = vpop.f32.mrb[69].mxu0  ;;  %v1086_v16 = vadd.f32 %v1085_v13, %v5209_v38  ;;  %v1087_v18 = vpop.f32.mrb[69].mxu1 }
 0x1b9   :  { %v735_v17 = vadd.f32 %v734_v14, %v5213_v39  ;;  %v736_v19 = vpop.f32.mrb[70].mxu0  ;;  %v1088_v20 = vadd.f32 %v1087_v18, %v5218_v40  ;;  %v1089_v22 = vpop.f32.mrb[70].mxu1 }
 0x1ba   :  { %v737_v21 = vadd.f32 %v736_v19, %v5205_v37  ;;  %v738_v23 = vpop.f32.mrb[71].mxu0  ;;  %v1090_v25 = vadd.f32 %v1089_v22, %v5209_v38  ;;  %v1091_v27 = vpop.f32.mrb[71].mxu1 }
 0x1bb   :  { %v4688_v24 = vpack.c.bf16 %v735_v17, %v733_v12  ;;  %v739_v26 = vadd.f32 %v738_v23, %v5213_v39  ;;  %v4689_v28 = vpack.c.bf16 %v1088_v20, %v1086_v16  ;;  %v1092_v29 = vadd.f32 %v1091_v27, %v5218_v40 }
 0x1bc   :  { %2753 = vmatmul.mubr.bf16.gmra.mrb[176].mxu0 %v4932_v15  ;;  %3106 = vmatmul.mubr.bf16.gmra.mrb[176].mxu1 %v4932_v15 }
 0x1bd   :  { %2070 = vst [vmem:[#allocation8 + $0x220] sm:$0xff] %v4688_v24  ;;  %v4690_v31 = vpack.c.bf16 %v739_v26, %v737_v21  ;;  %2762 = vmatprep.mubr.bf16.mxu0 %v5077_v0  ;;  %2071 = vst [vmem:[#allocation8 + $0x228] sm:$0xff] %v4689_v28  ;;  %v4691_v33 = vpack.c.bf16 %v1092_v29, %v1090_v25  ;;  %3115 = vmatprep.mubr.bf16.mxu1 %v5077_v0  ;;  %v4935_v24 = vld [vmem:[#allocation2 + $0x78] sm:$0xff]  }
 0x1bf   :  { %2072 = vst [vmem:[#allocation8 + $0x230] sm:$0xff] %v4690_v31  ;;  %v742_v41 = vpop.f32.mrb[72].mxu0  ;;  %2073 = vst [vmem:[#allocation8 + $0x238] sm:$0xff] %v4691_v33  ;;  %v1095_v43 = vpop.f32.mrb[72].mxu1 }
 0x1c0   :  { %v743_v42 = vadd.f32 %v742_v41, %v5205_v37  ;;  %v744_v44 = vpop.f32.mrb[73].mxu0  ;;  %v1096_v46 = vadd.f32 %v1095_v43, %v5209_v38  ;;  %v1097_v48 = vpop.f32.mrb[73].mxu1 }
 0x1c1   :  { %v745_v47 = vadd.f32 %v744_v44, %v5213_v39  ;;  %v746_v49 = vpop.f32.mrb[74].mxu0  ;;  %v1098_v50 = vadd.f32 %v1097_v48, %v5218_v40  ;;  %v1099_v52 = vpop.f32.mrb[74].mxu1 }
 0x1c2   :  { %v747_v51 = vadd.f32 %v746_v49, %v5205_v37  ;;  %v748_v53 = vpop.f32.mrb[75].mxu0  ;;  %v1100_v55 = vadd.f32 %v1099_v52, %v5209_v38  ;;  %v1101_v57 = vpop.f32.mrb[75].mxu1 }
 0x1c3   :  { %v4692_v54 = vpack.c.bf16 %v745_v47, %v743_v42  ;;  %v749_v56 = vadd.f32 %v748_v53, %v5213_v39  ;;  %v4693_v58 = vpack.c.bf16 %v1098_v50, %v1096_v46  ;;  %v1102_v59 = vadd.f32 %v1101_v57, %v5218_v40 }
 0x1c4   :  { %2763 = vmatmul.mubr.bf16.gmra.mrb[180].mxu0 %v4933_v45  ;;  %3116 = vmatmul.mubr.bf16.gmra.mrb[180].mxu1 %v4933_v45 }
 0x1c5   :  { %2074 = vst [vmem:[#allocation8 + $0x240] sm:$0xff] %v4692_v54  ;;  %v4694_v60 = vpack.c.bf16 %v749_v56, %v747_v51  ;;  %2772 = vmatprep.mubr.bf16.mxu0 %v5077_v0  ;;  %2075 = vst [vmem:[#allocation8 + $0x248] sm:$0xff] %v4693_v58  ;;  %v4695_v61 = vpack.c.bf16 %v1102_v59, %v1100_v55  ;;  %3125 = vmatprep.mubr.bf16.mxu1 %v5077_v0  ;;  %v4936_v54 = vld [vmem:[#allocation2 + $0x80] sm:$0xff]  }
 0x1c7   :  { %2076 = vst [vmem:[#allocation8 + $0x250] sm:$0xff] %v4694_v60  ;;  %v752_v62 = vpop.f32.mrb[76].mxu0  ;;  %2077 = vst [vmem:[#allocation8 + $0x258] sm:$0xff] %v4695_v61  ;;  %v1105_v1 = vpop.f32.mrb[76].mxu1 }
 0x1c8   :  { %v753_v63 = vadd.f32 %v752_v62, %v5205_v37  ;;  %v754_v2 = vpop.f32.mrb[77].mxu0  ;;  %v1106_v4 = vadd.f32 %v1105_v1, %v5209_v38  ;;  %v1107_v6 = vpop.f32.mrb[77].mxu1 }
 0x1c9   :  { %v755_v5 = vadd.f32 %v754_v2, %v5213_v39  ;;  %v756_v7 = vpop.f32.mrb[78].mxu0  ;;  %v1108_v8 = vadd.f32 %v1107_v6, %v5218_v40  ;;  %v1109_v10 = vpop.f32.mrb[78].mxu1 }
 0x1ca   :  { %v757_v9 = vadd.f32 %v756_v7, %v5205_v37  ;;  %v758_v11 = vpop.f32.mrb[79].mxu0  ;;  %v1110_v13 = vadd.f32 %v1109_v10, %v5209_v38  ;;  %v1111_v15 = vpop.f32.mrb[79].mxu1 }
 0x1cb   :  { %v4696_v12 = vpack.c.bf16 %v755_v5, %v753_v63  ;;  %v759_v14 = vadd.f32 %v758_v11, %v5213_v39  ;;  %v4697_v16 = vpack.c.bf16 %v1108_v8, %v1106_v4  ;;  %v1112_v17 = vadd.f32 %v1111_v15, %v5218_v40 }
 0x1cc   :  { %2773 = vmatmul.mubr.bf16.gmra.mrb[184].mxu0 %v4934_v3  ;;  %3126 = vmatmul.mubr.bf16.gmra.mrb[184].mxu1 %v4934_v3 }
 0x1cd   :  { %2078 = vst [vmem:[#allocation8 + $0x260] sm:$0xff] %v4696_v12  ;;  %v4698_v18 = vpack.c.bf16 %v759_v14, %v757_v9  ;;  %2782 = vmatprep.mubr.bf16.mxu0 %v5077_v0  ;;  %2079 = vst [vmem:[#allocation8 + $0x268] sm:$0xff] %v4697_v16  ;;  %v4699_v19 = vpack.c.bf16 %v1112_v17, %v1110_v13  ;;  %3135 = vmatprep.mubr.bf16.mxu1 %v5077_v0  ;;  %v4937_v12 = vld [vmem:[#allocation2 + $0x88] sm:$0xff]  }
 0x1cf   :  { %2080 = vst [vmem:[#allocation8 + $0x270] sm:$0xff] %v4698_v18  ;;  %v762_v20 = vpop.f32.mrb[80].mxu0  ;;  %2081 = vst [vmem:[#allocation8 + $0x278] sm:$0xff] %v4699_v19  ;;  %v1115_v22 = vpop.f32.mrb[80].mxu1 }
 0x1d0   :  { %v763_v21 = vadd.f32 %v762_v20, %v5205_v37  ;;  %v764_v23 = vpop.f32.mrb[81].mxu0  ;;  %v1116_v25 = vadd.f32 %v1115_v22, %v5209_v38  ;;  %v1117_v27 = vpop.f32.mrb[81].mxu1 }
 0x1d1   :  { %v765_v26 = vadd.f32 %v764_v23, %v5213_v39  ;;  %v766_v28 = vpop.f32.mrb[82].mxu0  ;;  %v1118_v29 = vadd.f32 %v1117_v27, %v5218_v40  ;;  %v1119_v33 = vpop.f32.mrb[82].mxu1 }
 0x1d2   :  { %v767_v31 = vadd.f32 %v766_v28, %v5205_v37  ;;  %v768_v41 = vpop.f32.mrb[83].mxu0  ;;  %v1120_v43 = vadd.f32 %v1119_v33, %v5209_v38  ;;  %v1121_v45 = vpop.f32.mrb[83].mxu1 }
 0x1d3   :  { %v4700_v42 = vpack.c.bf16 %v765_v26, %v763_v21  ;;  %v769_v44 = vadd.f32 %v768_v41, %v5213_v39  ;;  %v4701_v46 = vpack.c.bf16 %v1118_v29, %v1116_v25  ;;  %v1122_v47 = vadd.f32 %v1121_v45, %v5218_v40 }
 0x1d4   :  { %2783 = vmatmul.mubr.bf16.gmra.mrb[188].mxu0 %v4935_v24  ;;  %3136 = vmatmul.mubr.bf16.gmra.mrb[188].mxu1 %v4935_v24 }
 0x1d5   :  { %2082 = vst [vmem:[#allocation8 + $0x280] sm:$0xff] %v4700_v42  ;;  %v4702_v48 = vpack.c.bf16 %v769_v44, %v767_v31  ;;  %2792 = vmatprep.mubr.bf16.mxu0 %v5077_v0  ;;  %2083 = vst [vmem:[#allocation8 + $0x288] sm:$0xff] %v4701_v46  ;;  %v4703_v49 = vpack.c.bf16 %v1122_v47, %v1120_v43  ;;  %3145 = vmatprep.mubr.bf16.mxu1 %v5077_v0  ;;  %v4938_v42 = vld [vmem:[#allocation2 + $0x90] sm:$0xff]  }
 0x1d7   :  { %2084 = vst [vmem:[#allocation8 + $0x290] sm:$0xff] %v4702_v48  ;;  %v772_v50 = vpop.f32.mrb[84].mxu0  ;;  %2085 = vst [vmem:[#allocation8 + $0x298] sm:$0xff] %v4703_v49  ;;  %v1125_v52 = vpop.f32.mrb[84].mxu1 }
 0x1d8   :  { %v773_v51 = vadd.f32 %v772_v50, %v5205_v37  ;;  %v774_v53 = vpop.f32.mrb[85].mxu0  ;;  %v1126_v55 = vadd.f32 %v1125_v52, %v5209_v38  ;;  %v1127_v57 = vpop.f32.mrb[85].mxu1 }
 0x1d9   :  { %v775_v56 = vadd.f32 %v774_v53, %v5213_v39  ;;  %v776_v58 = vpop.f32.mrb[86].mxu0  ;;  %v1128_v59 = vadd.f32 %v1127_v57, %v5218_v40  ;;  %v1129_v61 = vpop.f32.mrb[86].mxu1 }
 0x1da   :  { %v777_v60 = vadd.f32 %v776_v58, %v5205_v37  ;;  %v778_v62 = vpop.f32.mrb[87].mxu0  ;;  %v1130_v1 = vadd.f32 %v1129_v61, %v5209_v38  ;;  %v1131_v3 = vpop.f32.mrb[87].mxu1 }
 0x1db   :  { %v4704_v63 = vpack.c.bf16 %v775_v56, %v773_v51  ;;  %v779_v2 = vadd.f32 %v778_v62, %v5213_v39  ;;  %v4705_v4 = vpack.c.bf16 %v1128_v59, %v1126_v55  ;;  %v1132_v5 = vadd.f32 %v1131_v3, %v5218_v40 }
 0x1dc   :  { %2793 = vmatmul.mubr.bf16.gmra.mrb[192].mxu0 %v4936_v54  ;;  %3146 = vmatmul.mubr.bf16.gmra.mrb[192].mxu1 %v4936_v54 }
 0x1dd   :  { %2086 = vst [vmem:[#allocation8 + $0x2a0] sm:$0xff] %v4704_v63  ;;  %v4706_v6 = vpack.c.bf16 %v779_v2, %v777_v60  ;;  %2802 = vmatprep.mubr.bf16.mxu0 %v5077_v0  ;;  %2087 = vst [vmem:[#allocation8 + $0x2a8] sm:$0xff] %v4705_v4  ;;  %v4707_v7 = vpack.c.bf16 %v1132_v5, %v1130_v1  ;;  %3155 = vmatprep.mubr.bf16.mxu1 %v5077_v0  ;;  %v4939_v63 = vld [vmem:[#allocation2 + $0x98] sm:$0xff]  }
 0x1df   :  { %2088 = vst [vmem:[#allocation8 + $0x2b0] sm:$0xff] %v4706_v6  ;;  %v782_v8 = vpop.f32.mrb[88].mxu0  ;;  %2089 = vst [vmem:[#allocation8 + $0x2b8] sm:$0xff] %v4707_v7  ;;  %v1135_v10 = vpop.f32.mrb[88].mxu1 }
 0x1e0   :  { %v783_v9 = vadd.f32 %v782_v8, %v5205_v37  ;;  %v784_v11 = vpop.f32.mrb[89].mxu0  ;;  %v1136_v13 = vadd.f32 %v1135_v10, %v5209_v38  ;;  %v1137_v15 = vpop.f32.mrb[89].mxu1 }
 0x1e1   :  { %v785_v14 = vadd.f32 %v784_v11, %v5213_v39  ;;  %v786_v16 = vpop.f32.mrb[90].mxu0  ;;  %v1138_v17 = vadd.f32 %v1137_v15, %v5218_v40  ;;  %v1139_v19 = vpop.f32.mrb[90].mxu1 }
 0x1e2   :  { %v787_v18 = vadd.f32 %v786_v16, %v5205_v37  ;;  %v788_v20 = vpop.f32.mrb[91].mxu0  ;;  %v1140_v22 = vadd.f32 %v1139_v19, %v5209_v38  ;;  %v1141_v24 = vpop.f32.mrb[91].mxu1 }
 0x1e3   :  { %v4708_v21 = vpack.c.bf16 %v785_v14, %v783_v9  ;;  %v789_v23 = vadd.f32 %v788_v20, %v5213_v39  ;;  %v4709_v25 = vpack.c.bf16 %v1138_v17, %v1136_v13  ;;  %v1142_v26 = vadd.f32 %v1141_v24, %v5218_v40 }
 0x1e4   :  { %2803 = vmatmul.mubr.bf16.gmra.mrb[196].mxu0 %v4937_v12  ;;  %3156 = vmatmul.mubr.bf16.gmra.mrb[196].mxu1 %v4937_v12 }
 0x1e5   :  { %2090 = vst [vmem:[#allocation8 + $0x2c0] sm:$0xff] %v4708_v21  ;;  %v4710_v27 = vpack.c.bf16 %v789_v23, %v787_v18  ;;  %2812 = vmatprep.mubr.bf16.mxu0 %v5077_v0  ;;  %2091 = vst [vmem:[#allocation8 + $0x2c8] sm:$0xff] %v4709_v25  ;;  %v4711_v28 = vpack.c.bf16 %v1142_v26, %v1140_v22  ;;  %3165 = vmatprep.mubr.bf16.mxu1 %v5077_v0  ;;  %v4940_v21 = vld [vmem:[#allocation2 + $0xa0] sm:$0xff]  }
 0x1e7   :  { %2092 = vst [vmem:[#allocation8 + $0x2d0] sm:$0xff] %v4710_v27  ;;  %v792_v29 = vpop.f32.mrb[92].mxu0  ;;  %2093 = vst [vmem:[#allocation8 + $0x2d8] sm:$0xff] %v4711_v28  ;;  %v1145_v33 = vpop.f32.mrb[92].mxu1 }
 0x1e8   :  { %v793_v31 = vadd.f32 %v792_v29, %v5205_v37  ;;  %v794_v41 = vpop.f32.mrb[93].mxu0  ;;  %v1146_v43 = vadd.f32 %v1145_v33, %v5209_v38  ;;  %v1147_v45 = vpop.f32.mrb[93].mxu1 }
 0x1e9   :  { %v795_v44 = vadd.f32 %v794_v41, %v5213_v39  ;;  %v796_v46 = vpop.f32.mrb[94].mxu0  ;;  %v1148_v47 = vadd.f32 %v1147_v45, %v5218_v40  ;;  %v1149_v49 = vpop.f32.mrb[94].mxu1 }
 0x1ea   :  { %v797_v48 = vadd.f32 %v796_v46, %v5205_v37  ;;  %v798_v50 = vpop.f32.mrb[95].mxu0  ;;  %v1150_v52 = vadd.f32 %v1149_v49, %v5209_v38  ;;  %v1151_v54 = vpop.f32.mrb[95].mxu1 }
 0x1eb   :  { %v4712_v51 = vpack.c.bf16 %v795_v44, %v793_v31  ;;  %v799_v53 = vadd.f32 %v798_v50, %v5213_v39  ;;  %v4713_v55 = vpack.c.bf16 %v1148_v47, %v1146_v43  ;;  %v1152_v56 = vadd.f32 %v1151_v54, %v5218_v40 }
 0x1ec   :  { %2813 = vmatmul.mubr.bf16.gmra.mrb[200].mxu0 %v4938_v42  ;;  %3166 = vmatmul.mubr.bf16.gmra.mrb[200].mxu1 %v4938_v42 }
 0x1ed   :  { %2094 = vst [vmem:[#allocation8 + $0x2e0] sm:$0xff] %v4712_v51  ;;  %v4714_v57 = vpack.c.bf16 %v799_v53, %v797_v48  ;;  %2822 = vmatprep.mubr.bf16.mxu0 %v5077_v0  ;;  %2095 = vst [vmem:[#allocation8 + $0x2e8] sm:$0xff] %v4713_v55  ;;  %v4715_v58 = vpack.c.bf16 %v1152_v56, %v1150_v52  ;;  %3175 = vmatprep.mubr.bf16.mxu1 %v5077_v0  ;;  %v4941_v51 = vld [vmem:[#allocation2 + $0xa8] sm:$0xff]  }
 0x1ef   :  { %2096 = vst [vmem:[#allocation8 + $0x2f0] sm:$0xff] %v4714_v57  ;;  %v802_v59 = vpop.f32.mrb[96].mxu0  ;;  %2097 = vst [vmem:[#allocation8 + $0x2f8] sm:$0xff] %v4715_v58  ;;  %v1155_v61 = vpop.f32.mrb[96].mxu1 }
 0x1f0   :  { %v803_v60 = vadd.f32 %v802_v59, %v5205_v37  ;;  %v804_v62 = vpop.f32.mrb[97].mxu0  ;;  %v1156_v1 = vadd.f32 %v1155_v61, %v5209_v38  ;;  %v1157_v3 = vpop.f32.mrb[97].mxu1 }
 0x1f1   :  { %v805_v2 = vadd.f32 %v804_v62, %v5213_v39  ;;  %v806_v4 = vpop.f32.mrb[98].mxu0  ;;  %v1158_v5 = vadd.f32 %v1157_v3, %v5218_v40  ;;  %v1159_v7 = vpop.f32.mrb[98].mxu1 }
 0x1f2   :  { %v807_v6 = vadd.f32 %v806_v4, %v5205_v37  ;;  %v808_v8 = vpop.f32.mrb[99].mxu0  ;;  %v1160_v10 = vadd.f32 %v1159_v7, %v5209_v38  ;;  %v1161_v12 = vpop.f32.mrb[99].mxu1 }
 0x1f3   :  { %v4716_v9 = vpack.c.bf16 %v805_v2, %v803_v60  ;;  %v809_v11 = vadd.f32 %v808_v8, %v5213_v39  ;;  %v4717_v13 = vpack.c.bf16 %v1158_v5, %v1156_v1  ;;  %v1162_v14 = vadd.f32 %v1161_v12, %v5218_v40 }
 0x1f4   :  { %2823 = vmatmul.mubr.bf16.gmra.mrb[204].mxu0 %v4939_v63  ;;  %3176 = vmatmul.mubr.bf16.gmra.mrb[204].mxu1 %v4939_v63 }
 0x1f5   :  { %2098 = vst [vmem:[#allocation8 + $0x300] sm:$0xff] %v4716_v9  ;;  %v4718_v15 = vpack.c.bf16 %v809_v11, %v807_v6  ;;  %2832 = vmatprep.mubr.bf16.mxu0 %v5077_v0  ;;  %2099 = vst [vmem:[#allocation8 + $0x308] sm:$0xff] %v4717_v13  ;;  %v4719_v16 = vpack.c.bf16 %v1162_v14, %v1160_v10  ;;  %3185 = vmatprep.mubr.bf16.mxu1 %v5077_v0  ;;  %v4942_v9 = vld [vmem:[#allocation2 + $0xb0] sm:$0xff]  }
 0x1f7   :  { %2100 = vst [vmem:[#allocation8 + $0x310] sm:$0xff] %v4718_v15  ;;  %v812_v17 = vpop.f32.mrb[100].mxu0  ;;  %2101 = vst [vmem:[#allocation8 + $0x318] sm:$0xff] %v4719_v16  ;;  %v1165_v19 = vpop.f32.mrb[100].mxu1 }
 0x1f8   :  { %v813_v18 = vadd.f32 %v812_v17, %v5205_v37  ;;  %v814_v20 = vpop.f32.mrb[101].mxu0  ;;  %v1166_v22 = vadd.f32 %v1165_v19, %v5209_v38  ;;  %v1167_v24 = vpop.f32.mrb[101].mxu1 }
 0x1f9   :  { %v815_v23 = vadd.f32 %v814_v20, %v5213_v39  ;;  %v816_v25 = vpop.f32.mrb[102].mxu0  ;;  %v1168_v26 = vadd.f32 %v1167_v24, %v5218_v40  ;;  %v1169_v28 = vpop.f32.mrb[102].mxu1 }
 0x1fa   :  { %v817_v27 = vadd.f32 %v816_v25, %v5205_v37  ;;  %v818_v29 = vpop.f32.mrb[103].mxu0  ;;  %v1170_v33 = vadd.f32 %v1169_v28, %v5209_v38  ;;  %v1171_v42 = vpop.f32.mrb[103].mxu1 }
 0x1fb   :  { %v4720_v31 = vpack.c.bf16 %v815_v23, %v813_v18  ;;  %v819_v41 = vadd.f32 %v818_v29, %v5213_v39  ;;  %v4721_v43 = vpack.c.bf16 %v1168_v26, %v1166_v22  ;;  %v1172_v44 = vadd.f32 %v1171_v42, %v5218_v40 }
 0x1fc   :  { %2833 = vmatmul.mubr.bf16.gmra.mrb[208].mxu0 %v4940_v21  ;;  %3186 = vmatmul.mubr.bf16.gmra.mrb[208].mxu1 %v4940_v21 }
 0x1fd   :  { %2102 = vst [vmem:[#allocation8 + $0x320] sm:$0xff] %v4720_v31  ;;  %v4722_v45 = vpack.c.bf16 %v819_v41, %v817_v27  ;;  %2842 = vmatprep.mubr.bf16.mxu0 %v5077_v0  ;;  %2103 = vst [vmem:[#allocation8 + $0x328] sm:$0xff] %v4721_v43  ;;  %v4723_v46 = vpack.c.bf16 %v1172_v44, %v1170_v33  ;;  %3195 = vmatprep.mubr.bf16.mxu1 %v5077_v0  ;;  %v4943_v31 = vld [vmem:[#allocation2 + $0xb8] sm:$0xff]  }
 0x1ff   :  { %2104 = vst [vmem:[#allocation8 + $0x330] sm:$0xff] %v4722_v45  ;;  %v822_v47 = vpop.f32.mrb[104].mxu0  ;;  %2105 = vst [vmem:[#allocation8 + $0x338] sm:$0xff] %v4723_v46  ;;  %v1175_v49 = vpop.f32.mrb[104].mxu1 }
 0x200   :  { %v823_v48 = vadd.f32 %v822_v47, %v5205_v37  ;;  %v824_v50 = vpop.f32.mrb[105].mxu0  ;;  %v1176_v52 = vadd.f32 %v1175_v49, %v5209_v38  ;;  %v1177_v54 = vpop.f32.mrb[105].mxu1 }
 0x201   :  { %v825_v53 = vadd.f32 %v824_v50, %v5213_v39  ;;  %v826_v55 = vpop.f32.mrb[106].mxu0  ;;  %v1178_v56 = vadd.f32 %v1177_v54, %v5218_v40  ;;  %v1179_v58 = vpop.f32.mrb[106].mxu1 }
 0x202   :  { %v827_v57 = vadd.f32 %v826_v55, %v5205_v37  ;;  %v828_v59 = vpop.f32.mrb[107].mxu0  ;;  %v1180_v61 = vadd.f32 %v1179_v58, %v5209_v38  ;;  %v1181_v63 = vpop.f32.mrb[107].mxu1 }
 0x203   :  { %v4724_v60 = vpack.c.bf16 %v825_v53, %v823_v48  ;;  %v829_v62 = vadd.f32 %v828_v59, %v5213_v39  ;;  %v4725_v1 = vpack.c.bf16 %v1178_v56, %v1176_v52  ;;  %v1182_v2 = vadd.f32 %v1181_v63, %v5218_v40 }
 0x204   :  { %2843 = vmatmul.mubr.bf16.gmra.mrb[212].mxu0 %v4941_v51  ;;  %3196 = vmatmul.mubr.bf16.gmra.mrb[212].mxu1 %v4941_v51 }
 0x205   :  { %2106 = vst [vmem:[#allocation8 + $0x340] sm:$0xff] %v4724_v60  ;;  %v4726_v3 = vpack.c.bf16 %v829_v62, %v827_v57  ;;  %2852 = vmatprep.mubr.bf16.mxu0 %v5077_v0  ;;  %2107 = vst [vmem:[#allocation8 + $0x348] sm:$0xff] %v4725_v1  ;;  %v4727_v4 = vpack.c.bf16 %v1182_v2, %v1180_v61  ;;  %3205 = vmatprep.mubr.bf16.mxu1 %v5077_v0  ;;  %v4944_v60 = vld [vmem:[#allocation2 + $0xc0] sm:$0xff]  }
 0x207   :  { %2108 = vst [vmem:[#allocation8 + $0x350] sm:$0xff] %v4726_v3  ;;  %v832_v5 = vpop.f32.mrb[108].mxu0  ;;  %2109 = vst [vmem:[#allocation8 + $0x358] sm:$0xff] %v4727_v4  ;;  %v1185_v7 = vpop.f32.mrb[108].mxu1 }
 0x208   :  { %v833_v6 = vadd.f32 %v832_v5, %v5205_v37  ;;  %v834_v8 = vpop.f32.mrb[109].mxu0  ;;  %v1186_v10 = vadd.f32 %v1185_v7, %v5209_v38  ;;  %v1187_v12 = vpop.f32.mrb[109].mxu1 }
 0x209   :  { %v835_v11 = vadd.f32 %v834_v8, %v5213_v39  ;;  %v836_v13 = vpop.f32.mrb[110].mxu0  ;;  %v1188_v14 = vadd.f32 %v1187_v12, %v5218_v40  ;;  %v1189_v16 = vpop.f32.mrb[110].mxu1 }
 0x20a   :  { %v837_v15 = vadd.f32 %v836_v13, %v5205_v37  ;;  %v838_v17 = vpop.f32.mrb[111].mxu0  ;;  %v1190_v19 = vadd.f32 %v1189_v16, %v5209_v38  ;;  %v1191_v21 = vpop.f32.mrb[111].mxu1 }
 0x20b   :  { %v4728_v18 = vpack.c.bf16 %v835_v11, %v833_v6  ;;  %v839_v20 = vadd.f32 %v838_v17, %v5213_v39  ;;  %v4729_v22 = vpack.c.bf16 %v1188_v14, %v1186_v10  ;;  %v1192_v23 = vadd.f32 %v1191_v21, %v5218_v40 }
 0x20c   :  { %2853 = vmatmul.mubr.bf16.gmra.mrb[216].mxu0 %v4942_v9  ;;  %3206 = vmatmul.mubr.bf16.gmra.mrb[216].mxu1 %v4942_v9 }
 0x20d   :  { %2110 = vst [vmem:[#allocation8 + $0x360] sm:$0xff] %v4728_v18  ;;  %v4730_v24 = vpack.c.bf16 %v839_v20, %v837_v15  ;;  %2862 = vmatprep.mubr.bf16.mxu0 %v5077_v0  ;;  %2111 = vst [vmem:[#allocation8 + $0x368] sm:$0xff] %v4729_v22  ;;  %v4731_v25 = vpack.c.bf16 %v1192_v23, %v1190_v19  ;;  %3215 = vmatprep.mubr.bf16.mxu1 %v5077_v0  ;;  %v4945_v18 = vld [vmem:[#allocation2 + $0xc8] sm:$0xff]  }
 0x20f   :  { %2112 = vst [vmem:[#allocation8 + $0x370] sm:$0xff] %v4730_v24  ;;  %v842_v26 = vpop.f32.mrb[112].mxu0  ;;  %2113 = vst [vmem:[#allocation8 + $0x378] sm:$0xff] %v4731_v25  ;;  %v1195_v28 = vpop.f32.mrb[112].mxu1 }
 0x210   :  { %v843_v27 = vadd.f32 %v842_v26, %v5205_v37  ;;  %v844_v29 = vpop.f32.mrb[113].mxu0  ;;  %v1196_v33 = vadd.f32 %v1195_v28, %v5209_v38  ;;  %v1197_v42 = vpop.f32.mrb[113].mxu1 }
 0x211   :  { %v845_v41 = vadd.f32 %v844_v29, %v5213_v39  ;;  %v846_v43 = vpop.f32.mrb[114].mxu0  ;;  %v1198_v44 = vadd.f32 %v1197_v42, %v5218_v40  ;;  %v1199_v46 = vpop.f32.mrb[114].mxu1 }
 0x212   :  { %v847_v45 = vadd.f32 %v846_v43, %v5205_v37  ;;  %v848_v47 = vpop.f32.mrb[115].mxu0  ;;  %v1200_v49 = vadd.f32 %v1199_v46, %v5209_v38  ;;  %v1201_v51 = vpop.f32.mrb[115].mxu1 }
 0x213   :  { %v4732_v48 = vpack.c.bf16 %v845_v41, %v843_v27  ;;  %v849_v50 = vadd.f32 %v848_v47, %v5213_v39  ;;  %v4733_v52 = vpack.c.bf16 %v1198_v44, %v1196_v33  ;;  %v1202_v53 = vadd.f32 %v1201_v51, %v5218_v40 }
 0x214   :  { %2863 = vmatmul.mubr.bf16.gmra.mrb[220].mxu0 %v4943_v31  ;;  %3216 = vmatmul.mubr.bf16.gmra.mrb[220].mxu1 %v4943_v31 }
 0x215   :  { %2114 = vst [vmem:[#allocation8 + $0x380] sm:$0xff] %v4732_v48  ;;  %v4734_v54 = vpack.c.bf16 %v849_v50, %v847_v45  ;;  %2872 = vmatprep.mubr.bf16.mxu0 %v5077_v0  ;;  %2115 = vst [vmem:[#allocation8 + $0x388] sm:$0xff] %v4733_v52  ;;  %v4735_v55 = vpack.c.bf16 %v1202_v53, %v1200_v49  ;;  %3225 = vmatprep.mubr.bf16.mxu1 %v5077_v0  ;;  %v4946_v48 = vld [vmem:[#allocation2 + $0xd0] sm:$0xff]   ;;  %v2226_v53 = vld [vmem:[#allocation7 + $0x4] sm:$0xf] }
 0x217   :  { %2116 = vst [vmem:[#allocation8 + $0x390] sm:$0xff] %v4734_v54  ;;  %v852_v56 = vpop.f32.mrb[116].mxu0  ;;  %2117 = vst [vmem:[#allocation8 + $0x398] sm:$0xff] %v4735_v55  ;;  %v1205_v58 = vpop.f32.mrb[116].mxu1 }
 0x218   :  { %v853_v57 = vadd.f32 %v852_v56, %v5205_v37  ;;  %v854_v59 = vpop.f32.mrb[117].mxu0  ;;  %v1206_v61 = vadd.f32 %v1205_v58, %v5209_v38  ;;  %v1207_v63 = vpop.f32.mrb[117].mxu1 }
 0x219   :  { %v855_v62 = vadd.f32 %v854_v59, %v5213_v39  ;;  %v856_v1 = vpop.f32.mrb[118].mxu0  ;;  %v1208_v2 = vadd.f32 %v1207_v63, %v5218_v40  ;;  %v1209_v4 = vpop.f32.mrb[118].mxu1 }
 0x21a   :  { %v857_v3 = vadd.f32 %v856_v1, %v5205_v37  ;;  %v858_v5 = vpop.f32.mrb[119].mxu0  ;;  %v1210_v7 = vadd.f32 %v1209_v4, %v5209_v38  ;;  %v1211_v9 = vpop.f32.mrb[119].mxu1  ;;  %v5541_v1 = vrot.slane %v2226_v53, %v158_v32 }
 0x21b   :  { %v4736_v6 = vpack.c.bf16 %v855_v62, %v853_v57  ;;  %v859_v8 = vadd.f32 %v858_v5, %v5213_v39  ;;  %v4737_v10 = vpack.c.bf16 %v1208_v2, %v1206_v61  ;;  %v1212_v11 = vadd.f32 %v1211_v9, %v5218_v40  ;;  %v4947_v5 = vld [vmem:[#allocation2 + $0xd8] sm:$0xff]  }
 0x21c   :  { %2873 = vmatmul.mubr.bf16.gmra.mrb[224].mxu0 %v4944_v60  ;;  %3226 = vmatmul.mubr.bf16.gmra.mrb[224].mxu1 %v4944_v60 }
 0x21d   :  { %2118 = vst [vmem:[#allocation8 + $0x3a0] sm:$0xff] %v4736_v6  ;;  %v4738_v12 = vpack.c.bf16 %v859_v8, %v857_v3  ;;  %2882 = vmatprep.mubr.bf16.mxu0 %v5077_v0  ;;  %2119 = vst [vmem:[#allocation8 + $0x3a8] sm:$0xff] %v4737_v10  ;;  %v4739_v13 = vpack.c.bf16 %v1212_v11, %v1210_v7  ;;  %3235 = vmatprep.mubr.bf16.mxu1 %v5077_v0 }
 0x21f   :  { %2120 = vst [vmem:[#allocation8 + $0x3b0] sm:$0xff] %v4738_v12  ;;  %v862_v14 = vpop.f32.mrb[120].mxu0  ;;  %2121 = vst [vmem:[#allocation8 + $0x3b8] sm:$0xff] %v4739_v13  ;;  %v1215_v16 = vpop.f32.mrb[120].mxu1 }
 0x220   :  { %v863_v15 = vadd.f32 %v862_v14, %v5205_v37  ;;  %v864_v17 = vpop.f32.mrb[121].mxu0  ;;  %v1216_v19 = vadd.f32 %v1215_v16, %v5209_v38  ;;  %v1217_v21 = vpop.f32.mrb[121].mxu1 }
 0x221   :  { %v865_v20 = vadd.f32 %v864_v17, %v5213_v39  ;;  %v866_v22 = vpop.f32.mrb[122].mxu0  ;;  %v1218_v23 = vadd.f32 %v1217_v21, %v5218_v40  ;;  %v1219_v25 = vpop.f32.mrb[122].mxu1 }
 0x222   :  { %v867_v24 = vadd.f32 %v866_v22, %v5205_v37  ;;  %v868_v26 = vpop.f32.mrb[123].mxu0  ;;  %v1220_v28 = vadd.f32 %v1219_v25, %v5209_v38  ;;  %v1221_v31 = vpop.f32.mrb[123].mxu1 }
 0x223   :  { %v4740_v27 = vpack.c.bf16 %v865_v20, %v863_v15  ;;  %v869_v29 = vadd.f32 %v868_v26, %v5213_v39  ;;  %v4741_v33 = vpack.c.bf16 %v1218_v23, %v1216_v19  ;;  %v1222_v41 = vadd.f32 %v1221_v31, %v5218_v40  ;;  %v4948_v23 = vld [vmem:[#allocation2 + $0xe0] sm:$0xff]  }
 0x224   :  { %2883 = vmatmul.mubr.bf16.gmra.mrb[228].mxu0 %v4945_v18  ;;  %3236 = vmatmul.mubr.bf16.gmra.mrb[228].mxu1 %v4945_v18 }
 0x225   :  { %2122 = vst [vmem:[#allocation8 + $0x3c0] sm:$0xff] %v4740_v27  ;;  %v4742_v42 = vpack.c.bf16 %v869_v29, %v867_v24  ;;  %2892 = vmatprep.mubr.bf16.mxu0 %v5077_v0  ;;  %2123 = vst [vmem:[#allocation8 + $0x3c8] sm:$0xff] %v4741_v33  ;;  %v4743_v43 = vpack.c.bf16 %v1222_v41, %v1220_v28  ;;  %3245 = vmatprep.mubr.bf16.mxu1 %v5077_v0 }
 0x227   :  { %2124 = vst [vmem:[#allocation8 + $0x3d0] sm:$0xff] %v4742_v42  ;;  %v872_v44 = vpop.f32.mrb[124].mxu0  ;;  %2125 = vst [vmem:[#allocation8 + $0x3d8] sm:$0xff] %v4743_v43  ;;  %v1225_v46 = vpop.f32.mrb[124].mxu1 }
 0x228   :  { %v873_v45 = vadd.f32 %v872_v44, %v5205_v37  ;;  %v874_v47 = vpop.f32.mrb[125].mxu0  ;;  %v1226_v49 = vadd.f32 %v1225_v46, %v5209_v38  ;;  %v1227_v51 = vpop.f32.mrb[125].mxu1 }
 0x229   :  { %v875_v50 = vadd.f32 %v874_v47, %v5213_v39  ;;  %v876_v52 = vpop.f32.mrb[126].mxu0  ;;  %v1228_v54 = vadd.f32 %v1227_v51, %v5218_v40  ;;  %v1229_v56 = vpop.f32.mrb[126].mxu1 }
 0x22a   :  { %v877_v55 = vadd.f32 %v876_v52, %v5205_v37  ;;  %v878_v57 = vpop.f32.mrb[127].mxu0  ;;  %v1230_v59 = vadd.f32 %v1229_v56, %v5209_v38  ;;  %v1231_v61 = vpop.f32.mrb[127].mxu1  ;;  %v5545_v37 = vrot.slane %v2226_v53, %v166_v34  ;;  %v5549_v38 = vrot.slane %v2226_v53, %v162_v35 }
 0x22b   :  { %v4744_v58 = vpack.c.bf16 %v875_v50, %v873_v45  ;;  %v879_v60 = vadd.f32 %v878_v57, %v5213_v39  ;;  %v4745_v62 = vpack.c.bf16 %v1228_v54, %v1226_v49  ;;  %v1232_v63 = vadd.f32 %v1231_v61, %v5218_v40 }
 0x22c   :  { %2893 = vmatmul.mubr.bf16.gmra.mrb[232].mxu0 %v4946_v48  ;;  %3246 = vmatmul.mubr.bf16.gmra.mrb[232].mxu1 %v4946_v48  ;;  %v5554_v40 = vrot.slane %v2226_v53, %v170_v36  ;;  %v4949_v53 = vld [vmem:[#allocation2 + $0xe8] sm:$0xff]  }
 0x22d   :  { %2126 = vst [vmem:[#allocation8 + $0x3e0] sm:$0xff] %v4744_v58  ;;  %v4746_v2 = vpack.c.bf16 %v879_v60, %v877_v55  ;;  %2902 = vmatprep.mubr.bf16.mxu0 %v5077_v0  ;;  %2127 = vst [vmem:[#allocation8 + $0x3e8] sm:$0xff] %v4745_v62  ;;  %v4747_v39 = vpack.c.bf16 %v1232_v63, %v1230_v59  ;;  %3255 = vmatprep.mubr.bf16.mxu1 %v5077_v0 }
 0x22f   :  { %2128 = vst [vmem:[#allocation8 + $0x3f0] sm:$0xff] %v4746_v2  ;;  %v2634_v32 = vpop.f32.mrb[128].mxu0  ;;  %2129 = vst [vmem:[#allocation8 + $0x3f8] sm:$0xff] %v4747_v39  ;;  %v2987_v3 = vpop.f32.mrb[128].mxu1 }
 0x230   :  { %v2635_v34 = vadd.f32 %v2634_v32, %v5541_v1  ;;  %v2636_v4 = vpop.f32.mrb[129].mxu0  ;;  %v2988_v35 = vadd.f32 %v2987_v3, %v5545_v37  ;;  %v2989_v7 = vpop.f32.mrb[129].mxu1 }
 0x231   :  { %v2637_v6 = vadd.f32 %v2636_v4, %v5549_v38  ;;  %v2638_v8 = vpop.f32.mrb[130].mxu0  ;;  %v2990_v30 = vadd.f32 %v2989_v7, %v5554_v40  ;;  %v2991_v9 = vpop.f32.mrb[130].mxu1 }
 0x232   :  { %v2639_v36 = vadd.f32 %v2638_v8, %v5541_v1  ;;  %v2640_v10 = vpop.f32.mrb[131].mxu0  ;;  %v2992_v12 = vadd.f32 %v2991_v9, %v5545_v37  ;;  %v2993_v14 = vpop.f32.mrb[131].mxu1  ;;  %v4950_v8 = vld [vmem:[#allocation2 + $0xf0] sm:$0xff]  }
 0x233   :  { %v4748_v11 = vpack.c.bf16 %v2637_v6, %v2635_v34  ;;  %v2641_v13 = vadd.f32 %v2640_v10, %v5549_v38  ;;  %v4749_v15 = vpack.c.bf16 %v2990_v30, %v2988_v35  ;;  %v2994_v16 = vadd.f32 %v2993_v14, %v5554_v40 }
 0x234   :  { %2903 = vmatmul.mubr.bf16.gmra.mrb[236].mxu0 %v4947_v5  ;;  %3256 = vmatmul.mubr.bf16.gmra.mrb[236].mxu1 %v4947_v5 }
 0x235   :  { %4074 = vst [vmem:[#allocation9] sm:$0xff] %v4748_v11  ;;  %v4750_v17 = vpack.c.bf16 %v2641_v13, %v2639_v36  ;;  %2912 = vmatprep.mubr.bf16.mxu0 %v5077_v0  ;;  %4075 = vst [vmem:[#allocation9 + $0x8] sm:$0xff] %v4749_v15  ;;  %v4751_v18 = vpack.c.bf16 %v2994_v16, %v2992_v12  ;;  %3265 = vmatprep.mubr.bf16.mxu1 %v5077_v0 }
 0x237   :  { %4076 = vst [vmem:[#allocation9 + $0x10] sm:$0xff] %v4750_v17  ;;  %v2644_v19 = vpop.f32.mrb[132].mxu0  ;;  %4077 = vst [vmem:[#allocation9 + $0x18] sm:$0xff] %v4751_v18  ;;  %v2997_v21 = vpop.f32.mrb[132].mxu1 }
 0x238   :  { %v2645_v20 = vadd.f32 %v2644_v19, %v5541_v1  ;;  %v2646_v22 = vpop.f32.mrb[133].mxu0  ;;  %v2998_v24 = vadd.f32 %v2997_v21, %v5545_v37  ;;  %v2999_v26 = vpop.f32.mrb[133].mxu1 }
 0x239   :  { %v2647_v25 = vadd.f32 %v2646_v22, %v5549_v38  ;;  %v2648_v27 = vpop.f32.mrb[134].mxu0  ;;  %v3000_v28 = vadd.f32 %v2999_v26, %v5554_v40  ;;  %v3001_v31 = vpop.f32.mrb[134].mxu1 }
 0x23a   :  { %v2649_v29 = vadd.f32 %v2648_v27, %v5541_v1  ;;  %v2650_v33 = vpop.f32.mrb[135].mxu0  ;;  %v3002_v42 = vadd.f32 %v3001_v31, %v5545_v37  ;;  %v3003_v44 = vpop.f32.mrb[135].mxu1  ;;  %v4951_v27 = vld [vmem:[#allocation2 + $0xf8] sm:$0xff]  }
 0x23b   :  { %v4752_v41 = vpack.c.bf16 %v2647_v25, %v2645_v20  ;;  %v2651_v43 = vadd.f32 %v2650_v33, %v5549_v38  ;;  %v4753_v45 = vpack.c.bf16 %v3000_v28, %v2998_v24  ;;  %v3004_v46 = vadd.f32 %v3003_v44, %v5554_v40 }
 0x23c   :  { %2913 = vmatmul.mubr.bf16.gmra.mrb[240].mxu0 %v4948_v23  ;;  %3266 = vmatmul.mubr.bf16.gmra.mrb[240].mxu1 %v4948_v23 }
 0x23d   :  { %4078 = vst [vmem:[#allocation9 + $0x20] sm:$0xff] %v4752_v41  ;;  %v4754_v47 = vpack.c.bf16 %v2651_v43, %v2649_v29  ;;  %2922 = vmatprep.mubr.bf16.mxu0 %v5077_v0  ;;  %4079 = vst [vmem:[#allocation9 + $0x28] sm:$0xff] %v4753_v45  ;;  %v4755_v48 = vpack.c.bf16 %v3004_v46, %v3002_v42  ;;  %3275 = vmatprep.mubr.bf16.mxu1 %v5077_v0 }
 0x23f   :  { %4080 = vst [vmem:[#allocation9 + $0x30] sm:$0xff] %v4754_v47  ;;  %v2654_v49 = vpop.f32.mrb[136].mxu0  ;;  %4081 = vst [vmem:[#allocation9 + $0x38] sm:$0xff] %v4755_v48  ;;  %v3007_v51 = vpop.f32.mrb[136].mxu1 }
 0x240   :  { %v2655_v50 = vadd.f32 %v2654_v49, %v5541_v1  ;;  %v2656_v52 = vpop.f32.mrb[137].mxu0  ;;  %v3008_v54 = vadd.f32 %v3007_v51, %v5545_v37  ;;  %v3009_v56 = vpop.f32.mrb[137].mxu1 }
 0x241   :  { %v2657_v55 = vadd.f32 %v2656_v52, %v5549_v38  ;;  %v2658_v57 = vpop.f32.mrb[138].mxu0  ;;  %v3010_v58 = vadd.f32 %v3009_v56, %v5554_v40  ;;  %v3011_v60 = vpop.f32.mrb[138].mxu1 }
 0x242   :  { %v2659_v59 = vadd.f32 %v2658_v57, %v5541_v1  ;;  %v2660_v61 = vpop.f32.mrb[139].mxu0  ;;  %v3012_v63 = vadd.f32 %v3011_v60, %v5545_v37  ;;  %v3013_v39 = vpop.f32.mrb[139].mxu1 }
 0x243   :  { %v4756_v62 = vpack.c.bf16 %v2657_v55, %v2655_v50  ;;  %v2661_v2 = vadd.f32 %v2660_v61, %v5549_v38  ;;  %v4757_v32 = vpack.c.bf16 %v3010_v58, %v3008_v54  ;;  %v3014_v34 = vadd.f32 %v3013_v39, %v5554_v40 }
 0x244   :  { %2923 = vmatmul.mubr.bf16.gmra.mrb[244].mxu0 %v4949_v53  ;;  %3276 = vmatmul.mubr.bf16.gmra.mrb[244].mxu1 %v4949_v53 }
 0x245   :  { %4082 = vst [vmem:[#allocation9 + $0x40] sm:$0xff] %v4756_v62  ;;  %v4758_v3 = vpack.c.bf16 %v2661_v2, %v2659_v59  ;;  %2932 = vmatprep.mubr.bf16.mxu0 %v5077_v0  ;;  %4083 = vst [vmem:[#allocation9 + $0x48] sm:$0xff] %v4757_v32  ;;  %v4759_v4 = vpack.c.bf16 %v3014_v34, %v3012_v63  ;;  %3285 = vmatprep.mubr.bf16.mxu1 %v5077_v0 }
 0x247   :  { %4084 = vst [vmem:[#allocation9 + $0x50] sm:$0xff] %v4758_v3  ;;  %v2664_v5 = vpop.f32.mrb[140].mxu0  ;;  %4085 = vst [vmem:[#allocation9 + $0x58] sm:$0xff] %v4759_v4  ;;  %v3017_v6 = vpop.f32.mrb[140].mxu1 }
 0x248   :  { %v2665_v35 = vadd.f32 %v2664_v5, %v5541_v1  ;;  %v2666_v7 = vpop.f32.mrb[141].mxu0  ;;  %v3018_v30 = vadd.f32 %v3017_v6, %v5545_v37  ;;  %v3019_v9 = vpop.f32.mrb[141].mxu1 }
 0x249   :  { %v2667_v36 = vadd.f32 %v2666_v7, %v5549_v38  ;;  %v2668_v10 = vpop.f32.mrb[142].mxu0  ;;  %v3020_v11 = vadd.f32 %v3019_v9, %v5554_v40  ;;  %v3021_v13 = vpop.f32.mrb[142].mxu1 }
 0x24a   :  { %v2669_v12 = vadd.f32 %v2668_v10, %v5541_v1  ;;  %v2670_v14 = vpop.f32.mrb[143].mxu0  ;;  %v3022_v16 = vadd.f32 %v3021_v13, %v5545_v37  ;;  %v3023_v18 = vpop.f32.mrb[143].mxu1 }
 0x24b   :  { %v4760_v15 = vpack.c.bf16 %v2667_v36, %v2665_v35  ;;  %v2671_v17 = vadd.f32 %v2670_v14, %v5549_v38  ;;  %v4761_v19 = vpack.c.bf16 %v3020_v11, %v3018_v30  ;;  %v3024_v20 = vadd.f32 %v3023_v18, %v5554_v40 }
 0x24c   :  { %2933 = vmatmul.mubr.bf16.gmra.mrb[248].mxu0 %v4950_v8  ;;  %3286 = vmatmul.mubr.bf16.gmra.mrb[248].mxu1 %v4950_v8 }
 0x24d   :  { %4086 = vst [vmem:[#allocation9 + $0x60] sm:$0xff] %v4760_v15  ;;  %v4762_v21 = vpack.c.bf16 %v2671_v17, %v2669_v12  ;;  %2942 = vmatprep.mubr.bf16.mxu0 %v5077_v0  ;;  %4087 = vst [vmem:[#allocation9 + $0x68] sm:$0xff] %v4761_v19  ;;  %v4763_v22 = vpack.c.bf16 %v3024_v20, %v3022_v16  ;;  %3295 = vmatprep.mubr.bf16.mxu1 %v5077_v0 }
 0x24f   :  { %4088 = vst [vmem:[#allocation9 + $0x70] sm:$0xff] %v4762_v21  ;;  %v2674_v23 = vpop.f32.mrb[144].mxu0  ;;  %4089 = vst [vmem:[#allocation9 + $0x78] sm:$0xff] %v4763_v22  ;;  %v3027_v25 = vpop.f32.mrb[144].mxu1 }
 0x250   :  { %v2675_v24 = vadd.f32 %v2674_v23, %v5541_v1  ;;  %v2676_v26 = vpop.f32.mrb[145].mxu0  ;;  %v3028_v28 = vadd.f32 %v3027_v25, %v5545_v37  ;;  %v3029_v31 = vpop.f32.mrb[145].mxu1 }
 0x251   :  { %v2677_v29 = vadd.f32 %v2676_v26, %v5549_v38  ;;  %v2678_v33 = vpop.f32.mrb[146].mxu0  ;;  %v3030_v41 = vadd.f32 %v3029_v31, %v5554_v40  ;;  %v3031_v43 = vpop.f32.mrb[146].mxu1 }
 0x252   :  { %v2679_v42 = vadd.f32 %v2678_v33, %v5541_v1  ;;  %v2680_v0 = vpop.f32.mrb[147].mxu0  ;;  %v3032_v45 = vadd.f32 %v3031_v43, %v5545_v37  ;;  %v3033_v47 = vpop.f32.mrb[147].mxu1 }
 0x253   :  { %v4764_v44 = vpack.c.bf16 %v2677_v29, %v2675_v24  ;;  %v2681_v46 = vadd.f32 %v2680_v0, %v5549_v38  ;;  %v4765_v48 = vpack.c.bf16 %v3030_v41, %v3028_v28  ;;  %v3034_v49 = vadd.f32 %v3033_v47, %v5554_v40 }
 0x254   :  { %2943 = vmatmul.mubr.bf16.gmra.mrb[252].mxu0 %v4951_v27  ;;  %3296 = vmatmul.mubr.bf16.gmra.mrb[252].mxu1 %v4951_v27 }
 0x255   :  { %4090 = vst [vmem:[#allocation9 + $0x80] sm:$0xff] %v4764_v44  ;;  %v4766_v50 = vpack.c.bf16 %v2681_v46, %v2679_v42  ;;  %4091 = vst [vmem:[#allocation9 + $0x88] sm:$0xff] %v4765_v48  ;;  %v4767_v51 = vpack.c.bf16 %v3034_v49, %v3032_v45 }
 0x257   :  { %4092 = vst [vmem:[#allocation9 + $0x90] sm:$0xff] %v4766_v50  ;;  %v2684_v52 = vpop.f32.mrb[148].mxu0  ;;  %4093 = vst [vmem:[#allocation9 + $0x98] sm:$0xff] %v4767_v51  ;;  %v3037_v54 = vpop.f32.mrb[148].mxu1 }
 0x258   :  { %v2685_v53 = vadd.f32 %v2684_v52, %v5541_v1  ;;  %v2686_v55 = vpop.f32.mrb[149].mxu0  ;;  %v3038_v56 = vadd.f32 %v3037_v54, %v5545_v37  ;;  %v3039_v58 = vpop.f32.mrb[149].mxu1 }
 0x259   :  { %v2687_v57 = vadd.f32 %v2686_v55, %v5549_v38  ;;  %v2688_v59 = vpop.f32.mrb[150].mxu0  ;;  %v3040_v60 = vadd.f32 %v3039_v58, %v5554_v40  ;;  %v3041_v62 = vpop.f32.mrb[150].mxu1 }
 0x25a   :  { %v2689_v61 = vadd.f32 %v2688_v59, %v5541_v1  ;;  %v2690_v63 = vpop.f32.mrb[151].mxu0  ;;  %v3042_v39 = vadd.f32 %v3041_v62, %v5545_v37  ;;  %v3043_v34 = vpop.f32.mrb[151].mxu1 }
 0x25b   :  { %v4768_v2 = vpack.c.bf16 %v2687_v57, %v2685_v53  ;;  %v2691_v32 = vadd.f32 %v2690_v63, %v5549_v38  ;;  %v4769_v3 = vpack.c.bf16 %v3040_v60, %v3038_v56  ;;  %v3044_v4 = vadd.f32 %v3043_v34, %v5554_v40 }
 0x25d   :  { %4094 = vst [vmem:[#allocation9 + $0xa0] sm:$0xff] %v4768_v2  ;;  %v4770_v5 = vpack.c.bf16 %v2691_v32, %v2689_v61  ;;  %4095 = vst [vmem:[#allocation9 + $0xa8] sm:$0xff] %v4769_v3  ;;  %v4771_v35 = vpack.c.bf16 %v3044_v4, %v3042_v39 }
 0x25f   :  { %4096 = vst [vmem:[#allocation9 + $0xb0] sm:$0xff] %v4770_v5  ;;  %v2694_v6 = vpop.f32.mrb[152].mxu0  ;;  %4097 = vst [vmem:[#allocation9 + $0xb8] sm:$0xff] %v4771_v35  ;;  %v3047_v8 = vpop.f32.mrb[152].mxu1 }
 0x260   :  { %v2695_v7 = vadd.f32 %v2694_v6, %v5541_v1  ;;  %v2696_v30 = vpop.f32.mrb[153].mxu0  ;;  %v3048_v36 = vadd.f32 %v3047_v8, %v5545_v37  ;;  %v3049_v10 = vpop.f32.mrb[153].mxu1 }
 0x261   :  { %v2697_v9 = vadd.f32 %v2696_v30, %v5549_v38  ;;  %v2698_v11 = vpop.f32.mrb[154].mxu0  ;;  %v3050_v12 = vadd.f32 %v3049_v10, %v5554_v40  ;;  %v3051_v14 = vpop.f32.mrb[154].mxu1 }
 0x262   :  { %v2699_v13 = vadd.f32 %v2698_v11, %v5541_v1  ;;  %v2700_v15 = vpop.f32.mrb[155].mxu0  ;;  %v3052_v17 = vadd.f32 %v3051_v14, %v5545_v37  ;;  %v3053_v19 = vpop.f32.mrb[155].mxu1 }
 0x263   :  { %v4772_v16 = vpack.c.bf16 %v2697_v9, %v2695_v7  ;;  %v2701_v18 = vadd.f32 %v2700_v15, %v5549_v38  ;;  %v4773_v20 = vpack.c.bf16 %v3050_v12, %v3048_v36  ;;  %v3054_v21 = vadd.f32 %v3053_v19, %v5554_v40 }
 0x265   :  { %4098 = vst [vmem:[#allocation9 + $0xc0] sm:$0xff] %v4772_v16  ;;  %v4774_v22 = vpack.c.bf16 %v2701_v18, %v2699_v13  ;;  %4099 = vst [vmem:[#allocation9 + $0xc8] sm:$0xff] %v4773_v20  ;;  %v4775_v23 = vpack.c.bf16 %v3054_v21, %v3052_v17 }
 0x267   :  { %4100 = vst [vmem:[#allocation9 + $0xd0] sm:$0xff] %v4774_v22  ;;  %v2704_v24 = vpop.f32.mrb[156].mxu0  ;;  %4101 = vst [vmem:[#allocation9 + $0xd8] sm:$0xff] %v4775_v23  ;;  %v3057_v26 = vpop.f32.mrb[156].mxu1 }
 0x268   :  { %v2705_v25 = vadd.f32 %v2704_v24, %v5541_v1  ;;  %v2706_v27 = vpop.f32.mrb[157].mxu0  ;;  %v3058_v28 = vadd.f32 %v3057_v26, %v5545_v37  ;;  %v3059_v31 = vpop.f32.mrb[157].mxu1 }
 0x269   :  { %v2707_v29 = vadd.f32 %v2706_v27, %v5549_v38  ;;  %v2708_v33 = vpop.f32.mrb[158].mxu0  ;;  %v3060_v41 = vadd.f32 %v3059_v31, %v5554_v40  ;;  %v3061_v43 = vpop.f32.mrb[158].mxu1 }
 0x26a   :  { %v2709_v42 = vadd.f32 %v2708_v33, %v5541_v1  ;;  %v2710_v0 = vpop.f32.mrb[159].mxu0  ;;  %v3062_v45 = vadd.f32 %v3061_v43, %v5545_v37  ;;  %v3063_v47 = vpop.f32.mrb[159].mxu1 }
 0x26b   :  { %v4776_v44 = vpack.c.bf16 %v2707_v29, %v2705_v25  ;;  %v2711_v46 = vadd.f32 %v2710_v0, %v5549_v38  ;;  %v4777_v48 = vpack.c.bf16 %v3060_v41, %v3058_v28  ;;  %v3064_v49 = vadd.f32 %v3063_v47, %v5554_v40 }
 0x26d   :  { %4102 = vst [vmem:[#allocation9 + $0xe0] sm:$0xff] %v4776_v44  ;;  %v4778_v50 = vpack.c.bf16 %v2711_v46, %v2709_v42  ;;  %4103 = vst [vmem:[#allocation9 + $0xe8] sm:$0xff] %v4777_v48  ;;  %v4779_v51 = vpack.c.bf16 %v3064_v49, %v3062_v45 }
 0x26f   :  { %4104 = vst [vmem:[#allocation9 + $0xf0] sm:$0xff] %v4778_v50  ;;  %v2714_v52 = vpop.f32.mrb[160].mxu0  ;;  %4105 = vst [vmem:[#allocation9 + $0xf8] sm:$0xff] %v4779_v51  ;;  %v3067_v54 = vpop.f32.mrb[160].mxu1 }
 0x270   :  { %v2715_v53 = vadd.f32 %v2714_v52, %v5541_v1  ;;  %v2716_v55 = vpop.f32.mrb[161].mxu0  ;;  %v3068_v56 = vadd.f32 %v3067_v54, %v5545_v37  ;;  %v3069_v58 = vpop.f32.mrb[161].mxu1 }
 0x271   :  { %v2717_v57 = vadd.f32 %v2716_v55, %v5549_v38  ;;  %v2718_v59 = vpop.f32.mrb[162].mxu0  ;;  %v3070_v60 = vadd.f32 %v3069_v58, %v5554_v40  ;;  %v3071_v62 = vpop.f32.mrb[162].mxu1 }
 0x272   :  { %v2719_v61 = vadd.f32 %v2718_v59, %v5541_v1  ;;  %v2720_v63 = vpop.f32.mrb[163].mxu0  ;;  %v3072_v39 = vadd.f32 %v3071_v62, %v5545_v37  ;;  %v3073_v34 = vpop.f32.mrb[163].mxu1 }
 0x273   :  { %v4780_v2 = vpack.c.bf16 %v2717_v57, %v2715_v53  ;;  %v2721_v32 = vadd.f32 %v2720_v63, %v5549_v38  ;;  %v4781_v3 = vpack.c.bf16 %v3070_v60, %v3068_v56  ;;  %v3074_v4 = vadd.f32 %v3073_v34, %v5554_v40 }
 0x275   :  { %4106 = vst [vmem:[#allocation9 + $0x100] sm:$0xff] %v4780_v2  ;;  %v4782_v5 = vpack.c.bf16 %v2721_v32, %v2719_v61  ;;  %4107 = vst [vmem:[#allocation9 + $0x108] sm:$0xff] %v4781_v3  ;;  %v4783_v35 = vpack.c.bf16 %v3074_v4, %v3072_v39 }
 0x277   :  { %4108 = vst [vmem:[#allocation9 + $0x110] sm:$0xff] %v4782_v5  ;;  %v2724_v6 = vpop.f32.mrb[164].mxu0  ;;  %4109 = vst [vmem:[#allocation9 + $0x118] sm:$0xff] %v4783_v35  ;;  %v3077_v8 = vpop.f32.mrb[164].mxu1 }
 0x278   :  { %v2725_v7 = vadd.f32 %v2724_v6, %v5541_v1  ;;  %v2726_v30 = vpop.f32.mrb[165].mxu0  ;;  %v3078_v36 = vadd.f32 %v3077_v8, %v5545_v37  ;;  %v3079_v10 = vpop.f32.mrb[165].mxu1 }
 0x279   :  { %v2727_v9 = vadd.f32 %v2726_v30, %v5549_v38  ;;  %v2728_v11 = vpop.f32.mrb[166].mxu0  ;;  %v3080_v12 = vadd.f32 %v3079_v10, %v5554_v40  ;;  %v3081_v14 = vpop.f32.mrb[166].mxu1 }
 0x27a   :  { %v2729_v13 = vadd.f32 %v2728_v11, %v5541_v1  ;;  %v2730_v15 = vpop.f32.mrb[167].mxu0  ;;  %v3082_v17 = vadd.f32 %v3081_v14, %v5545_v37  ;;  %v3083_v19 = vpop.f32.mrb[167].mxu1 }
 0x27b   :  { %v4784_v16 = vpack.c.bf16 %v2727_v9, %v2725_v7  ;;  %v2731_v18 = vadd.f32 %v2730_v15, %v5549_v38  ;;  %v4785_v20 = vpack.c.bf16 %v3080_v12, %v3078_v36  ;;  %v3084_v21 = vadd.f32 %v3083_v19, %v5554_v40 }
 0x27d   :  { %4110 = vst [vmem:[#allocation9 + $0x120] sm:$0xff] %v4784_v16  ;;  %v4786_v22 = vpack.c.bf16 %v2731_v18, %v2729_v13  ;;  %4111 = vst [vmem:[#allocation9 + $0x128] sm:$0xff] %v4785_v20  ;;  %v4787_v23 = vpack.c.bf16 %v3084_v21, %v3082_v17 }
 0x27f   :  { %4112 = vst [vmem:[#allocation9 + $0x130] sm:$0xff] %v4786_v22  ;;  %v2734_v24 = vpop.f32.mrb[168].mxu0  ;;  %4113 = vst [vmem:[#allocation9 + $0x138] sm:$0xff] %v4787_v23  ;;  %v3087_v26 = vpop.f32.mrb[168].mxu1 }
 0x280   :  { %v2735_v25 = vadd.f32 %v2734_v24, %v5541_v1  ;;  %v2736_v27 = vpop.f32.mrb[169].mxu0  ;;  %v3088_v28 = vadd.f32 %v3087_v26, %v5545_v37  ;;  %v3089_v31 = vpop.f32.mrb[169].mxu1 }
 0x281   :  { %v2737_v29 = vadd.f32 %v2736_v27, %v5549_v38  ;;  %v2738_v33 = vpop.f32.mrb[170].mxu0  ;;  %v3090_v41 = vadd.f32 %v3089_v31, %v5554_v40  ;;  %v3091_v43 = vpop.f32.mrb[170].mxu1 }
 0x282   :  { %v2739_v42 = vadd.f32 %v2738_v33, %v5541_v1  ;;  %v2740_v0 = vpop.f32.mrb[171].mxu0  ;;  %v3092_v45 = vadd.f32 %v3091_v43, %v5545_v37  ;;  %v3093_v47 = vpop.f32.mrb[171].mxu1 }
 0x283   :  { %v4788_v44 = vpack.c.bf16 %v2737_v29, %v2735_v25  ;;  %v2741_v46 = vadd.f32 %v2740_v0, %v5549_v38  ;;  %v4789_v48 = vpack.c.bf16 %v3090_v41, %v3088_v28  ;;  %v3094_v49 = vadd.f32 %v3093_v47, %v5554_v40 }
 0x285   :  { %4114 = vst [vmem:[#allocation9 + $0x140] sm:$0xff] %v4788_v44  ;;  %v4790_v50 = vpack.c.bf16 %v2741_v46, %v2739_v42  ;;  %4115 = vst [vmem:[#allocation9 + $0x148] sm:$0xff] %v4789_v48  ;;  %v4791_v51 = vpack.c.bf16 %v3094_v49, %v3092_v45 }
 0x287   :  { %4116 = vst [vmem:[#allocation9 + $0x150] sm:$0xff] %v4790_v50  ;;  %v2744_v52 = vpop.f32.mrb[172].mxu0  ;;  %4117 = vst [vmem:[#allocation9 + $0x158] sm:$0xff] %v4791_v51  ;;  %v3097_v54 = vpop.f32.mrb[172].mxu1 }
 0x288   :  { %v2745_v53 = vadd.f32 %v2744_v52, %v5541_v1  ;;  %v2746_v55 = vpop.f32.mrb[173].mxu0  ;;  %v3098_v56 = vadd.f32 %v3097_v54, %v5545_v37  ;;  %v3099_v58 = vpop.f32.mrb[173].mxu1 }
 0x289   :  { %v2747_v57 = vadd.f32 %v2746_v55, %v5549_v38  ;;  %v2748_v59 = vpop.f32.mrb[174].mxu0  ;;  %v3100_v60 = vadd.f32 %v3099_v58, %v5554_v40  ;;  %v3101_v62 = vpop.f32.mrb[174].mxu1 }
 0x28a   :  { %v2749_v61 = vadd.f32 %v2748_v59, %v5541_v1  ;;  %v2750_v63 = vpop.f32.mrb[175].mxu0  ;;  %v3102_v39 = vadd.f32 %v3101_v62, %v5545_v37  ;;  %v3103_v34 = vpop.f32.mrb[175].mxu1 }
 0x28b   :  { %v4792_v2 = vpack.c.bf16 %v2747_v57, %v2745_v53  ;;  %v2751_v32 = vadd.f32 %v2750_v63, %v5549_v38  ;;  %v4793_v3 = vpack.c.bf16 %v3100_v60, %v3098_v56  ;;  %v3104_v4 = vadd.f32 %v3103_v34, %v5554_v40 }
 0x28d   :  { %4118 = vst [vmem:[#allocation9 + $0x160] sm:$0xff] %v4792_v2  ;;  %v4794_v5 = vpack.c.bf16 %v2751_v32, %v2749_v61  ;;  %4119 = vst [vmem:[#allocation9 + $0x168] sm:$0xff] %v4793_v3  ;;  %v4795_v35 = vpack.c.bf16 %v3104_v4, %v3102_v39 }
 0x28f   :  { %4120 = vst [vmem:[#allocation9 + $0x170] sm:$0xff] %v4794_v5  ;;  %v2754_v6 = vpop.f32.mrb[176].mxu0  ;;  %4121 = vst [vmem:[#allocation9 + $0x178] sm:$0xff] %v4795_v35  ;;  %v3107_v8 = vpop.f32.mrb[176].mxu1 }
 0x290   :  { %v2755_v7 = vadd.f32 %v2754_v6, %v5541_v1  ;;  %v2756_v30 = vpop.f32.mrb[177].mxu0  ;;  %v3108_v36 = vadd.f32 %v3107_v8, %v5545_v37  ;;  %v3109_v10 = vpop.f32.mrb[177].mxu1 }
 0x291   :  { %v2757_v9 = vadd.f32 %v2756_v30, %v5549_v38  ;;  %v2758_v11 = vpop.f32.mrb[178].mxu0  ;;  %v3110_v12 = vadd.f32 %v3109_v10, %v5554_v40  ;;  %v3111_v14 = vpop.f32.mrb[178].mxu1 }
 0x292   :  { %v2759_v13 = vadd.f32 %v2758_v11, %v5541_v1  ;;  %v2760_v15 = vpop.f32.mrb[179].mxu0  ;;  %v3112_v17 = vadd.f32 %v3111_v14, %v5545_v37  ;;  %v3113_v19 = vpop.f32.mrb[179].mxu1 }
 0x293   :  { %v4796_v16 = vpack.c.bf16 %v2757_v9, %v2755_v7  ;;  %v2761_v18 = vadd.f32 %v2760_v15, %v5549_v38  ;;  %v4797_v20 = vpack.c.bf16 %v3110_v12, %v3108_v36  ;;  %v3114_v21 = vadd.f32 %v3113_v19, %v5554_v40 }
 0x295   :  { %4122 = vst [vmem:[#allocation9 + $0x180] sm:$0xff] %v4796_v16  ;;  %v4798_v22 = vpack.c.bf16 %v2761_v18, %v2759_v13  ;;  %4123 = vst [vmem:[#allocation9 + $0x188] sm:$0xff] %v4797_v20  ;;  %v4799_v23 = vpack.c.bf16 %v3114_v21, %v3112_v17 }
 0x297   :  { %4124 = vst [vmem:[#allocation9 + $0x190] sm:$0xff] %v4798_v22  ;;  %v2764_v24 = vpop.f32.mrb[180].mxu0  ;;  %4125 = vst [vmem:[#allocation9 + $0x198] sm:$0xff] %v4799_v23  ;;  %v3117_v26 = vpop.f32.mrb[180].mxu1 }
 0x298   :  { %v2765_v25 = vadd.f32 %v2764_v24, %v5541_v1  ;;  %v2766_v27 = vpop.f32.mrb[181].mxu0  ;;  %v3118_v28 = vadd.f32 %v3117_v26, %v5545_v37  ;;  %v3119_v31 = vpop.f32.mrb[181].mxu1 }
 0x299   :  { %v2767_v29 = vadd.f32 %v2766_v27, %v5549_v38  ;;  %v2768_v33 = vpop.f32.mrb[182].mxu0  ;;  %v3120_v41 = vadd.f32 %v3119_v31, %v5554_v40  ;;  %v3121_v43 = vpop.f32.mrb[182].mxu1 }
 0x29a   :  { %v2769_v42 = vadd.f32 %v2768_v33, %v5541_v1  ;;  %v2770_v0 = vpop.f32.mrb[183].mxu0  ;;  %v3122_v45 = vadd.f32 %v3121_v43, %v5545_v37  ;;  %v3123_v47 = vpop.f32.mrb[183].mxu1 }
 0x29b   :  { %v4800_v44 = vpack.c.bf16 %v2767_v29, %v2765_v25  ;;  %v2771_v46 = vadd.f32 %v2770_v0, %v5549_v38  ;;  %v4801_v48 = vpack.c.bf16 %v3120_v41, %v3118_v28  ;;  %v3124_v49 = vadd.f32 %v3123_v47, %v5554_v40 }
 0x29d   :  { %4126 = vst [vmem:[#allocation9 + $0x1a0] sm:$0xff] %v4800_v44  ;;  %v4802_v50 = vpack.c.bf16 %v2771_v46, %v2769_v42  ;;  %4127 = vst [vmem:[#allocation9 + $0x1a8] sm:$0xff] %v4801_v48  ;;  %v4803_v51 = vpack.c.bf16 %v3124_v49, %v3122_v45 }
 0x29f   :  { %4128 = vst [vmem:[#allocation9 + $0x1b0] sm:$0xff] %v4802_v50  ;;  %v2774_v52 = vpop.f32.mrb[184].mxu0  ;;  %4129 = vst [vmem:[#allocation9 + $0x1b8] sm:$0xff] %v4803_v51  ;;  %v3127_v54 = vpop.f32.mrb[184].mxu1 }
 0x2a0   :  { %v2775_v53 = vadd.f32 %v2774_v52, %v5541_v1  ;;  %v2776_v55 = vpop.f32.mrb[185].mxu0  ;;  %v3128_v56 = vadd.f32 %v3127_v54, %v5545_v37  ;;  %v3129_v58 = vpop.f32.mrb[185].mxu1 }
 0x2a1   :  { %v2777_v57 = vadd.f32 %v2776_v55, %v5549_v38  ;;  %v2778_v59 = vpop.f32.mrb[186].mxu0  ;;  %v3130_v60 = vadd.f32 %v3129_v58, %v5554_v40  ;;  %v3131_v62 = vpop.f32.mrb[186].mxu1 }
 0x2a2   :  { %v2779_v61 = vadd.f32 %v2778_v59, %v5541_v1  ;;  %v2780_v63 = vpop.f32.mrb[187].mxu0  ;;  %v3132_v39 = vadd.f32 %v3131_v62, %v5545_v37  ;;  %v3133_v34 = vpop.f32.mrb[187].mxu1 }
 0x2a3   :  { %v4804_v2 = vpack.c.bf16 %v2777_v57, %v2775_v53  ;;  %v2781_v32 = vadd.f32 %v2780_v63, %v5549_v38  ;;  %v4805_v3 = vpack.c.bf16 %v3130_v60, %v3128_v56  ;;  %v3134_v4 = vadd.f32 %v3133_v34, %v5554_v40 }
 0x2a5   :  { %4130 = vst [vmem:[#allocation9 + $0x1c0] sm:$0xff] %v4804_v2  ;;  %v4806_v5 = vpack.c.bf16 %v2781_v32, %v2779_v61  ;;  %4131 = vst [vmem:[#allocation9 + $0x1c8] sm:$0xff] %v4805_v3  ;;  %v4807_v35 = vpack.c.bf16 %v3134_v4, %v3132_v39 }
 0x2a7   :  { %4132 = vst [vmem:[#allocation9 + $0x1d0] sm:$0xff] %v4806_v5  ;;  %v2784_v6 = vpop.f32.mrb[188].mxu0  ;;  %4133 = vst [vmem:[#allocation9 + $0x1d8] sm:$0xff] %v4807_v35  ;;  %v3137_v8 = vpop.f32.mrb[188].mxu1 }
 0x2a8   :  { %v2785_v7 = vadd.f32 %v2784_v6, %v5541_v1  ;;  %v2786_v30 = vpop.f32.mrb[189].mxu0  ;;  %v3138_v36 = vadd.f32 %v3137_v8, %v5545_v37  ;;  %v3139_v10 = vpop.f32.mrb[189].mxu1 }
 0x2a9   :  { %v2787_v9 = vadd.f32 %v2786_v30, %v5549_v38  ;;  %v2788_v11 = vpop.f32.mrb[190].mxu0  ;;  %v3140_v12 = vadd.f32 %v3139_v10, %v5554_v40  ;;  %v3141_v14 = vpop.f32.mrb[190].mxu1 }
 0x2aa   :  { %v2789_v13 = vadd.f32 %v2788_v11, %v5541_v1  ;;  %v2790_v15 = vpop.f32.mrb[191].mxu0  ;;  %v3142_v17 = vadd.f32 %v3141_v14, %v5545_v37  ;;  %v3143_v19 = vpop.f32.mrb[191].mxu1 }
 0x2ab   :  { %v4808_v16 = vpack.c.bf16 %v2787_v9, %v2785_v7  ;;  %v2791_v18 = vadd.f32 %v2790_v15, %v5549_v38  ;;  %v4809_v20 = vpack.c.bf16 %v3140_v12, %v3138_v36  ;;  %v3144_v21 = vadd.f32 %v3143_v19, %v5554_v40 }
 0x2ad   :  { %4134 = vst [vmem:[#allocation9 + $0x1e0] sm:$0xff] %v4808_v16  ;;  %v4810_v22 = vpack.c.bf16 %v2791_v18, %v2789_v13  ;;  %4135 = vst [vmem:[#allocation9 + $0x1e8] sm:$0xff] %v4809_v20  ;;  %v4811_v23 = vpack.c.bf16 %v3144_v21, %v3142_v17 }
 0x2af   :  { %4136 = vst [vmem:[#allocation9 + $0x1f0] sm:$0xff] %v4810_v22  ;;  %v2794_v24 = vpop.f32.mrb[192].mxu0  ;;  %4137 = vst [vmem:[#allocation9 + $0x1f8] sm:$0xff] %v4811_v23  ;;  %v3147_v26 = vpop.f32.mrb[192].mxu1 }
 0x2b0   :  { %v2795_v25 = vadd.f32 %v2794_v24, %v5541_v1  ;;  %v2796_v27 = vpop.f32.mrb[193].mxu0  ;;  %v3148_v28 = vadd.f32 %v3147_v26, %v5545_v37  ;;  %v3149_v31 = vpop.f32.mrb[193].mxu1 }
 0x2b1   :  { %v2797_v29 = vadd.f32 %v2796_v27, %v5549_v38  ;;  %v2798_v33 = vpop.f32.mrb[194].mxu0  ;;  %v3150_v41 = vadd.f32 %v3149_v31, %v5554_v40  ;;  %v3151_v43 = vpop.f32.mrb[194].mxu1 }
 0x2b2   :  { %v2799_v42 = vadd.f32 %v2798_v33, %v5541_v1  ;;  %v2800_v0 = vpop.f32.mrb[195].mxu0 }
 0x2b3   :  { %5029 = shalt.err (!%p5026_p0)
}
 0x2b4   :  { %s5030_s5 = scalar_lea.hbm %s5854_s3, 16384 }
 0x2b5   :  { %p5031_p1 = scmp.ne.s32.totalorder %s5854_s3, %s5030_s5  ;;  %p5034_p2 = scmp.lt.u32.totalorder %s5030_s5, %s5854_s3 }
 0x2b7   :  { %p5036_p3 = pnand %p5034_p2, %p5031_p1 }
 0x2b9   :  { %5039 = shalt.err (!%p5036_p3)
}
 0x2ba   :  { %s5079_s10 = smov 256   ;;  %s5080_s11 = smov 16   ;;  %v4812_v44 = vpack.c.bf16 %v2797_v29, %v2795_v25  ;;  %v3152_v45 = vadd.f32 %v3151_v43, %v5545_v37  ;;  %v2801_v46 = vadd.f32 %v2800_v0, %v5549_v38  ;;  %v3153_v47 = vpop.f32.mrb[195].mxu1  ;;  %v4813_v48 = vpack.c.bf16 %v3150_v41, %v3148_v28  ;;  %v2804_v52 = vpop.f32.mrb[196].mxu0 }
 0x2bb   :  { %4213 = dma.vmem_to_hbm [thread:$0]  %s4208_s27, 16384, %s5854_s3, [#allocation4], %s5079_s10, %s5079_s10, %s5080_s11   ;;  %v3154_v49 = vadd.f32 %v3153_v47, %v5554_v40  ;;  %v2805_v53 = vadd.f32 %v2804_v52, %v5541_v1  ;;  %v3157_v54 = vpop.f32.mrb[196].mxu1  ;;  %v2806_v55 = vpop.f32.mrb[197].mxu0 }
 0x2bc   :  { %4138 = vst [vmem:[#allocation9 + $0x200] sm:$0xff] %v4812_v44  ;;  %v4814_v50 = vpack.c.bf16 %v2801_v46, %v2799_v42  ;;  %4139 = vst [vmem:[#allocation9 + $0x208] sm:$0xff] %v4813_v48  ;;  %v3158_v56 = vadd.f32 %v3157_v54, %v5545_v37  ;;  %v2807_v57 = vadd.f32 %v2806_v55, %v5549_v38  ;;  %v3159_v58 = vpop.f32.mrb[197].mxu1  ;;  %v2808_v59 = vpop.f32.mrb[198].mxu0  ;;  %s5081_s3 = smov [#allocation9]  }
 0x2bd   :  { %v4815_v51 = vpack.c.bf16 %v3154_v49, %v3152_v45  ;;  %v3160_v60 = vadd.f32 %v3159_v58, %v5554_v40  ;;  %v2809_v61 = vadd.f32 %v2808_v59, %v5541_v1  ;;  %v3161_v62 = vpop.f32.mrb[198].mxu1  ;;  %v2810_v63 = vpop.f32.mrb[199].mxu0  ;;  %s4219_s13 = sshll.u32 %s5081_s3, 4  ;;  %s4220_s13 = int_to_ptr.vmem [resolvable:$true] %s4219_s13 }
 0x2be   :  { %4140 = vst [vmem:[#allocation9 + $0x210] sm:$0xff] %v4814_v50  ;;  %v4816_v2 = vpack.c.bf16 %v2807_v57, %v2805_v53  ;;  %v3162_v39 = vadd.f32 %v3161_v62, %v5545_v37  ;;  %v2811_v32 = vadd.f32 %v2810_v63, %v5549_v38  ;;  %v3163_v34 = vpop.f32.mrb[199].mxu1  ;;  %s5040_s14 = scalar_lea.vmem %s4220_s13, 16384  ;;  %p5045_p5 = scmp.lt.s32.totalorder %s4220_s13, %s4220_s13 }
 0x2bf   :  { %4141 = vst [vmem:[#allocation9 + $0x218] sm:$0xff] %v4815_v51  ;;  %v4817_v3 = vpack.c.bf16 %v3160_v60, %v3158_v56  ;;  %v3164_v4 = vadd.f32 %v3163_v34, %v5554_v40  ;;  %v2814_v6 = vpop.f32.mrb[200].mxu0  ;;  %v3167_v8 = vpop.f32.mrb[200].mxu1  ;;  %p5041_p4 = scmp.ne.s32.totalorder %s4220_s13, %s5040_s14  ;;  %p5046_p6 = scmp.lt.s32.totalorder %s5040_s14, %s5040_s14 }
 0x2c0   :  { %4142 = vst [vmem:[#allocation9 + $0x220] sm:$0xff] %v4816_v2  ;;  %v4818_v5 = vpack.c.bf16 %v2811_v32, %v2809_v61  ;;  %v2815_v7 = vadd.f32 %v2814_v6, %v5541_v1  ;;  %v2816_v30 = vpop.f32.mrb[201].mxu0  ;;  %v3168_v36 = vadd.f32 %v3167_v8, %v5545_v37  ;;  %v3169_v10 = vpop.f32.mrb[201].mxu1 }
 0x2c1   :  { %4143 = vst [vmem:[#allocation9 + $0x228] sm:$0xff] %v4817_v3  ;;  %v4819_v35 = vpack.c.bf16 %v3164_v4, %v3162_v39  ;;  %v2817_v9 = vadd.f32 %v2816_v30, %v5549_v38  ;;  %v2818_v11 = vpop.f32.mrb[202].mxu0  ;;  %v3170_v12 = vadd.f32 %v3169_v10, %v5554_v40  ;;  %v3171_v14 = vpop.f32.mrb[202].mxu1  ;;  %p5047_p7 = por %p5046_p6, %p5045_p5 }
 0x2c2   :  { %4144 = vst [vmem:[#allocation9 + $0x230] sm:$0xff] %v4818_v5  ;;  %v2819_v13 = vadd.f32 %v2818_v11, %v5541_v1  ;;  %v2820_v15 = vpop.f32.mrb[203].mxu0  ;;  %v3172_v17 = vadd.f32 %v3171_v14, %v5545_v37  ;;  %v3173_v19 = vpop.f32.mrb[203].mxu1 }
 0x2c3   :  { %4145 = vst [vmem:[#allocation9 + $0x238] sm:$0xff] %v4819_v35  ;;  %v4820_v16 = vpack.c.bf16 %v2817_v9, %v2815_v7  ;;  %v2821_v18 = vadd.f32 %v2820_v15, %v5549_v38  ;;  %v4821_v20 = vpack.c.bf16 %v3170_v12, %v3168_v36  ;;  %v3174_v21 = vadd.f32 %v3173_v19, %v5554_v40  ;;  %p5048_p8 = pnand %p5047_p7, %p5041_p4 }
 0x2c5   :  { %4146 = vst [vmem:[#allocation9 + $0x240] sm:$0xff] %v4820_v16  ;;  %v4822_v22 = vpack.c.bf16 %v2821_v18, %v2819_v13  ;;  %4147 = vst [vmem:[#allocation9 + $0x248] sm:$0xff] %v4821_v20  ;;  %v4823_v23 = vpack.c.bf16 %v3174_v21, %v3172_v17 }
 0x2c7   :  { %4148 = vst [vmem:[#allocation9 + $0x250] sm:$0xff] %v4822_v22  ;;  %v2824_v24 = vpop.f32.mrb[204].mxu0  ;;  %4149 = vst [vmem:[#allocation9 + $0x258] sm:$0xff] %v4823_v23  ;;  %v3177_v26 = vpop.f32.mrb[204].mxu1 }
 0x2c8   :  { %v2825_v25 = vadd.f32 %v2824_v24, %v5541_v1  ;;  %v2826_v27 = vpop.f32.mrb[205].mxu0  ;;  %v3178_v28 = vadd.f32 %v3177_v26, %v5545_v37  ;;  %v3179_v31 = vpop.f32.mrb[205].mxu1 }
 0x2c9   :  { %v2827_v29 = vadd.f32 %v2826_v27, %v5549_v38  ;;  %v2828_v33 = vpop.f32.mrb[206].mxu0  ;;  %v3180_v41 = vadd.f32 %v3179_v31, %v5554_v40  ;;  %v3181_v43 = vpop.f32.mrb[206].mxu1 }
 0x2ca   :  { %v2829_v42 = vadd.f32 %v2828_v33, %v5541_v1  ;;  %v2830_v0 = vpop.f32.mrb[207].mxu0  ;;  %v3182_v45 = vadd.f32 %v3181_v43, %v5545_v37  ;;  %v3183_v47 = vpop.f32.mrb[207].mxu1 }
 0x2cb   :  { %v4824_v44 = vpack.c.bf16 %v2827_v29, %v2825_v25  ;;  %v2831_v46 = vadd.f32 %v2830_v0, %v5549_v38  ;;  %v4825_v48 = vpack.c.bf16 %v3180_v41, %v3178_v28  ;;  %v3184_v49 = vadd.f32 %v3183_v47, %v5554_v40 }
 0x2cd   :  { %4150 = vst [vmem:[#allocation9 + $0x260] sm:$0xff] %v4824_v44  ;;  %v4826_v50 = vpack.c.bf16 %v2831_v46, %v2829_v42  ;;  %4151 = vst [vmem:[#allocation9 + $0x268] sm:$0xff] %v4825_v48  ;;  %v4827_v51 = vpack.c.bf16 %v3184_v49, %v3182_v45 }
 0x2cf   :  { %4152 = vst [vmem:[#allocation9 + $0x270] sm:$0xff] %v4826_v50  ;;  %v2834_v52 = vpop.f32.mrb[208].mxu0  ;;  %4153 = vst [vmem:[#allocation9 + $0x278] sm:$0xff] %v4827_v51  ;;  %v3187_v54 = vpop.f32.mrb[208].mxu1 }
 0x2d0   :  { %v2835_v53 = vadd.f32 %v2834_v52, %v5541_v1  ;;  %v2836_v55 = vpop.f32.mrb[209].mxu0  ;;  %v3188_v56 = vadd.f32 %v3187_v54, %v5545_v37  ;;  %v3189_v58 = vpop.f32.mrb[209].mxu1 }
 0x2d1   :  { %v2837_v57 = vadd.f32 %v2836_v55, %v5549_v38  ;;  %v2838_v59 = vpop.f32.mrb[210].mxu0  ;;  %v3190_v60 = vadd.f32 %v3189_v58, %v5554_v40  ;;  %v3191_v62 = vpop.f32.mrb[210].mxu1 }
 0x2d2   :  { %v2839_v61 = vadd.f32 %v2838_v59, %v5541_v1  ;;  %v2840_v63 = vpop.f32.mrb[211].mxu0  ;;  %v3192_v39 = vadd.f32 %v3191_v62, %v5545_v37  ;;  %v3193_v34 = vpop.f32.mrb[211].mxu1 }
 0x2d3   :  { %v4828_v2 = vpack.c.bf16 %v2837_v57, %v2835_v53  ;;  %v2841_v32 = vadd.f32 %v2840_v63, %v5549_v38  ;;  %v4829_v3 = vpack.c.bf16 %v3190_v60, %v3188_v56  ;;  %v3194_v4 = vadd.f32 %v3193_v34, %v5554_v40 }
 0x2d5   :  { %4154 = vst [vmem:[#allocation9 + $0x280] sm:$0xff] %v4828_v2  ;;  %v4830_v5 = vpack.c.bf16 %v2841_v32, %v2839_v61  ;;  %4155 = vst [vmem:[#allocation9 + $0x288] sm:$0xff] %v4829_v3  ;;  %v4831_v35 = vpack.c.bf16 %v3194_v4, %v3192_v39 }
 0x2d7   :  { %4156 = vst [vmem:[#allocation9 + $0x290] sm:$0xff] %v4830_v5  ;;  %v2844_v6 = vpop.f32.mrb[212].mxu0  ;;  %4157 = vst [vmem:[#allocation9 + $0x298] sm:$0xff] %v4831_v35  ;;  %v3197_v8 = vpop.f32.mrb[212].mxu1 }
 0x2d8   :  { %v2845_v7 = vadd.f32 %v2844_v6, %v5541_v1  ;;  %v2846_v30 = vpop.f32.mrb[213].mxu0  ;;  %v3198_v36 = vadd.f32 %v3197_v8, %v5545_v37  ;;  %v3199_v10 = vpop.f32.mrb[213].mxu1 }
 0x2d9   :  { %v2847_v9 = vadd.f32 %v2846_v30, %v5549_v38  ;;  %v2848_v11 = vpop.f32.mrb[214].mxu0  ;;  %v3200_v12 = vadd.f32 %v3199_v10, %v5554_v40  ;;  %v3201_v14 = vpop.f32.mrb[214].mxu1 }
 0x2da   :  { %v2849_v13 = vadd.f32 %v2848_v11, %v5541_v1  ;;  %v2850_v15 = vpop.f32.mrb[215].mxu0  ;;  %v3202_v17 = vadd.f32 %v3201_v14, %v5545_v37  ;;  %v3203_v19 = vpop.f32.mrb[215].mxu1 }
 0x2db   :  { %v4832_v16 = vpack.c.bf16 %v2847_v9, %v2845_v7  ;;  %v2851_v18 = vadd.f32 %v2850_v15, %v5549_v38  ;;  %v4833_v20 = vpack.c.bf16 %v3200_v12, %v3198_v36  ;;  %v3204_v21 = vadd.f32 %v3203_v19, %v5554_v40 }
 0x2dd   :  { %4158 = vst [vmem:[#allocation9 + $0x2a0] sm:$0xff] %v4832_v16  ;;  %v4834_v22 = vpack.c.bf16 %v2851_v18, %v2849_v13  ;;  %4159 = vst [vmem:[#allocation9 + $0x2a8] sm:$0xff] %v4833_v20  ;;  %v4835_v23 = vpack.c.bf16 %v3204_v21, %v3202_v17 }
 0x2df   :  { %4160 = vst [vmem:[#allocation9 + $0x2b0] sm:$0xff] %v4834_v22  ;;  %v2854_v24 = vpop.f32.mrb[216].mxu0  ;;  %4161 = vst [vmem:[#allocation9 + $0x2b8] sm:$0xff] %v4835_v23  ;;  %v3207_v26 = vpop.f32.mrb[216].mxu1 }
 0x2e0   :  { %v2855_v25 = vadd.f32 %v2854_v24, %v5541_v1  ;;  %v2856_v27 = vpop.f32.mrb[217].mxu0  ;;  %v3208_v28 = vadd.f32 %v3207_v26, %v5545_v37  ;;  %v3209_v31 = vpop.f32.mrb[217].mxu1 }
 0x2e1   :  { %v2857_v29 = vadd.f32 %v2856_v27, %v5549_v38  ;;  %v2858_v33 = vpop.f32.mrb[218].mxu0  ;;  %v3210_v41 = vadd.f32 %v3209_v31, %v5554_v40  ;;  %v3211_v43 = vpop.f32.mrb[218].mxu1 }
 0x2e2   :  { %v2859_v42 = vadd.f32 %v2858_v33, %v5541_v1  ;;  %v2860_v0 = vpop.f32.mrb[219].mxu0  ;;  %v3212_v45 = vadd.f32 %v3211_v43, %v5545_v37  ;;  %v3213_v47 = vpop.f32.mrb[219].mxu1 }
 0x2e3   :  { %v4836_v44 = vpack.c.bf16 %v2857_v29, %v2855_v25  ;;  %v2861_v46 = vadd.f32 %v2860_v0, %v5549_v38  ;;  %v4837_v48 = vpack.c.bf16 %v3210_v41, %v3208_v28  ;;  %v3214_v49 = vadd.f32 %v3213_v47, %v5554_v40 }
 0x2e5   :  { %4162 = vst [vmem:[#allocation9 + $0x2c0] sm:$0xff] %v4836_v44  ;;  %v4838_v50 = vpack.c.bf16 %v2861_v46, %v2859_v42  ;;  %4163 = vst [vmem:[#allocation9 + $0x2c8] sm:$0xff] %v4837_v48  ;;  %v4839_v51 = vpack.c.bf16 %v3214_v49, %v3212_v45 }
 0x2e7   :  { %4164 = vst [vmem:[#allocation9 + $0x2d0] sm:$0xff] %v4838_v50  ;;  %v2864_v52 = vpop.f32.mrb[220].mxu0  ;;  %4165 = vst [vmem:[#allocation9 + $0x2d8] sm:$0xff] %v4839_v51  ;;  %v3217_v54 = vpop.f32.mrb[220].mxu1 }
 0x2e8   :  { %v2865_v53 = vadd.f32 %v2864_v52, %v5541_v1  ;;  %v2866_v55 = vpop.f32.mrb[221].mxu0  ;;  %v3218_v56 = vadd.f32 %v3217_v54, %v5545_v37  ;;  %v3219_v58 = vpop.f32.mrb[221].mxu1 }
 0x2e9   :  { %v2867_v57 = vadd.f32 %v2866_v55, %v5549_v38  ;;  %v2868_v59 = vpop.f32.mrb[222].mxu0  ;;  %v3220_v60 = vadd.f32 %v3219_v58, %v5554_v40  ;;  %v3221_v62 = vpop.f32.mrb[222].mxu1 }
 0x2ea   :  { %v2869_v61 = vadd.f32 %v2868_v59, %v5541_v1  ;;  %v2870_v63 = vpop.f32.mrb[223].mxu0  ;;  %v3222_v39 = vadd.f32 %v3221_v62, %v5545_v37  ;;  %v3223_v34 = vpop.f32.mrb[223].mxu1 }
 0x2eb   :  { %v4840_v2 = vpack.c.bf16 %v2867_v57, %v2865_v53  ;;  %v2871_v32 = vadd.f32 %v2870_v63, %v5549_v38  ;;  %v4841_v3 = vpack.c.bf16 %v3220_v60, %v3218_v56  ;;  %v3224_v4 = vadd.f32 %v3223_v34, %v5554_v40 }
 0x2ed   :  { %4166 = vst [vmem:[#allocation9 + $0x2e0] sm:$0xff] %v4840_v2  ;;  %v4842_v5 = vpack.c.bf16 %v2871_v32, %v2869_v61  ;;  %4167 = vst [vmem:[#allocation9 + $0x2e8] sm:$0xff] %v4841_v3  ;;  %v4843_v35 = vpack.c.bf16 %v3224_v4, %v3222_v39 }
 0x2ef   :  { %4168 = vst [vmem:[#allocation9 + $0x2f0] sm:$0xff] %v4842_v5  ;;  %v2874_v6 = vpop.f32.mrb[224].mxu0  ;;  %4169 = vst [vmem:[#allocation9 + $0x2f8] sm:$0xff] %v4843_v35  ;;  %v3227_v8 = vpop.f32.mrb[224].mxu1 }
 0x2f0   :  { %v2875_v7 = vadd.f32 %v2874_v6, %v5541_v1  ;;  %v2876_v30 = vpop.f32.mrb[225].mxu0  ;;  %v3228_v36 = vadd.f32 %v3227_v8, %v5545_v37  ;;  %v3229_v10 = vpop.f32.mrb[225].mxu1 }
 0x2f1   :  { %v2877_v9 = vadd.f32 %v2876_v30, %v5549_v38  ;;  %v2878_v11 = vpop.f32.mrb[226].mxu0  ;;  %v3230_v12 = vadd.f32 %v3229_v10, %v5554_v40  ;;  %v3231_v14 = vpop.f32.mrb[226].mxu1 }
 0x2f2   :  { %v2879_v13 = vadd.f32 %v2878_v11, %v5541_v1  ;;  %v2880_v15 = vpop.f32.mrb[227].mxu0  ;;  %v3232_v17 = vadd.f32 %v3231_v14, %v5545_v37  ;;  %v3233_v19 = vpop.f32.mrb[227].mxu1 }
 0x2f3   :  { %v4844_v16 = vpack.c.bf16 %v2877_v9, %v2875_v7  ;;  %v2881_v18 = vadd.f32 %v2880_v15, %v5549_v38  ;;  %v4845_v20 = vpack.c.bf16 %v3230_v12, %v3228_v36  ;;  %v3234_v21 = vadd.f32 %v3233_v19, %v5554_v40 }
 0x2f5   :  { %4170 = vst [vmem:[#allocation9 + $0x300] sm:$0xff] %v4844_v16  ;;  %v4846_v22 = vpack.c.bf16 %v2881_v18, %v2879_v13  ;;  %4171 = vst [vmem:[#allocation9 + $0x308] sm:$0xff] %v4845_v20  ;;  %v4847_v23 = vpack.c.bf16 %v3234_v21, %v3232_v17 }
 0x2f7   :  { %4172 = vst [vmem:[#allocation9 + $0x310] sm:$0xff] %v4846_v22  ;;  %v2884_v24 = vpop.f32.mrb[228].mxu0  ;;  %4173 = vst [vmem:[#allocation9 + $0x318] sm:$0xff] %v4847_v23  ;;  %v3237_v26 = vpop.f32.mrb[228].mxu1 }
 0x2f8   :  { %v2885_v25 = vadd.f32 %v2884_v24, %v5541_v1  ;;  %v2886_v27 = vpop.f32.mrb[229].mxu0  ;;  %v3238_v28 = vadd.f32 %v3237_v26, %v5545_v37  ;;  %v3239_v31 = vpop.f32.mrb[229].mxu1 }
 0x2f9   :  { %v2887_v29 = vadd.f32 %v2886_v27, %v5549_v38  ;;  %v2888_v33 = vpop.f32.mrb[230].mxu0  ;;  %v3240_v41 = vadd.f32 %v3239_v31, %v5554_v40  ;;  %v3241_v43 = vpop.f32.mrb[230].mxu1 }
 0x2fa   :  { %v2889_v42 = vadd.f32 %v2888_v33, %v5541_v1  ;;  %v2890_v0 = vpop.f32.mrb[231].mxu0  ;;  %v3242_v45 = vadd.f32 %v3241_v43, %v5545_v37  ;;  %v3243_v47 = vpop.f32.mrb[231].mxu1 }
 0x2fb   :  { %v4848_v44 = vpack.c.bf16 %v2887_v29, %v2885_v25  ;;  %v2891_v46 = vadd.f32 %v2890_v0, %v5549_v38  ;;  %v4849_v48 = vpack.c.bf16 %v3240_v41, %v3238_v28  ;;  %v3244_v49 = vadd.f32 %v3243_v47, %v5554_v40 }
 0x2fd   :  { %4174 = vst [vmem:[#allocation9 + $0x320] sm:$0xff] %v4848_v44  ;;  %v4850_v50 = vpack.c.bf16 %v2891_v46, %v2889_v42  ;;  %4175 = vst [vmem:[#allocation9 + $0x328] sm:$0xff] %v4849_v48  ;;  %v4851_v51 = vpack.c.bf16 %v3244_v49, %v3242_v45 }
 0x2ff   :  { %4176 = vst [vmem:[#allocation9 + $0x330] sm:$0xff] %v4850_v50  ;;  %v2894_v52 = vpop.f32.mrb[232].mxu0  ;;  %4177 = vst [vmem:[#allocation9 + $0x338] sm:$0xff] %v4851_v51  ;;  %v3247_v54 = vpop.f32.mrb[232].mxu1 }
 0x300   :  { %v2895_v53 = vadd.f32 %v2894_v52, %v5541_v1  ;;  %v2896_v55 = vpop.f32.mrb[233].mxu0  ;;  %v3248_v56 = vadd.f32 %v3247_v54, %v5545_v37  ;;  %v3249_v58 = vpop.f32.mrb[233].mxu1 }
 0x301   :  { %v2897_v57 = vadd.f32 %v2896_v55, %v5549_v38  ;;  %v2898_v59 = vpop.f32.mrb[234].mxu0  ;;  %v3250_v60 = vadd.f32 %v3249_v58, %v5554_v40  ;;  %v3251_v62 = vpop.f32.mrb[234].mxu1 }
 0x302   :  { %v2899_v61 = vadd.f32 %v2898_v59, %v5541_v1  ;;  %v2900_v63 = vpop.f32.mrb[235].mxu0  ;;  %v3252_v39 = vadd.f32 %v3251_v62, %v5545_v37  ;;  %v3253_v34 = vpop.f32.mrb[235].mxu1 }
 0x303   :  { %v4852_v2 = vpack.c.bf16 %v2897_v57, %v2895_v53  ;;  %v2901_v32 = vadd.f32 %v2900_v63, %v5549_v38  ;;  %v4853_v3 = vpack.c.bf16 %v3250_v60, %v3248_v56  ;;  %v3254_v4 = vadd.f32 %v3253_v34, %v5554_v40 }
 0x305   :  { %4178 = vst [vmem:[#allocation9 + $0x340] sm:$0xff] %v4852_v2  ;;  %v4854_v5 = vpack.c.bf16 %v2901_v32, %v2899_v61  ;;  %4179 = vst [vmem:[#allocation9 + $0x348] sm:$0xff] %v4853_v3  ;;  %v4855_v35 = vpack.c.bf16 %v3254_v4, %v3252_v39 }
 0x307   :  { %4180 = vst [vmem:[#allocation9 + $0x350] sm:$0xff] %v4854_v5  ;;  %v2904_v6 = vpop.f32.mrb[236].mxu0  ;;  %4181 = vst [vmem:[#allocation9 + $0x358] sm:$0xff] %v4855_v35  ;;  %v3257_v8 = vpop.f32.mrb[236].mxu1 }
 0x308   :  { %v2905_v7 = vadd.f32 %v2904_v6, %v5541_v1  ;;  %v2906_v30 = vpop.f32.mrb[237].mxu0  ;;  %v3258_v36 = vadd.f32 %v3257_v8, %v5545_v37  ;;  %v3259_v10 = vpop.f32.mrb[237].mxu1 }
 0x309   :  { %v2907_v9 = vadd.f32 %v2906_v30, %v5549_v38  ;;  %v2908_v11 = vpop.f32.mrb[238].mxu0  ;;  %v3260_v12 = vadd.f32 %v3259_v10, %v5554_v40  ;;  %v3261_v14 = vpop.f32.mrb[238].mxu1 }
 0x30a   :  { %v2909_v13 = vadd.f32 %v2908_v11, %v5541_v1  ;;  %v2910_v15 = vpop.f32.mrb[239].mxu0  ;;  %v3262_v17 = vadd.f32 %v3261_v14, %v5545_v37  ;;  %v3263_v19 = vpop.f32.mrb[239].mxu1 }
 0x30b   :  { %v4856_v16 = vpack.c.bf16 %v2907_v9, %v2905_v7  ;;  %v2911_v18 = vadd.f32 %v2910_v15, %v5549_v38  ;;  %v4857_v20 = vpack.c.bf16 %v3260_v12, %v3258_v36  ;;  %v3264_v21 = vadd.f32 %v3263_v19, %v5554_v40 }
 0x30d   :  { %4182 = vst [vmem:[#allocation9 + $0x360] sm:$0xff] %v4856_v16  ;;  %v4858_v22 = vpack.c.bf16 %v2911_v18, %v2909_v13  ;;  %4183 = vst [vmem:[#allocation9 + $0x368] sm:$0xff] %v4857_v20  ;;  %v4859_v23 = vpack.c.bf16 %v3264_v21, %v3262_v17 }
 0x30f   :  { %4184 = vst [vmem:[#allocation9 + $0x370] sm:$0xff] %v4858_v22  ;;  %v2914_v24 = vpop.f32.mrb[240].mxu0  ;;  %4185 = vst [vmem:[#allocation9 + $0x378] sm:$0xff] %v4859_v23  ;;  %v3267_v26 = vpop.f32.mrb[240].mxu1 }
 0x310   :  { %v2915_v25 = vadd.f32 %v2914_v24, %v5541_v1  ;;  %v2916_v27 = vpop.f32.mrb[241].mxu0  ;;  %v3268_v28 = vadd.f32 %v3267_v26, %v5545_v37  ;;  %v3269_v31 = vpop.f32.mrb[241].mxu1 }
 0x311   :  { %v2917_v29 = vadd.f32 %v2916_v27, %v5549_v38  ;;  %v2918_v33 = vpop.f32.mrb[242].mxu0  ;;  %v3270_v41 = vadd.f32 %v3269_v31, %v5554_v40  ;;  %v3271_v43 = vpop.f32.mrb[242].mxu1 }
 0x312   :  { %v2919_v42 = vadd.f32 %v2918_v33, %v5541_v1  ;;  %v2920_v0 = vpop.f32.mrb[243].mxu0  ;;  %v3272_v45 = vadd.f32 %v3271_v43, %v5545_v37  ;;  %v3273_v47 = vpop.f32.mrb[243].mxu1 }
 0x313   :  { %v4860_v44 = vpack.c.bf16 %v2917_v29, %v2915_v25  ;;  %v2921_v46 = vadd.f32 %v2920_v0, %v5549_v38  ;;  %v4861_v48 = vpack.c.bf16 %v3270_v41, %v3268_v28  ;;  %v3274_v49 = vadd.f32 %v3273_v47, %v5554_v40 }
 0x315   :  { %4186 = vst [vmem:[#allocation9 + $0x380] sm:$0xff] %v4860_v44  ;;  %v4862_v50 = vpack.c.bf16 %v2921_v46, %v2919_v42  ;;  %4187 = vst [vmem:[#allocation9 + $0x388] sm:$0xff] %v4861_v48  ;;  %v4863_v51 = vpack.c.bf16 %v3274_v49, %v3272_v45 }
 0x317   :  { %4188 = vst [vmem:[#allocation9 + $0x390] sm:$0xff] %v4862_v50  ;;  %v2924_v52 = vpop.f32.mrb[244].mxu0  ;;  %4189 = vst [vmem:[#allocation9 + $0x398] sm:$0xff] %v4863_v51  ;;  %v3277_v54 = vpop.f32.mrb[244].mxu1 }
 0x318   :  { %v2925_v53 = vadd.f32 %v2924_v52, %v5541_v1  ;;  %v2926_v55 = vpop.f32.mrb[245].mxu0  ;;  %v3278_v56 = vadd.f32 %v3277_v54, %v5545_v37  ;;  %v3279_v58 = vpop.f32.mrb[245].mxu1 }
 0x319   :  { %v2927_v57 = vadd.f32 %v2926_v55, %v5549_v38  ;;  %v2928_v59 = vpop.f32.mrb[246].mxu0  ;;  %v3280_v60 = vadd.f32 %v3279_v58, %v5554_v40  ;;  %v3281_v62 = vpop.f32.mrb[246].mxu1 }
 0x31a   :  { %v2929_v61 = vadd.f32 %v2928_v59, %v5541_v1  ;;  %v2930_v63 = vpop.f32.mrb[247].mxu0  ;;  %v3282_v39 = vadd.f32 %v3281_v62, %v5545_v37  ;;  %v3283_v34 = vpop.f32.mrb[247].mxu1 }
 0x31b   :  { %v4864_v2 = vpack.c.bf16 %v2927_v57, %v2925_v53  ;;  %v2931_v32 = vadd.f32 %v2930_v63, %v5549_v38  ;;  %v4865_v3 = vpack.c.bf16 %v3280_v60, %v3278_v56  ;;  %v3284_v4 = vadd.f32 %v3283_v34, %v5554_v40 }
 0x31d   :  { %4190 = vst [vmem:[#allocation9 + $0x3a0] sm:$0xff] %v4864_v2  ;;  %v4866_v5 = vpack.c.bf16 %v2931_v32, %v2929_v61  ;;  %4191 = vst [vmem:[#allocation9 + $0x3a8] sm:$0xff] %v4865_v3  ;;  %v4867_v35 = vpack.c.bf16 %v3284_v4, %v3282_v39 }
 0x31f   :  { %4192 = vst [vmem:[#allocation9 + $0x3b0] sm:$0xff] %v4866_v5  ;;  %v2934_v6 = vpop.f32.mrb[248].mxu0  ;;  %4193 = vst [vmem:[#allocation9 + $0x3b8] sm:$0xff] %v4867_v35  ;;  %v3287_v8 = vpop.f32.mrb[248].mxu1 }
 0x320   :  { %v2935_v7 = vadd.f32 %v2934_v6, %v5541_v1  ;;  %v2936_v30 = vpop.f32.mrb[249].mxu0  ;;  %v3288_v36 = vadd.f32 %v3287_v8, %v5545_v37  ;;  %v3289_v10 = vpop.f32.mrb[249].mxu1 }
 0x321   :  { %v2937_v9 = vadd.f32 %v2936_v30, %v5549_v38  ;;  %v2938_v11 = vpop.f32.mrb[250].mxu0  ;;  %v3290_v12 = vadd.f32 %v3289_v10, %v5554_v40  ;;  %v3291_v14 = vpop.f32.mrb[250].mxu1 }
 0x322   :  { %v2939_v13 = vadd.f32 %v2938_v11, %v5541_v1  ;;  %v2940_v15 = vpop.f32.mrb[251].mxu0  ;;  %v3292_v17 = vadd.f32 %v3291_v14, %v5545_v37  ;;  %v3293_v19 = vpop.f32.mrb[251].mxu1 }
 0x323   :  { %v4868_v16 = vpack.c.bf16 %v2937_v9, %v2935_v7  ;;  %v2941_v18 = vadd.f32 %v2940_v15, %v5549_v38  ;;  %v4869_v20 = vpack.c.bf16 %v3290_v12, %v3288_v36  ;;  %v3294_v21 = vadd.f32 %v3293_v19, %v5554_v40 }
 0x325   :  { %4194 = vst [vmem:[#allocation9 + $0x3c0] sm:$0xff] %v4868_v16  ;;  %v4870_v22 = vpack.c.bf16 %v2941_v18, %v2939_v13  ;;  %4195 = vst [vmem:[#allocation9 + $0x3c8] sm:$0xff] %v4869_v20  ;;  %v4871_v23 = vpack.c.bf16 %v3294_v21, %v3292_v17 }
 0x327   :  { %4196 = vst [vmem:[#allocation9 + $0x3d0] sm:$0xff] %v4870_v22  ;;  %v2944_v24 = vpop.f32.mrb[252].mxu0  ;;  %4197 = vst [vmem:[#allocation9 + $0x3d8] sm:$0xff] %v4871_v23  ;;  %v3297_v26 = vpop.f32.mrb[252].mxu1 }
 0x328   :  { %v2945_v25 = vadd.f32 %v2944_v24, %v5541_v1  ;;  %v2946_v27 = vpop.f32.mrb[253].mxu0  ;;  %v3298_v28 = vadd.f32 %v3297_v26, %v5545_v37  ;;  %v3299_v31 = vpop.f32.mrb[253].mxu1 }
 0x329   :  { %v2947_v29 = vadd.f32 %v2946_v27, %v5549_v38  ;;  %v2948_v33 = vpop.f32.mrb[254].mxu0  ;;  %v3300_v41 = vadd.f32 %v3299_v31, %v5554_v40  ;;  %v3301_v43 = vpop.f32.mrb[254].mxu1 }
 0x32a   :  { %v2949_v42 = vadd.f32 %v2948_v33, %v5541_v1  ;;  %v2950_v0 = vpop.f32.mrb[255].mxu0  ;;  %v3302_v45 = vadd.f32 %v3301_v43, %v5545_v37  ;;  %v3303_v47 = vpop.f32.mrb[255].mxu1 }
 0x32b   :  { %v4872_v44 = vpack.c.bf16 %v2947_v29, %v2945_v25  ;;  %v2951_v46 = vadd.f32 %v2950_v0, %v5549_v38  ;;  %v4873_v48 = vpack.c.bf16 %v3300_v41, %v3298_v28  ;;  %v3304_v49 = vadd.f32 %v3303_v47, %v5554_v40 }
 0x32d   :  { %4198 = vst [vmem:[#allocation9 + $0x3e0] sm:$0xff] %v4872_v44  ;;  %v4874_v50 = vpack.c.bf16 %v2951_v46, %v2949_v42  ;;  %4199 = vst [vmem:[#allocation9 + $0x3e8] sm:$0xff] %v4873_v48  ;;  %v4875_v51 = vpack.c.bf16 %v3304_v49, %v3302_v45 }
 0x32f   :  { %4200 = vst [vmem:[#allocation9 + $0x3f0] sm:$0xff] %v4874_v50  ;;  %4201 = vst [vmem:[#allocation9 + $0x3f8] sm:$0xff] %v4875_v51 }
 0x330   :  { %5051 = shalt.err (!%p5048_p8)
}
 0x331   :  { %s5052_s17 = scalar_lea.hbm %s5855_s4, 16384 }
 0x332   :  { %p5053_p9 = scmp.ne.s32.totalorder %s5855_s4, %s5052_s17  ;;  %p5056_p10 = scmp.lt.u32.totalorder %s5052_s17, %s5855_s4 }
 0x334   :  { %p5058_p11 = pnand %p5056_p10, %p5053_p9 }
 0x336   :  { %5061 = shalt.err (!%p5058_p11)
}
 0x337   :  { %4225 = dma.vmem_to_hbm [thread:$0]  %s4220_s13, 16384, %s5855_s4, [#allocation10], %s5079_s10, %s5079_s10, %s5080_s11  }
 0x338   :  { %5066 = dma.done.wait [#allocation4], 16384  }
 0x339   :  { %5067 = vsyncadd [#allocation4], 4294950912 }
 0x33a   :  { %5068 = dma.done.wait [#allocation10], 16384  }
 0x33b   :  { %5069 = vsyncadd [#allocation10], 4294950912 }
 0x33c   :  { %4232 = vsyncpa [#allocation3], 1 }
 0x33d   :  { %4233 = vsyncpa [#allocation6], 1 }
 0x33e   :  { %4234 = vsyncpa [#allocation4], 1 }
 0x33f   :  { %4235 = vsyncpa [#allocation10], 1 }

</bundles_post_ra>
